<compile_context>
chip_gen: v5e
topology: v5e:2x2
jax: 0.10.0
libtpu: 0.0.40
codegen_flags: <defaults>
</compile_context>

<pallas_src>
import numpy as np
import jax
import jax.numpy as jnp
from jax import lax
from jax.experimental import pallas as pl
from jax.experimental.pallas import tpu as pltpu


# contract last dim of both operands: A @ B^T (same dims as TPU flash attention q.k^T)
_NT_DIMS = (((1,), (1,)), ((), ()))


def _pack_rows(pieces):
    """Pack named 2-D f32 arrays into one [R, 128] slab.

    Each piece starts at an 8-aligned row offset, column 0.  Returns the slab and
    {name: (row_offset, rows, cols)} (Python ints) for static in-kernel slicing.
    """
    offs, padded, r = {}, [], 0
    for name, a in pieces:
        a = jnp.asarray(a, jnp.float32)
        nr, nc = a.shape
        pr = -(-nr // 8) * 8
        padded.append(jnp.pad(a, ((0, pr - nr), (0, 128 - nc))))
        offs[name] = (r, nr, nc)
        r += pr
    return jnp.concatenate(padded, axis=0), offs


# ---------------------------------------------------------------------------
# STGATEncoder forward (single fused pallas_call)
# ---------------------------------------------------------------------------

def stgat_forward(X, rel_rec, rel_send, p):
    f32 = jnp.float32
    B, N, T, F = X.shape
    Tm = T - 1
    BN = B * N
    H = p['mrnn_wh'].shape[-1]
    G4 = 4 * H
    n_out = p['fc_w'].shape[-1]
    n_mo = p['mo_w2'].shape[-1]
    n_io = p['io_w2'].shape[-1]
    n_head = n_mo + n_io

    # ---------------- host-side one-time packing (glue) ----------------
    gate_order = (0, 1, 3, 2)                      # (i, f, o, g)

    def cat_gates(w):
        return jnp.concatenate([w[k] for k in gate_order], axis=1)

    wx_m = cat_gates(p['mrnn_wx'])                 # [16, 4H]
    wmh = cat_gates(p['mrnn_wh'])                  # [H, 4H]
    b_m = cat_gates(p['mrnn_b'])                   # [1, 4H]
    wmx = p['emb_w'] @ wx_m                        # MotionEmbedding folded in
    bm = b_m + p['emb_b'] @ wx_m

    # interact LSTM: single [x | h] weight -> one MXU push per step
    wi = jnp.concatenate([cat_gates(p['irnn_wx']), cat_gates(p['irnn_wh'])], axis=0)
    bi = cat_gates(p['irnn_b'])

    # GAT fc extended with folded attention vectors: columns = [Wh | c_r(+a_b) | c_s]
    fcw_ext = jnp.concatenate(
        [p['fc_w'], p['fc_w'] @ p['a_r'], p['fc_w'] @ p['a_s']], axis=1)
    fcb_ext = jnp.concatenate(
        [p['fc_b'], p['fc_b'] @ p['a_r'] + p['a_b'], p['fc_b'] @ p['a_s']], axis=1)

    # fused output heads: block-diagonal weights acting on [hm | hi]
    w1h = jnp.zeros((2 * H, 128), f32)
    w1h = w1h.at[0:H, 0:64].set(p['mo_w1']).at[H:2 * H, 64:128].set(p['io_w1'])
    b1h = jnp.concatenate([p['mo_b1'], p['io_b1']], axis=1)          # [1, 128]
    w2h = jnp.zeros((128, n_head), f32)
    w2h = w2h.at[0:64, 0:n_mo].set(p['mo_w2']).at[64:128, n_mo:n_head].set(p['io_w2'])
    b2h = jnp.concatenate([p['mo_b2'], p['io_b2']], axis=1)          # [1, n_head]

    # One-hot graph exploited: A[n,m] = mask[n,m] * exp(leaky_relu(c_r[n]+c_s[m]+a_b)).
    # TODO(synk): assumes NRI-style one-hot rel_rec/rel_send (each edge has exactly one
    # receiver and one sender); fractional encodings would need the full matmul path.
    mask = rel_rec.T @ rel_send                                      # [N, N] edge counts
    bdmask = jnp.kron(jnp.eye(B, dtype=f32), mask)                   # batch block-diag
    bdmask_t = jnp.kron(jnp.eye(B, dtype=f32), mask.T)

    # batch folded into rows (row = b*N + n); dX staged time-major for one projection push
    dX = X[:, :, 1:, :] - X[:, :, :-1, :]                            # [B, N, Tm, F]
    dx_rows = jnp.transpose(dX, (2, 0, 1, 3)).reshape(Tm * BN, F)

    slab, off = _pack_rows([
        ('dx', dx_rows), ('wmx', wmx), ('bm', bm), ('wmh', wmh),
        ('wi', wi), ('bi', bi), ('fcw', fcw_ext), ('fcb', fcb_ext),
        ('w1h', w1h), ('b1h', b1h), ('w2h', w2h), ('b2h', b2h),
        ('mask', bdmask), ('maskt', bdmask_t),
    ])
    R = slab.shape[0]

    # ---------------- the fused kernel ----------------
    def kernel(slab_ref, a_ref, heads_ref, gxs_ref):
        def rd(name):
            r0, nr, nc = off[name]
            return slab_ref[r0:r0 + nr, 0:nc]

        # loop-invariant loads / bias broadcasts (hoisted out of the time loop)
        wmh_v = rd('wmh')
        wi_v = rd('wi')
        bi_v = jnp.broadcast_to(rd('bi'), (BN, G4))
        fcw_v = rd('fcw')
        fcb_v = jnp.broadcast_to(rd('fcb'), (BN, n_out + 2))
        mask_v = rd('mask')
        maskt_v = rd('maskt')
        ones_c = jnp.ones((BN, 1), f32)

        # motion-LSTM input projection for ALL timesteps: one MXU push, staged in VMEM
        gxs_ref[...] = (jnp.dot(rd('dx'), rd('wmx'), preferred_element_type=f32)
                        + rd('bm'))

        def gates(g):                      # gate order (i, f, o, g)
            s = jax.nn.sigmoid(g[:, 0:3 * H])
            return s[:, 0:H], s[:, H:2 * H], s[:, 2 * H:3 * H], jnp.tanh(g[:, 3 * H:])

        hm = jnp.zeros((BN, H), f32); cm = jnp.zeros((BN, H), f32)
        hi = jnp.zeros((BN, H), f32); ci = jnp.zeros((BN, H), f32)

        for t in range(Tm):                # Tm small & static -> trace-time unroll
            # ---- motion LSTM step (input part precomputed) ----
            g = gxs_ref[t * BN:(t + 1) * BN, :] + jnp.dot(
                hm, wmh_v, preferred_element_type=f32)
            i_t, f_t, o_t, g_t = gates(g)
            cm = f_t * cm + i_t * g_t
            hm = o_t * jnp.tanh(cm)

            # ---- GraphAttentionLayer: one push gives Wh, c_r(+a_b), c_s ----
            whe = jnp.dot(hm, fcw_v, preferred_element_type=f32) + fcb_v
            wh = whe[:, 0:n_out]
            c_r = whe[:, n_out:n_out + 1]
            c_s = whe[:, n_out + 1:n_out + 2]
            # pre[n,m] = c_r[n] + c_s[m] (+a_b) via A @ B^T; preT is its transpose.
            l_m = jnp.concatenate([ones_c, c_r], axis=1)             # [BN, 2]
            r_m = jnp.concatenate([c_s, ones_c], axis=1)             # [BN, 2]
            pre = lax.dot_general(l_m, r_m, _NT_DIMS, preferred_element_type=f32)
            pre_t = lax.dot_general(r_m, l_m, _NT_DIMS, preferred_element_type=f32)
            a_mat = mask_v * jnp.exp(jnp.where(pre >= 0, pre, 0.2 * pre))
            a_mat_t = maskt_v * jnp.exp(jnp.where(pre_t >= 0, pre_t, 0.2 * pre_t))
            # TODO(synk): `symmetrize` is undefined in the reference; using 0.5*(A + A^T).
            a_sym = 0.5 * (a_mat + a_mat_t)
            a_norm = a_mat / jnp.sum(a_mat, axis=-1, keepdims=True)  # exact division
            h_p = jnp.maximum(jnp.dot(a_norm, wh, preferred_element_type=f32), 0.0)

            a_ref[t] = jnp.concatenate([a_mat, a_sym, a_norm], axis=1)   # [BN, 3*BN]

            # ---- interact LSTM: fused [x | h] weight, one push ----
            gi = jnp.dot(jnp.concatenate([h_p, hi], axis=1), wi_v,
                         preferred_element_type=f32) + bi_v
            i2, f2, o2, g2 = gates(gi)
            ci = f2 * ci + i2 * g2
            hi = o2 * jnp.tanh(ci)

        # ---- fused output heads (dropout p=0 -> identity) ----
        hcat = jnp.concatenate([hm, hi], axis=1)                     # [BN, 2H]
        h1 = jnp.maximum(
            jnp.dot(hcat, rd('w1h'), preferred_element_type=f32) + rd('b1h'), 0.0)
        heads_ref[...] = jnp.maximum(
            jnp.dot(h1, rd('w2h'), preferred_element_type=f32) + rd('b2h'), 0.0)

    a_slab, heads = pl.pallas_call(
        kernel,
        grid=(1,),
        in_specs=[pl.BlockSpec((R, 128), lambda i: (0, 0))],
        out_specs=(
            pl.BlockSpec((Tm, BN, 3 * BN), lambda i: (0, 0, 0)),
            pl.BlockSpec((BN, n_head), lambda i: (0, 0)),
        ),
        out_shape=(
            jax.ShapeDtypeStruct((Tm, BN, 3 * BN), jnp.float32),
            jax.ShapeDtypeStruct((BN, n_head), jnp.float32),
        ),
        scratch_shapes=[pltpu.VMEM((Tm * BN, G4), jnp.float32)],
        compiler_params=pltpu.CompilerParams(
            dimension_semantics=("arbitrary",)),
    )(slab)

    # ---- host glue: unfold batch rows / split the merged A slab ----
    h_T_o = heads.reshape(B, N, n_head)                              # [m_out | h_T_p]

    def take(kind):
        sub = a_slab[:, :, kind * BN:(kind + 1) * BN]                # [Tm, BN, BN]
        return jnp.stack(
            [sub[:, b * N:(b + 1) * N, b * N:(b + 1) * N] for b in range(B)], axis=0)

    return h_T_o, take(0), take(1), take(2)


# ---------------------------------------------------------------------------
# Pure-JAX reference (mirrors the PyTorch forward) for validation
# ---------------------------------------------------------------------------

def reference_forward(X, rel_rec, rel_send, p):
    dX = X[:, :, 1:, :] - X[:, :, :-1, :]
    em = dX @ p['emb_w'] + p['emb_b']

    def lstm_seq(x_seq, wx, wh, b):
        B, N, T, _ = x_seq.shape
        H = wh.shape[-1]
        h = jnp.zeros((B, N, H), jnp.float32)
        c = jnp.zeros_like(h)
        hs = []
        for t in range(T):
            xt = x_seq[:, :, t, :]
            g = [xt @ wx[k] + h @ wh[k] + b[k] for k in range(4)]
            i_t = jax.nn.sigmoid(g[0])
            f_t = jax.nn.sigmoid(g[1])
            g_t = jnp.tanh(g[2])
            o_t = jax.nn.sigmoid(g[3])
            c = f_t * c + i_t * g_t
            h = o_t * jnp.tanh(c)
            hs.append(h)
        return jnp.stack(hs, axis=2)

    hm = lstm_seq(em, p['mrnn_wx'], p['mrnn_wh'], p['mrnn_b'])      # [B,N,Tm,32]

    Wh = hm @ p['fc_w'] + p['fc_b']                                  # [B,N,Tm,16]
    rec = jnp.einsum('en,bnto->beto', rel_rec, Wh)
    snd = jnp.einsum('en,bnto->beto', rel_send, Wh)
    pre = rec @ p['a_r'] + snd @ p['a_s'] + p['a_b']                 # [B,E,Tm,1]
    score = jnp.exp(jnp.where(pre >= 0, pre, 0.2 * pre))[..., 0]     # [B,E,Tm]
    score = jnp.transpose(score, (0, 2, 1))                          # [B,Tm,E]
    A = jnp.einsum('en,bte,em->btnm', rel_rec, score, rel_send)
    A_sym = 0.5 * (A + jnp.swapaxes(A, -1, -2))
    A_norm = A / A.sum(-1, keepdims=True)
    Wh_t = jnp.transpose(Wh, (0, 2, 1, 3))
    h_p = jax.nn.relu(jnp.einsum('btnm,btmo->btno', A_norm, Wh_t))
    em_p = jnp.transpose(h_p, (0, 2, 1, 3))                          # [B,N,Tm,16]

    hi = lstm_seq(em_p, p['irnn_wx'], p['irnn_wh'], p['irnn_b'])
    h_T = hi[:, :, -1, :]

    def mlp(x, w1, b1, w2, b2):
        return jax.nn.relu(jax.nn.relu(x @ w1 + b1) @ w2 + b2)

    m_out = mlp(hm[:, :, -1, :], p['mo_w1'], p['mo_b1'], p['mo_w2'], p['mo_b2'])
    h_T_p = mlp(h_T, p['io_w1'], p['io_b1'], p['io_w2'], p['io_b2'])
    h_T_o = jnp.concatenate([m_out, h_T_p], axis=-1)
    return h_T_o, A, A_sym, A_norm


# ---------------------------------------------------------------------------
# Deterministic parameter construction
# ---------------------------------------------------------------------------

def init_params(key):
    keys = iter(jax.random.split(key, 64))

    def nrm(shape):
        return (0.1 * jax.random.normal(next(keys), shape)).astype(jnp.float32)

    p = {}
    # MotionEmbedding: Linear(4, 16)
    p['emb_w'] = nrm((4, 16))
    p['emb_b'] = jnp.full((1, 16), 0.1, jnp.float32)
    # LSTM cells (gate order i, f, g, o); bias = b_input + b_hidden fused
    for name in ('mrnn', 'irnn'):
        p[name + '_wx'] = jnp.stack([nrm((16, 32)) for _ in range(4)])
        p[name + '_wh'] = jnp.stack([nrm((32, 32)) for _ in range(4)])
        p[name + '_b'] = jnp.full((4, 1, 32), 0.1, jnp.float32)
    # GAT: fc Linear(32,16), a Linear(32,1) split into receiver/sender halves
    p['fc_w'] = nrm((32, 16))
    p['fc_b'] = jnp.full((1, 16), 0.1, jnp.float32)
    p['a_r'] = nrm((16, 1))
    p['a_s'] = nrm((16, 1))
    p['a_b'] = jnp.full((1, 1), 0.1, jnp.float32)
    # motion_out MLP(32, 64, 24), interact_out MLP(32, 64, 16)
    p['mo_w1'] = nrm((32, 64)); p['mo_b1'] = jnp.full((1, 64), 0.1, jnp.float32)
    p['mo_w2'] = nrm((64, 24)); p['mo_b2'] = jnp.full((1, 24), 0.1, jnp.float32)
    p['io_w1'] = nrm((32, 64)); p['io_b1'] = jnp.full((1, 64), 0.1, jnp.float32)
    p['io_w2'] = nrm((64, 16)); p['io_b2'] = jnp.full((1, 16), 0.1, jnp.float32)
    return p


# ---------------------------------------------------------------------------

if __name__ == "__main__":
    key = jax.random.PRNGKey(0)
    kx, kp = jax.random.split(key)

    B, N, T, F = 2, 5, 8, 4                    # batch, atoms, timesteps, features
    X = jax.random.normal(kx, (B, N, T, F), jnp.float32)

    # Fully-connected directed graph without self loops (NRI-style one-hot encodings)
    off_diag = np.ones((N, N), np.float32) - np.eye(N, dtype=np.float32)
    recv_idx, send_idx = np.where(off_diag)
    rel_rec = jnp.asarray(np.eye(N, dtype=np.float32)[recv_idx])    # [E, N], E = 20
    rel_send = jnp.asarray(np.eye(N, dtype=np.float32)[send_idx])   # [E, N]

    params = init_params(kp)

    fwd = jax.jit(stgat_forward)
    outs = fwd(X, rel_rec, rel_send, params)
    outs = jax.block_until_ready(outs)

    refs = reference_forward(X, rel_rec, rel_send, params)
    for o, r in zip(outs, refs):
        np.testing.assert_allclose(np.asarray(o), np.asarray(r), rtol=5e-2, atol=5e-2)

    print("KERNEL_OK")
</pallas_src>

<mosaic_0001>
module attributes {stable_mosaic.version = 11 : i64} {
  func.func @kernel(%arg0: i32, %arg1: memref<456x128xf32, #tpu.memory_space<vmem>>, %arg2: memref<7x10x30xf32, #tpu.memory_space<vmem>>, %arg3: memref<10x40xf32, #tpu.memory_space<vmem>>, %arg4: memref<70x128xf32, #tpu.memory_space<vmem>>) attributes {dimension_semantics = [#tpu.dimension_semantics<arbitrary>], iteration_bounds = array<i64: 1>, scalar_prefetch = 0 : i64, scratch_operands = 1 : i64, tpu.core_type = #tpu.core_type<tc>, window_params = [{pipeline_mode = #tpu.pipeline_mode<synchronous>, transform_indices = @transform_0, window_bounds = array<i64: 456, 128>}, {pipeline_mode = #tpu.pipeline_mode<synchronous>, transform_indices = @transform_1, window_bounds = array<i64: 7, 10, 30>}, {pipeline_mode = #tpu.pipeline_mode<synchronous>, transform_indices = @transform_2, window_bounds = array<i64: 10, 40>}]} {
    %c88 = arith.constant 88 : index
    %c0 = arith.constant 0 : index
    %0 = vector.load %arg1[%c88, %c0] : memref<456x128xf32, #tpu.memory_space<vmem>>, vector<32x128xf32>
    %c120 = arith.constant 120 : index
    %c0_0 = arith.constant 0 : index
    %1 = vector.load %arg1[%c120, %c0_0] : memref<456x128xf32, #tpu.memory_space<vmem>>, vector<48x128xf32>
    %c168 = arith.constant 168 : index
    %c0_1 = arith.constant 0 : index
    %2 = vector.load %arg1[%c168, %c0_1] : memref<456x128xf32, #tpu.memory_space<vmem>>, vector<1x128xf32>
    %3 = vector.shape_cast %2 : vector<1x128xf32> to vector<1x128xf32>
    %4 = vector.broadcast %3 : vector<1x128xf32> to vector<10x128xf32>
    %c176 = arith.constant 176 : index
    %c0_2 = arith.constant 0 : index
    %5 = vector.load %arg1[%c176, %c0_2] : memref<456x128xf32, #tpu.memory_space<vmem>>, vector<32x18xf32>
    %c208 = arith.constant 208 : index
    %c0_3 = arith.constant 0 : index
    %6 = vector.load %arg1[%c208, %c0_3] : memref<456x128xf32, #tpu.memory_space<vmem>>, vector<1x18xf32>
    %7 = vector.shape_cast %6 : vector<1x18xf32> to vector<1x18xf32>
    %8 = vector.broadcast %7 : vector<1x18xf32> to vector<10x18xf32>
    %c424 = arith.constant 424 : index
    %c0_4 = arith.constant 0 : index
    %9 = vector.load %arg1[%c424, %c0_4] : memref<456x128xf32, #tpu.memory_space<vmem>>, vector<10x10xf32>
    %c440 = arith.constant 440 : index
    %c0_5 = arith.constant 0 : index
    %10 = vector.load %arg1[%c440, %c0_5] : memref<456x128xf32, #tpu.memory_space<vmem>>, vector<10x10xf32>
    %cst = arith.constant 1.000000e+00 : f32
    %11 = vector.broadcast %cst : f32 to vector<10x1xf32>
    %c0_6 = arith.constant 0 : index
    %c0_7 = arith.constant 0 : index
    %12 = vector.load %arg1[%c0_6, %c0_7] : memref<456x128xf32, #tpu.memory_space<vmem>>, vector<70x4xf32>
    %c72 = arith.constant 72 : index
    %c0_8 = arith.constant 0 : index
    %13 = vector.load %arg1[%c72, %c0_8] : memref<456x128xf32, #tpu.memory_space<vmem>>, vector<4x128xf32>
    %cst_9 = arith.constant dense<0.000000e+00> : vector<70x128xf32>
    %14 = tpu.matmul %12, %13, %cst_9 {dimension_numbers = #tpu.dot_dimension_numbers<[1], [0], [0], [1], [0, 0, 1, 1], [], []>} : vector<70x4xf32>, vector<4x128xf32>, vector<70x128xf32> -> vector<70x128xf32>
    %c80 = arith.constant 80 : index
    %c0_10 = arith.constant 0 : index
    %15 = vector.load %arg1[%c80, %c0_10] : memref<456x128xf32, #tpu.memory_space<vmem>>, vector<1x128xf32>
    %16 = vector.broadcast %15 : vector<1x128xf32> to vector<70x128xf32>
    %17 = arith.addf %14, %16 : vector<70x128xf32>
    %c0_11 = arith.constant 0 : index
    %c0_12 = arith.constant 0 : index
    %18 = vector.load %arg4[%c0_11, %c0_12] : memref<70x128xf32, #tpu.memory_space<vmem>>, vector<70x128xf32>
    tpu.vector_store %arg4[%c0_11, %c0_12], %17 {strides = array<i32>} : memref<70x128xf32, #tpu.memory_space<vmem>>, vector<70x128xf32>,
    %cst_13 = arith.constant 0.000000e+00 : f32
    %19 = vector.broadcast %cst_13 : f32 to vector<10x32xf32>
    %cst_14 = arith.constant 0.000000e+00 : f32
    %20 = vector.broadcast %cst_14 : f32 to vector<10x32xf32>
    %cst_15 = arith.constant 0.000000e+00 : f32
    %21 = vector.broadcast %cst_15 : f32 to vector<10x32xf32>
    %cst_16 = arith.constant 0.000000e+00 : f32
    %22 = vector.broadcast %cst_16 : f32 to vector<10x32xf32>
    %c0_17 = arith.constant 0 : index
    %c0_18 = arith.constant 0 : index
    %23 = vector.load %arg4[%c0_17, %c0_18] : memref<70x128xf32, #tpu.memory_space<vmem>>, vector<10x128xf32>
    %cst_19 = arith.constant dense<0.000000e+00> : vector<10x128xf32>
    %24 = tpu.matmul %19, %0, %cst_19 {dimension_numbers = #tpu.dot_dimension_numbers<[1], [0], [0], [1], [0, 0, 1, 1], [], []>} : vector<10x32xf32>, vector<32x128xf32>, vector<10x128xf32> -> vector<10x128xf32>
    %25 = arith.addf %23, %24 : vector<10x128xf32>
    %26 = vector.extract_strided_slice %25 {offsets = [0, 0], sizes = [10, 96], strides = [1, 1]} : vector<10x128xf32> to vector<10x96xf32>
    %27 = arith.negf %26 : vector<10x96xf32>
    %28 = math.exp %27 : vector<10x96xf32>
    %cst_20 = arith.constant 1.000000e+00 : f32
    %29 = vector.broadcast %cst_20 : f32 to vector<10x96xf32>
    %30 = arith.addf %29, %28 : vector<10x96xf32>
    %31 = arith.divf %29, %30 : vector<10x96xf32>
    %32 = vector.extract_strided_slice %31 {offsets = [0, 0], sizes = [10, 32], strides = [1, 1]} : vector<10x96xf32> to vector<10x32xf32>
    %33 = vector.extract_strided_slice %31 {offsets = [0, 32], sizes = [10, 32], strides = [1, 1]} : vector<10x96xf32> to vector<10x32xf32>
    %34 = vector.extract_strided_slice %31 {offsets = [0, 64], sizes = [10, 32], strides = [1, 1]} : vector<10x96xf32> to vector<10x32xf32>
    %35 = vector.extract_strided_slice %25 {offsets = [0, 96], sizes = [10, 32], strides = [1, 1]} : vector<10x128xf32> to vector<10x32xf32>
    %36 = math.tanh %35 : vector<10x32xf32>
    %37 = arith.mulf %33, %20 : vector<10x32xf32>
    %38 = arith.mulf %32, %36 : vector<10x32xf32>
    %39 = arith.addf %37, %38 : vector<10x32xf32>
    %40 = math.tanh %39 : vector<10x32xf32>
    %41 = arith.mulf %34, %40 : vector<10x32xf32>
    %cst_21 = arith.constant dense<0.000000e+00> : vector<10x18xf32>
    %42 = tpu.matmul %41, %5, %cst_21 {dimension_numbers = #tpu.dot_dimension_numbers<[1], [0], [0], [1], [0, 0, 1, 1], [], []>} : vector<10x32xf32>, vector<32x18xf32>, vector<10x18xf32> -> vector<10x18xf32>
    %43 = arith.addf %42, %8 : vector<10x18xf32>
    %44 = vector.extract_strided_slice %43 {offsets = [0, 0], sizes = [10, 16], strides = [1, 1]} : vector<10x18xf32> to vector<10x16xf32>
    %45 = vector.extract_strided_slice %43 {offsets = [0, 16], sizes = [10, 1], strides = [1, 1]} : vector<10x18xf32> to vector<10x1xf32>
    %46 = vector.extract_strided_slice %43 {offsets = [0, 17], sizes = [10, 1], strides = [1, 1]} : vector<10x18xf32> to vector<10x1xf32>
    %47 = tpu.concatenate %11, %45 in 1 : vector<10x1xf32>, vector<10x1xf32> -> vector<10x2xf32>
    %48 = tpu.concatenate %46, %11 in 1 : vector<10x1xf32>, vector<10x1xf32> -> vector<10x2xf32>
    %cst_22 = arith.constant dense<0.000000e+00> : vector<10x10xf32>
    %49 = tpu.matmul %47, %48, %cst_22 {dimension_numbers = #tpu.dot_dimension_numbers<[1], [1], [0], [0], [0, 0, 1, 0], [], []>} : vector<10x2xf32>, vector<10x2xf32>, vector<10x10xf32> -> vector<10x10xf32>
    %cst_23 = arith.constant dense<0.000000e+00> : vector<10x10xf32>
    %50 = tpu.matmul %48, %47, %cst_23 {dimension_numbers = #tpu.dot_dimension_numbers<[1], [1], [0], [0], [0, 0, 1, 0], [], []>} : vector<10x2xf32>, vector<10x2xf32>, vector<10x10xf32> -> vector<10x10xf32>
    %cst_24 = arith.constant 0.000000e+00 : f32
    %51 = vector.broadcast %cst_24 : f32 to vector<10x10xf32>
    %52 = arith.cmpf oge, %49, %51 : vector<10x10xf32>
    %cst_25 = arith.constant 2.000000e-01 : f32
    %53 = vector.broadcast %cst_25 : f32 to vector<10x10xf32>
    %54 = arith.mulf %53, %49 : vector<10x10xf32>
    %55 = arith.select %52, %49, %54 : vector<10x10xi1>, vector<10x10xf32>
    %56 = math.exp %55 : vector<10x10xf32>
    %57 = arith.mulf %9, %56 : vector<10x10xf32>
    %cst_26 = arith.constant 0.000000e+00 : f32
    %58 = vector.broadcast %cst_26 : f32 to vector<10x10xf32>
    %59 = arith.cmpf oge, %50, %58 : vector<10x10xf32>
    %cst_27 = arith.constant 2.000000e-01 : f32
    %60 = vector.broadcast %cst_27 : f32 to vector<10x10xf32>
    %61 = arith.mulf %60, %50 : vector<10x10xf32>
    %62 = arith.select %59, %50, %61 : vector<10x10xi1>, vector<10x10xf32>
    %63 = math.exp %62 : vector<10x10xf32>
    %64 = arith.mulf %10, %63 : vector<10x10xf32>
    %65 = arith.addf %57, %64 : vector<10x10xf32>
    %cst_28 = arith.constant 5.000000e-01 : f32
    %66 = vector.broadcast %cst_28 : f32 to vector<10x10xf32>
    %67 = arith.mulf %66, %65 : vector<10x10xf32>
    %cst_29 = arith.constant dense<0.000000e+00> : vector<10xf32>
    %68 = vector.multi_reduction <add>, %57, %cst_29 [1] : vector<10x10xf32> to vector<10xf32>
    %69 = vector.shape_cast %68 : vector<10xf32> to vector<10x1xf32>
    %70 = vector.broadcast %69 : vector<10x1xf32> to vector<10x10xf32>
    %71 = arith.divf %57, %70 : vector<10x10xf32>
    %cst_30 = arith.constant dense<0.000000e+00> : vector<10x16xf32>
    %72 = tpu.matmul %71, %44, %cst_30 {dimension_numbers = #tpu.dot_dimension_numbers<[1], [0], [0], [1], [0, 0, 1, 1], [], []>} : vector<10x10xf32>, vector<10x16xf32>, vector<10x16xf32> -> vector<10x16xf32>
    %cst_31 = arith.constant 0.000000e+00 : f32
    %73 = vector.broadcast %cst_31 : f32 to vector<10x16xf32>
    %74 = arith.maximumf %72, %73 : vector<10x16xf32>
    %75 = tpu.concatenate %57, %67, %71 in 1 : vector<10x10xf32>, vector<10x10xf32>, vector<10x10xf32> -> vector<10x30xf32>
    %c0_32 = arith.constant 0 : index
    %c0_33 = arith.constant 0 : index
    %c0_34 = arith.constant 0 : index
    %76 = vector.load %arg2[%c0_32, %c0_33, %c0_34] : memref<7x10x30xf32, #tpu.memory_space<vmem>>, vector<1x10x30xf32>
    %77 = vector.shape_cast %76 : vector<1x10x30xf32> to vector<10x30xf32>
    %78 = vector.shape_cast %75 : vector<10x30xf32> to vector<1x10x30xf32>
    tpu.vector_store %arg2[%c0_32, %c0_33, %c0_34], %78 {strides = array<i32>} : memref<7x10x30xf32, #tpu.memory_space<vmem>>, vector<1x10x30xf32>,
    %79 = tpu.concatenate %74, %21 in 1 : vector<10x16xf32>, vector<10x32xf32> -> vector<10x48xf32>
    %cst_35 = arith.constant dense<0.000000e+00> : vector<10x128xf32>
    %80 = tpu.matmul %79, %1, %cst_35 {dimension_numbers = #tpu.dot_dimension_numbers<[1], [0], [0], [1], [0, 0, 1, 1], [], []>} : vector<10x48xf32>, vector<48x128xf32>, vector<10x128xf32> -> vector<10x128xf32>
    %81 = arith.addf %80, %4 : vector<10x128xf32>
    %82 = vector.extract_strided_slice %81 {offsets = [0, 0], sizes = [10, 96], strides = [1, 1]} : vector<10x128xf32> to vector<10x96xf32>
    %83 = arith.negf %82 : vector<10x96xf32>
    %84 = math.exp %83 : vector<10x96xf32>
    %cst_36 = arith.constant 1.000000e+00 : f32
    %85 = vector.broadcast %cst_36 : f32 to vector<10x96xf32>
    %86 = arith.addf %85, %84 : vector<10x96xf32>
    %87 = arith.divf %85, %86 : vector<10x96xf32>
    %88 = vector.extract_strided_slice %87 {offsets = [0, 0], sizes = [10, 32], strides = [1, 1]} : vector<10x96xf32> to vector<10x32xf32>
    %89 = vector.extract_strided_slice %87 {offsets = [0, 32], sizes = [10, 32], strides = [1, 1]} : vector<10x96xf32> to vector<10x32xf32>
    %90 = vector.extract_strided_slice %87 {offsets = [0, 64], sizes = [10, 32], strides = [1, 1]} : vector<10x96xf32> to vector<10x32xf32>
    %91 = vector.extract_strided_slice %81 {offsets = [0, 96], sizes = [10, 32], strides = [1, 1]} : vector<10x128xf32> to vector<10x32xf32>
    %92 = math.tanh %91 : vector<10x32xf32>
    %93 = arith.mulf %89, %22 : vector<10x32xf32>
    %94 = arith.mulf %88, %92 : vector<10x32xf32>
    %95 = arith.addf %93, %94 : vector<10x32xf32>
    %96 = math.tanh %95 : vector<10x32xf32>
    %97 = arith.mulf %90, %96 : vector<10x32xf32>
    %c10 = arith.constant 10 : index
    %c0_37 = arith.constant 0 : index
    %98 = vector.load %arg4[%c10, %c0_37] : memref<70x128xf32, #tpu.memory_space<vmem>>, vector<10x128xf32>
    %cst_38 = arith.constant dense<0.000000e+00> : vector<10x128xf32>
    %99 = tpu.matmul %41, %0, %cst_38 {dimension_numbers = #tpu.dot_dimension_numbers<[1], [0], [0], [1], [0, 0, 1, 1], [], []>} : vector<10x32xf32>, vector<32x128xf32>, vector<10x128xf32> -> vector<10x128xf32>
    %100 = arith.addf %98, %99 : vector<10x128xf32>
    %101 = vector.extract_strided_slice %100 {offsets = [0, 0], sizes = [10, 96], strides = [1, 1]} : vector<10x128xf32> to vector<10x96xf32>
    %102 = arith.negf %101 : vector<10x96xf32>
    %103 = math.exp %102 : vector<10x96xf32>
    %cst_39 = arith.constant 1.000000e+00 : f32
    %104 = vector.broadcast %cst_39 : f32 to vector<10x96xf32>
    %105 = arith.addf %104, %103 : vector<10x96xf32>
    %106 = arith.divf %104, %105 : vector<10x96xf32>
    %107 = vector.extract_strided_slice %106 {offsets = [0, 0], sizes = [10, 32], strides = [1, 1]} : vector<10x96xf32> to vector<10x32xf32>
    %108 = vector.extract_strided_slice %106 {offsets = [0, 32], sizes = [10, 32], strides = [1, 1]} : vector<10x96xf32> to vector<10x32xf32>
    %109 = vector.extract_strided_slice %106 {offsets = [0, 64], sizes = [10, 32], strides = [1, 1]} : vector<10x96xf32> to vector<10x32xf32>
    %110 = vector.extract_strided_slice %100 {offsets = [0, 96], sizes = [10, 32], strides = [1, 1]} : vector<10x128xf32> to vector<10x32xf32>
    %111 = math.tanh %110 : vector<10x32xf32>
    %112 = arith.mulf %108, %39 : vector<10x32xf32>
    %113 = arith.mulf %107, %111 : vector<10x32xf32>
    %114 = arith.addf %112, %113 : vector<10x32xf32>
    %115 = math.tanh %114 : vector<10x32xf32>
    %116 = arith.mulf %109, %115 : vector<10x32xf32>
    %cst_40 = arith.constant dense<0.000000e+00> : vector<10x18xf32>
    %117 = tpu.matmul %116, %5, %cst_40 {dimension_numbers = #tpu.dot_dimension_numbers<[1], [0], [0], [1], [0, 0, 1, 1], [], []>} : vector<10x32xf32>, vector<32x18xf32>, vector<10x18xf32> -> vector<10x18xf32>
    %118 = arith.addf %117, %8 : vector<10x18xf32>
    %119 = vector.extract_strided_slice %118 {offsets = [0, 0], sizes = [10, 16], strides = [1, 1]} : vector<10x18xf32> to vector<10x16xf32>
    %120 = vector.extract_strided_slice %118 {offsets = [0, 16], sizes = [10, 1], strides = [1, 1]} : vector<10x18xf32> to vector<10x1xf32>
    %121 = vector.extract_strided_slice %118 {offsets = [0, 17], sizes = [10, 1], strides = [1, 1]} : vector<10x18xf32> to vector<10x1xf32>
    %122 = tpu.concatenate %11, %120 in 1 : vector<10x1xf32>, vector<10x1xf32> -> vector<10x2xf32>
    %123 = tpu.concatenate %121, %11 in 1 : vector<10x1xf32>, vector<10x1xf32> -> vector<10x2xf32>
    %cst_41 = arith.constant dense<0.000000e+00> : vector<10x10xf32>
    %124 = tpu.matmul %122, %123, %cst_41 {dimension_numbers = #tpu.dot_dimension_numbers<[1], [1], [0], [0], [0, 0, 1, 0], [], []>} : vector<10x2xf32>, vector<10x2xf32>, vector<10x10xf32> -> vector<10x10xf32>
    %cst_42 = arith.constant dense<0.000000e+00> : vector<10x10xf32>
    %125 = tpu.matmul %123, %122, %cst_42 {dimension_numbers = #tpu.dot_dimension_numbers<[1], [1], [0], [0], [0, 0, 1, 0], [], []>} : vector<10x2xf32>, vector<10x2xf32>, vector<10x10xf32> -> vector<10x10xf32>
    %cst_43 = arith.constant 0.000000e+00 : f32
    %126 = vector.broadcast %cst_43 : f32 to vector<10x10xf32>
    %127 = arith.cmpf oge, %124, %126 : vector<10x10xf32>
    %cst_44 = arith.constant 2.000000e-01 : f32
    %128 = vector.broadcast %cst_44 : f32 to vector<10x10xf32>
    %129 = arith.mulf %128, %124 : vector<10x10xf32>
    %130 = arith.select %127, %124, %129 : vector<10x10xi1>, vector<10x10xf32>
    %131 = math.exp %130 : vector<10x10xf32>
    %132 = arith.mulf %9, %131 : vector<10x10xf32>
    %cst_45 = arith.constant 0.000000e+00 : f32
    %133 = vector.broadcast %cst_45 : f32 to vector<10x10xf32>
    %134 = arith.cmpf oge, %125, %133 : vector<10x10xf32>
    %cst_46 = arith.constant 2.000000e-01 : f32
    %135 = vector.broadcast %cst_46 : f32 to vector<10x10xf32>
    %136 = arith.mulf %135, %125 : vector<10x10xf32>
    %137 = arith.select %134, %125, %136 : vector<10x10xi1>, vector<10x10xf32>
    %138 = math.exp %137 : vector<10x10xf32>
    %139 = arith.mulf %10, %138 : vector<10x10xf32>
    %140 = arith.addf %132, %139 : vector<10x10xf32>
    %cst_47 = arith.constant 5.000000e-01 : f32
    %141 = vector.broadcast %cst_47 : f32 to vector<10x10xf32>
    %142 = arith.mulf %141, %140 : vector<10x10xf32>
    %cst_48 = arith.constant dense<0.000000e+00> : vector<10xf32>
    %143 = vector.multi_reduction <add>, %132, %cst_48 [1] : vector<10x10xf32> to vector<10xf32>
    %144 = vector.shape_cast %143 : vector<10xf32> to vector<10x1xf32>
    %145 = vector.broadcast %144 : vector<10x1xf32> to vector<10x10xf32>
    %146 = arith.divf %132, %145 : vector<10x10xf32>
    %cst_49 = arith.constant dense<0.000000e+00> : vector<10x16xf32>
    %147 = tpu.matmul %146, %119, %cst_49 {dimension_numbers = #tpu.dot_dimension_numbers<[1], [0], [0], [1], [0, 0, 1, 1], [], []>} : vector<10x10xf32>, vector<10x16xf32>, vector<10x16xf32> -> vector<10x16xf32>
    %cst_50 = arith.constant 0.000000e+00 : f32
    %148 = vector.broadcast %cst_50 : f32 to vector<10x16xf32>
    %149 = arith.maximumf %147, %148 : vector<10x16xf32>
    %150 = tpu.concatenate %132, %142, %146 in 1 : vector<10x10xf32>, vector<10x10xf32>, vector<10x10xf32> -> vector<10x30xf32>
    %c1 = arith.constant 1 : index
    %c0_51 = arith.constant 0 : index
    %c0_52 = arith.constant 0 : index
    %151 = vector.load %arg2[%c1, %c0_51, %c0_52] : memref<7x10x30xf32, #tpu.memory_space<vmem>>, vector<1x10x30xf32>
    %152 = vector.shape_cast %151 : vector<1x10x30xf32> to vector<10x30xf32>
    %153 = vector.shape_cast %150 : vector<10x30xf32> to vector<1x10x30xf32>
    tpu.vector_store %arg2[%c1, %c0_51, %c0_52], %153 {strides = array<i32>} : memref<7x10x30xf32, #tpu.memory_space<vmem>>, vector<1x10x30xf32>,
    %154 = tpu.concatenate %149, %97 in 1 : vector<10x16xf32>, vector<10x32xf32> -> vector<10x48xf32>
    %cst_53 = arith.constant dense<0.000000e+00> : vector<10x128xf32>
    %155 = tpu.matmul %154, %1, %cst_53 {dimension_numbers = #tpu.dot_dimension_numbers<[1], [0], [0], [1], [0, 0, 1, 1], [], []>} : vector<10x48xf32>, vector<48x128xf32>, vector<10x128xf32> -> vector<10x128xf32>
    %156 = arith.addf %155, %4 : vector<10x128xf32>
    %157 = vector.extract_strided_slice %156 {offsets = [0, 0], sizes = [10, 96], strides = [1, 1]} : vector<10x128xf32> to vector<10x96xf32>
    %158 = arith.negf %157 : vector<10x96xf32>
    %159 = math.exp %158 : vector<10x96xf32>
    %cst_54 = arith.constant 1.000000e+00 : f32
    %160 = vector.broadcast %cst_54 : f32 to vector<10x96xf32>
    %161 = arith.addf %160, %159 : vector<10x96xf32>
    %162 = arith.divf %160, %161 : vector<10x96xf32>
    %163 = vector.extract_strided_slice %162 {offsets = [0, 0], sizes = [10, 32], strides = [1, 1]} : vector<10x96xf32> to vector<10x32xf32>
    %164 = vector.extract_strided_slice %162 {offsets = [0, 32], sizes = [10, 32], strides = [1, 1]} : vector<10x96xf32> to vector<10x32xf32>
    %165 = vector.extract_strided_slice %162 {offsets = [0, 64], sizes = [10, 32], strides = [1, 1]} : vector<10x96xf32> to vector<10x32xf32>
    %166 = vector.extract_strided_slice %156 {offsets = [0, 96], sizes = [10, 32], strides = [1, 1]} : vector<10x128xf32> to vector<10x32xf32>
    %167 = math.tanh %166 : vector<10x32xf32>
    %168 = arith.mulf %164, %95 : vector<10x32xf32>
    %169 = arith.mulf %163, %167 : vector<10x32xf32>
    %170 = arith.addf %168, %169 : vector<10x32xf32>
    %171 = math.tanh %170 : vector<10x32xf32>
    %172 = arith.mulf %165, %171 : vector<10x32xf32>
    %c20 = arith.constant 20 : index
    %c0_55 = arith.constant 0 : index
    %173 = vector.load %arg4[%c20, %c0_55] : memref<70x128xf32, #tpu.memory_space<vmem>>, vector<10x128xf32>
    %cst_56 = arith.constant dense<0.000000e+00> : vector<10x128xf32>
    %174 = tpu.matmul %116, %0, %cst_56 {dimension_numbers = #tpu.dot_dimension_numbers<[1], [0], [0], [1], [0, 0, 1, 1], [], []>} : vector<10x32xf32>, vector<32x128xf32>, vector<10x128xf32> -> vector<10x128xf32>
    %175 = arith.addf %173, %174 : vector<10x128xf32>
    %176 = vector.extract_strided_slice %175 {offsets = [0, 0], sizes = [10, 96], strides = [1, 1]} : vector<10x128xf32> to vector<10x96xf32>
    %177 = arith.negf %176 : vector<10x96xf32>
    %178 = math.exp %177 : vector<10x96xf32>
    %cst_57 = arith.constant 1.000000e+00 : f32
    %179 = vector.broadcast %cst_57 : f32 to vector<10x96xf32>
    %180 = arith.addf %179, %178 : vector<10x96xf32>
    %181 = arith.divf %179, %180 : vector<10x96xf32>
    %182 = vector.extract_strided_slice %181 {offsets = [0, 0], sizes = [10, 32], strides = [1, 1]} : vector<10x96xf32> to vector<10x32xf32>
    %183 = vector.extract_strided_slice %181 {offsets = [0, 32], sizes = [10, 32], strides = [1, 1]} : vector<10x96xf32> to vector<10x32xf32>
    %184 = vector.extract_strided_slice %181 {offsets = [0, 64], sizes = [10, 32], strides = [1, 1]} : vector<10x96xf32> to vector<10x32xf32>
    %185 = vector.extract_strided_slice %175 {offsets = [0, 96], sizes = [10, 32], strides = [1, 1]} : vector<10x128xf32> to vector<10x32xf32>
    %186 = math.tanh %185 : vector<10x32xf32>
    %187 = arith.mulf %183, %114 : vector<10x32xf32>
    %188 = arith.mulf %182, %186 : vector<10x32xf32>
    %189 = arith.addf %187, %188 : vector<10x32xf32>
    %190 = math.tanh %189 : vector<10x32xf32>
    %191 = arith.mulf %184, %190 : vector<10x32xf32>
    %cst_58 = arith.constant dense<0.000000e+00> : vector<10x18xf32>
    %192 = tpu.matmul %191, %5, %cst_58 {dimension_numbers = #tpu.dot_dimension_numbers<[1], [0], [0], [1], [0, 0, 1, 1], [], []>} : vector<10x32xf32>, vector<32x18xf32>, vector<10x18xf32> -> vector<10x18xf32>
    %193 = arith.addf %192, %8 : vector<10x18xf32>
    %194 = vector.extract_strided_slice %193 {offsets = [0, 0], sizes = [10, 16], strides = [1, 1]} : vector<10x18xf32> to vector<10x16xf32>
    %195 = vector.extract_strided_slice %193 {offsets = [0, 16], sizes = [10, 1], strides = [1, 1]} : vector<10x18xf32> to vector<10x1xf32>
    %196 = vector.extract_strided_slice %193 {offsets = [0, 17], sizes = [10, 1], strides = [1, 1]} : vector<10x18xf32> to vector<10x1xf32>
    %197 = tpu.concatenate %11, %195 in 1 : vector<10x1xf32>, vector<10x1xf32> -> vector<10x2xf32>
    %198 = tpu.concatenate %196, %11 in 1 : vector<10x1xf32>, vector<10x1xf32> -> vector<10x2xf32>
    %cst_59 = arith.constant dense<0.000000e+00> : vector<10x10xf32>
    %199 = tpu.matmul %197, %198, %cst_59 {dimension_numbers = #tpu.dot_dimension_numbers<[1], [1], [0], [0], [0, 0, 1, 0], [], []>} : vector<10x2xf32>, vector<10x2xf32>, vector<10x10xf32> -> vector<10x10xf32>
    %cst_60 = arith.constant dense<0.000000e+00> : vector<10x10xf32>
    %200 = tpu.matmul %198, %197, %cst_60 {dimension_numbers = #tpu.dot_dimension_numbers<[1], [1], [0], [0], [0, 0, 1, 0], [], []>} : vector<10x2xf32>, vector<10x2xf32>, vector<10x10xf32> -> vector<10x10xf32>
    %cst_61 = arith.constant 0.000000e+00 : f32
    %201 = vector.broadcast %cst_61 : f32 to vector<10x10xf32>
    %202 = arith.cmpf oge, %199, %201 : vector<10x10xf32>
    %cst_62 = arith.constant 2.000000e-01 : f32
    %203 = vector.broadcast %cst_62 : f32 to vector<10x10xf32>
    %204 = arith.mulf %203, %199 : vector<10x10xf32>
    %205 = arith.select %202, %199, %204 : vector<10x10xi1>, vector<10x10xf32>
    %206 = math.exp %205 : vector<10x10xf32>
    %207 = arith.mulf %9, %206 : vector<10x10xf32>
    %cst_63 = arith.constant 0.000000e+00 : f32
    %208 = vector.broadcast %cst_63 : f32 to vector<10x10xf32>
    %209 = arith.cmpf oge, %200, %208 : vector<10x10xf32>
    %cst_64 = arith.constant 2.000000e-01 : f32
    %210 = vector.broadcast %cst_64 : f32 to vector<10x10xf32>
    %211 = arith.mulf %210, %200 : vector<10x10xf32>
    %212 = arith.select %209, %200, %211 : vector<10x10xi1>, vector<10x10xf32>
    %213 = math.exp %212 : vector<10x10xf32>
    %214 = arith.mulf %10, %213 : vector<10x10xf32>
    %215 = arith.addf %207, %214 : vector<10x10xf32>
    %cst_65 = arith.constant 5.000000e-01 : f32
    %216 = vector.broadcast %cst_65 : f32 to vector<10x10xf32>
    %217 = arith.mulf %216, %215 : vector<10x10xf32>
    %cst_66 = arith.constant dense<0.000000e+00> : vector<10xf32>
    %218 = vector.multi_reduction <add>, %207, %cst_66 [1] : vector<10x10xf32> to vector<10xf32>
    %219 = vector.shape_cast %218 : vector<10xf32> to vector<10x1xf32>
    %220 = vector.broadcast %219 : vector<10x1xf32> to vector<10x10xf32>
    %221 = arith.divf %207, %220 : vector<10x10xf32>
    %cst_67 = arith.constant dense<0.000000e+00> : vector<10x16xf32>
    %222 = tpu.matmul %221, %194, %cst_67 {dimension_numbers = #tpu.dot_dimension_numbers<[1], [0], [0], [1], [0, 0, 1, 1], [], []>} : vector<10x10xf32>, vector<10x16xf32>, vector<10x16xf32> -> vector<10x16xf32>
    %cst_68 = arith.constant 0.000000e+00 : f32
    %223 = vector.broadcast %cst_68 : f32 to vector<10x16xf32>
    %224 = arith.maximumf %222, %223 : vector<10x16xf32>
    %225 = tpu.concatenate %207, %217, %221 in 1 : vector<10x10xf32>, vector<10x10xf32>, vector<10x10xf32> -> vector<10x30xf32>
    %c2 = arith.constant 2 : index
    %c0_69 = arith.constant 0 : index
    %c0_70 = arith.constant 0 : index
    %226 = vector.load %arg2[%c2, %c0_69, %c0_70] : memref<7x10x30xf32, #tpu.memory_space<vmem>>, vector<1x10x30xf32>
    %227 = vector.shape_cast %226 : vector<1x10x30xf32> to vector<10x30xf32>
    %228 = vector.shape_cast %225 : vector<10x30xf32> to vector<1x10x30xf32>
    tpu.vector_store %arg2[%c2, %c0_69, %c0_70], %228 {strides = array<i32>} : memref<7x10x30xf32, #tpu.memory_space<vmem>>, vector<1x10x30xf32>,
    %229 = tpu.concatenate %224, %172 in 1 : vector<10x16xf32>, vector<10x32xf32> -> vector<10x48xf32>
    %cst_71 = arith.constant dense<0.000000e+00> : vector<10x128xf32>
    %230 = tpu.matmul %229, %1, %cst_71 {dimension_numbers = #tpu.dot_dimension_numbers<[1], [0], [0], [1], [0, 0, 1, 1], [], []>} : vector<10x48xf32>, vector<48x128xf32>, vector<10x128xf32> -> vector<10x128xf32>
    %231 = arith.addf %230, %4 : vector<10x128xf32>
    %232 = vector.extract_strided_slice %231 {offsets = [0, 0], sizes = [10, 96], strides = [1, 1]} : vector<10x128xf32> to vector<10x96xf32>
    %233 = arith.negf %232 : vector<10x96xf32>
    %234 = math.exp %233 : vector<10x96xf32>
    %cst_72 = arith.constant 1.000000e+00 : f32
    %235 = vector.broadcast %cst_72 : f32 to vector<10x96xf32>
    %236 = arith.addf %235, %234 : vector<10x96xf32>
    %237 = arith.divf %235, %236 : vector<10x96xf32>
    %238 = vector.extract_strided_slice %237 {offsets = [0, 0], sizes = [10, 32], strides = [1, 1]} : vector<10x96xf32> to vector<10x32xf32>
    %239 = vector.extract_strided_slice %237 {offsets = [0, 32], sizes = [10, 32], strides = [1, 1]} : vector<10x96xf32> to vector<10x32xf32>
    %240 = vector.extract_strided_slice %237 {offsets = [0, 64], sizes = [10, 32], strides = [1, 1]} : vector<10x96xf32> to vector<10x32xf32>
    %241 = vector.extract_strided_slice %231 {offsets = [0, 96], sizes = [10, 32], strides = [1, 1]} : vector<10x128xf32> to vector<10x32xf32>
    %242 = math.tanh %241 : vector<10x32xf32>
    %243 = arith.mulf %239, %170 : vector<10x32xf32>
    %244 = arith.mulf %238, %242 : vector<10x32xf32>
    %245 = arith.addf %243, %244 : vector<10x32xf32>
    %246 = math.tanh %245 : vector<10x32xf32>
    %247 = arith.mulf %240, %246 : vector<10x32xf32>
    %c30 = arith.constant 30 : index
    %c0_73 = arith.constant 0 : index
    %248 = vector.load %arg4[%c30, %c0_73] : memref<70x128xf32, #tpu.memory_space<vmem>>, vector<10x128xf32>
    %cst_74 = arith.constant dense<0.000000e+00> : vector<10x128xf32>
    %249 = tpu.matmul %191, %0, %cst_74 {dimension_numbers = #tpu.dot_dimension_numbers<[1], [0], [0], [1], [0, 0, 1, 1], [], []>} : vector<10x32xf32>, vector<32x128xf32>, vector<10x128xf32> -> vector<10x128xf32>
    %250 = arith.addf %248, %249 : vector<10x128xf32>
    %251 = vector.extract_strided_slice %250 {offsets = [0, 0], sizes = [10, 96], strides = [1, 1]} : vector<10x128xf32> to vector<10x96xf32>
    %252 = arith.negf %251 : vector<10x96xf32>
    %253 = math.exp %252 : vector<10x96xf32>
    %cst_75 = arith.constant 1.000000e+00 : f32
    %254 = vector.broadcast %cst_75 : f32 to vector<10x96xf32>
    %255 = arith.addf %254, %253 : vector<10x96xf32>
    %256 = arith.divf %254, %255 : vector<10x96xf32>
    %257 = vector.extract_strided_slice %256 {offsets = [0, 0], sizes = [10, 32], strides = [1, 1]} : vector<10x96xf32> to vector<10x32xf32>
    %258 = vector.extract_strided_slice %256 {offsets = [0, 32], sizes = [10, 32], strides = [1, 1]} : vector<10x96xf32> to vector<10x32xf32>
    %259 = vector.extract_strided_slice %256 {offsets = [0, 64], sizes = [10, 32], strides = [1, 1]} : vector<10x96xf32> to vector<10x32xf32>
    %260 = vector.extract_strided_slice %250 {offsets = [0, 96], sizes = [10, 32], strides = [1, 1]} : vector<10x128xf32> to vector<10x32xf32>
    %261 = math.tanh %260 : vector<10x32xf32>
    %262 = arith.mulf %258, %189 : vector<10x32xf32>
    %263 = arith.mulf %257, %261 : vector<10x32xf32>
    %264 = arith.addf %262, %263 : vector<10x32xf32>
    %265 = math.tanh %264 : vector<10x32xf32>
    %266 = arith.mulf %259, %265 : vector<10x32xf32>
    %cst_76 = arith.constant dense<0.000000e+00> : vector<10x18xf32>
    %267 = tpu.matmul %266, %5, %cst_76 {dimension_numbers = #tpu.dot_dimension_numbers<[1], [0], [0], [1], [0, 0, 1, 1], [], []>} : vector<10x32xf32>, vector<32x18xf32>, vector<10x18xf32> -> vector<10x18xf32>
    %268 = arith.addf %267, %8 : vector<10x18xf32>
    %269 = vector.extract_strided_slice %268 {offsets = [0, 0], sizes = [10, 16], strides = [1, 1]} : vector<10x18xf32> to vector<10x16xf32>
    %270 = vector.extract_strided_slice %268 {offsets = [0, 16], sizes = [10, 1], strides = [1, 1]} : vector<10x18xf32> to vector<10x1xf32>
    %271 = vector.extract_strided_slice %268 {offsets = [0, 17], sizes = [10, 1], strides = [1, 1]} : vector<10x18xf32> to vector<10x1xf32>
    %272 = tpu.concatenate %11, %270 in 1 : vector<10x1xf32>, vector<10x1xf32> -> vector<10x2xf32>
    %273 = tpu.concatenate %271, %11 in 1 : vector<10x1xf32>, vector<10x1xf32> -> vector<10x2xf32>
    %cst_77 = arith.constant dense<0.000000e+00> : vector<10x10xf32>
    %274 = tpu.matmul %272, %273, %cst_77 {dimension_numbers = #tpu.dot_dimension_numbers<[1], [1], [0], [0], [0, 0, 1, 0], [], []>} : vector<10x2xf32>, vector<10x2xf32>, vector<10x10xf32> -> vector<10x10xf32>
    %cst_78 = arith.constant dense<0.000000e+00> : vector<10x10xf32>
    %275 = tpu.matmul %273, %272, %cst_78 {dimension_numbers = #tpu.dot_dimension_numbers<[1], [1], [0], [0], [0, 0, 1, 0], [], []>} : vector<10x2xf32>, vector<10x2xf32>, vector<10x10xf32> -> vector<10x10xf32>
    %cst_79 = arith.constant 0.000000e+00 : f32
    %276 = vector.broadcast %cst_79 : f32 to vector<10x10xf32>
    %277 = arith.cmpf oge, %274, %276 : vector<10x10xf32>
    %cst_80 = arith.constant 2.000000e-01 : f32
    %278 = vector.broadcast %cst_80 : f32 to vector<10x10xf32>
    %279 = arith.mulf %278, %274 : vector<10x10xf32>
    %280 = arith.select %277, %274, %279 : vector<10x10xi1>, vector<10x10xf32>
    %281 = math.exp %280 : vector<10x10xf32>
    %282 = arith.mulf %9, %281 : vector<10x10xf32>
    %cst_81 = arith.constant 0.000000e+00 : f32
    %283 = vector.broadcast %cst_81 : f32 to vector<10x10xf32>
    %284 = arith.cmpf oge, %275, %283 : vector<10x10xf32>
    %cst_82 = arith.constant 2.000000e-01 : f32
    %285 = vector.broadcast %cst_82 : f32 to vector<10x10xf32>
    %286 = arith.mulf %285, %275 : vector<10x10xf32>
    %287 = arith.select %284, %275, %286 : vector<10x10xi1>, vector<10x10xf32>
    %288 = math.exp %287 : vector<10x10xf32>
    %289 = arith.mulf %10, %288 : vector<10x10xf32>
    %290 = arith.addf %282, %289 : vector<10x10xf32>
    %cst_83 = arith.constant 5.000000e-01 : f32
    %291 = vector.broadcast %cst_83 : f32 to vector<10x10xf32>
    %292 = arith.mulf %291, %290 : vector<10x10xf32>
    %cst_84 = arith.constant dense<0.000000e+00> : vector<10xf32>
    %293 = vector.multi_reduction <add>, %282, %cst_84 [1] : vector<10x10xf32> to vector<10xf32>
    %294 = vector.shape_cast %293 : vector<10xf32> to vector<10x1xf32>
    %295 = vector.broadcast %294 : vector<10x1xf32> to vector<10x10xf32>
    %296 = arith.divf %282, %295 : vector<10x10xf32>
    %cst_85 = arith.constant dense<0.000000e+00> : vector<10x16xf32>
    %297 = tpu.matmul %296, %269, %cst_85 {dimension_numbers = #tpu.dot_dimension_numbers<[1], [0], [0], [1], [0, 0, 1, 1], [], []>} : vector<10x10xf32>, vector<10x16xf32>, vector<10x16xf32> -> vector<10x16xf32>
    %cst_86 = arith.constant 0.000000e+00 : f32
    %298 = vector.broadcast %cst_86 : f32 to vector<10x16xf32>
    %299 = arith.maximumf %297, %298 : vector<10x16xf32>
    %300 = tpu.concatenate %282, %292, %296 in 1 : vector<10x10xf32>, vector<10x10xf32>, vector<10x10xf32> -> vector<10x30xf32>
    %c3 = arith.constant 3 : index
    %c0_87 = arith.constant 0 : index
    %c0_88 = arith.constant 0 : index
    %301 = vector.load %arg2[%c3, %c0_87, %c0_88] : memref<7x10x30xf32, #tpu.memory_space<vmem>>, vector<1x10x30xf32>
    %302 = vector.shape_cast %301 : vector<1x10x30xf32> to vector<10x30xf32>
    %303 = vector.shape_cast %300 : vector<10x30xf32> to vector<1x10x30xf32>
    tpu.vector_store %arg2[%c3, %c0_87, %c0_88], %303 {strides = array<i32>} : memref<7x10x30xf32, #tpu.memory_space<vmem>>, vector<1x10x30xf32>,
    %304 = tpu.concatenate %299, %247 in 1 : vector<10x16xf32>, vector<10x32xf32> -> vector<10x48xf32>
    %cst_89 = arith.constant dense<0.000000e+00> : vector<10x128xf32>
    %305 = tpu.matmul %304, %1, %cst_89 {dimension_numbers = #tpu.dot_dimension_numbers<[1], [0], [0], [1], [0, 0, 1, 1], [], []>} : vector<10x48xf32>, vector<48x128xf32>, vector<10x128xf32> -> vector<10x128xf32>
    %306 = arith.addf %305, %4 : vector<10x128xf32>
    %307 = vector.extract_strided_slice %306 {offsets = [0, 0], sizes = [10, 96], strides = [1, 1]} : vector<10x128xf32> to vector<10x96xf32>
    %308 = arith.negf %307 : vector<10x96xf32>
    %309 = math.exp %308 : vector<10x96xf32>
    %cst_90 = arith.constant 1.000000e+00 : f32
    %310 = vector.broadcast %cst_90 : f32 to vector<10x96xf32>
    %311 = arith.addf %310, %309 : vector<10x96xf32>
    %312 = arith.divf %310, %311 : vector<10x96xf32>
    %313 = vector.extract_strided_slice %312 {offsets = [0, 0], sizes = [10, 32], strides = [1, 1]} : vector<10x96xf32> to vector<10x32xf32>
    %314 = vector.extract_strided_slice %312 {offsets = [0, 32], sizes = [10, 32], strides = [1, 1]} : vector<10x96xf32> to vector<10x32xf32>
    %315 = vector.extract_strided_slice %312 {offsets = [0, 64], sizes = [10, 32], strides = [1, 1]} : vector<10x96xf32> to vector<10x32xf32>
    %316 = vector.extract_strided_slice %306 {offsets = [0, 96], sizes = [10, 32], strides = [1, 1]} : vector<10x128xf32> to vector<10x32xf32>
    %317 = math.tanh %316 : vector<10x32xf32>
    %318 = arith.mulf %314, %245 : vector<10x32xf32>
    %319 = arith.mulf %313, %317 : vector<10x32xf32>
    %320 = arith.addf %318, %319 : vector<10x32xf32>
    %321 = math.tanh %320 : vector<10x32xf32>
    %322 = arith.mulf %315, %321 : vector<10x32xf32>
    %c40 = arith.constant 40 : index
    %c0_91 = arith.constant 0 : index
    %323 = vector.load %arg4[%c40, %c0_91] : memref<70x128xf32, #tpu.memory_space<vmem>>, vector<10x128xf32>
    %cst_92 = arith.constant dense<0.000000e+00> : vector<10x128xf32>
    %324 = tpu.matmul %266, %0, %cst_92 {dimension_numbers = #tpu.dot_dimension_numbers<[1], [0], [0], [1], [0, 0, 1, 1], [], []>} : vector<10x32xf32>, vector<32x128xf32>, vector<10x128xf32> -> vector<10x128xf32>
    %325 = arith.addf %323, %324 : vector<10x128xf32>
    %326 = vector.extract_strided_slice %325 {offsets = [0, 0], sizes = [10, 96], strides = [1, 1]} : vector<10x128xf32> to vector<10x96xf32>
    %327 = arith.negf %326 : vector<10x96xf32>
    %328 = math.exp %327 : vector<10x96xf32>
    %cst_93 = arith.constant 1.000000e+00 : f32
    %329 = vector.broadcast %cst_93 : f32 to vector<10x96xf32>
    %330 = arith.addf %329, %328 : vector<10x96xf32>
    %331 = arith.divf %329, %330 : vector<10x96xf32>
    %332 = vector.extract_strided_slice %331 {offsets = [0, 0], sizes = [10, 32], strides = [1, 1]} : vector<10x96xf32> to vector<10x32xf32>
    %333 = vector.extract_strided_slice %331 {offsets = [0, 32], sizes = [10, 32], strides = [1, 1]} : vector<10x96xf32> to vector<10x32xf32>
    %334 = vector.extract_strided_slice %331 {offsets = [0, 64], sizes = [10, 32], strides = [1, 1]} : vector<10x96xf32> to vector<10x32xf32>
    %335 = vector.extract_strided_slice %325 {offsets = [0, 96], sizes = [10, 32], strides = [1, 1]} : vector<10x128xf32> to vector<10x32xf32>
    %336 = math.tanh %335 : vector<10x32xf32>
    %337 = arith.mulf %333, %264 : vector<10x32xf32>
    %338 = arith.mulf %332, %336 : vector<10x32xf32>
    %339 = arith.addf %337, %338 : vector<10x32xf32>
    %340 = math.tanh %339 : vector<10x32xf32>
    %341 = arith.mulf %334, %340 : vector<10x32xf32>
    %cst_94 = arith.constant dense<0.000000e+00> : vector<10x18xf32>
    %342 = tpu.matmul %341, %5, %cst_94 {dimension_numbers = #tpu.dot_dimension_numbers<[1], [0], [0], [1], [0, 0, 1, 1], [], []>} : vector<10x32xf32>, vector<32x18xf32>, vector<10x18xf32> -> vector<10x18xf32>
    %343 = arith.addf %342, %8 : vector<10x18xf32>
    %344 = vector.extract_strided_slice %343 {offsets = [0, 0], sizes = [10, 16], strides = [1, 1]} : vector<10x18xf32> to vector<10x16xf32>
    %345 = vector.extract_strided_slice %343 {offsets = [0, 16], sizes = [10, 1], strides = [1, 1]} : vector<10x18xf32> to vector<10x1xf32>
    %346 = vector.extract_strided_slice %343 {offsets = [0, 17], sizes = [10, 1], strides = [1, 1]} : vector<10x18xf32> to vector<10x1xf32>
    %347 = tpu.concatenate %11, %345 in 1 : vector<10x1xf32>, vector<10x1xf32> -> vector<10x2xf32>
    %348 = tpu.concatenate %346, %11 in 1 : vector<10x1xf32>, vector<10x1xf32> -> vector<10x2xf32>
    %cst_95 = arith.constant dense<0.000000e+00> : vector<10x10xf32>
    %349 = tpu.matmul %347, %348, %cst_95 {dimension_numbers = #tpu.dot_dimension_numbers<[1], [1], [0], [0], [0, 0, 1, 0], [], []>} : vector<10x2xf32>, vector<10x2xf32>, vector<10x10xf32> -> vector<10x10xf32>
    %cst_96 = arith.constant dense<0.000000e+00> : vector<10x10xf32>
    %350 = tpu.matmul %348, %347, %cst_96 {dimension_numbers = #tpu.dot_dimension_numbers<[1], [1], [0], [0], [0, 0, 1, 0], [], []>} : vector<10x2xf32>, vector<10x2xf32>, vector<10x10xf32> -> vector<10x10xf32>
    %cst_97 = arith.constant 0.000000e+00 : f32
    %351 = vector.broadcast %cst_97 : f32 to vector<10x10xf32>
    %352 = arith.cmpf oge, %349, %351 : vector<10x10xf32>
    %cst_98 = arith.constant 2.000000e-01 : f32
    %353 = vector.broadcast %cst_98 : f32 to vector<10x10xf32>
    %354 = arith.mulf %353, %349 : vector<10x10xf32>
    %355 = arith.select %352, %349, %354 : vector<10x10xi1>, vector<10x10xf32>
    %356 = math.exp %355 : vector<10x10xf32>
    %357 = arith.mulf %9, %356 : vector<10x10xf32>
    %cst_99 = arith.constant 0.000000e+00 : f32
    %358 = vector.broadcast %cst_99 : f32 to vector<10x10xf32>
    %359 = arith.cmpf oge, %350, %358 : vector<10x10xf32>
    %cst_100 = arith.constant 2.000000e-01 : f32
    %360 = vector.broadcast %cst_100 : f32 to vector<10x10xf32>
    %361 = arith.mulf %360, %350 : vector<10x10xf32>
    %362 = arith.select %359, %350, %361 : vector<10x10xi1>, vector<10x10xf32>
    %363 = math.exp %362 : vector<10x10xf32>
    %364 = arith.mulf %10, %363 : vector<10x10xf32>
    %365 = arith.addf %357, %364 : vector<10x10xf32>
    %cst_101 = arith.constant 5.000000e-01 : f32
    %366 = vector.broadcast %cst_101 : f32 to vector<10x10xf32>
    %367 = arith.mulf %366, %365 : vector<10x10xf32>
    %cst_102 = arith.constant dense<0.000000e+00> : vector<10xf32>
    %368 = vector.multi_reduction <add>, %357, %cst_102 [1] : vector<10x10xf32> to vector<10xf32>
    %369 = vector.shape_cast %368 : vector<10xf32> to vector<10x1xf32>
    %370 = vector.broadcast %369 : vector<10x1xf32> to vector<10x10xf32>
    %371 = arith.divf %357, %370 : vector<10x10xf32>
    %cst_103 = arith.constant dense<0.000000e+00> : vector<10x16xf32>
    %372 = tpu.matmul %371, %344, %cst_103 {dimension_numbers = #tpu.dot_dimension_numbers<[1], [0], [0], [1], [0, 0, 1, 1], [], []>} : vector<10x10xf32>, vector<10x16xf32>, vector<10x16xf32> -> vector<10x16xf32>
    %cst_104 = arith.constant 0.000000e+00 : f32
    %373 = vector.broadcast %cst_104 : f32 to vector<10x16xf32>
    %374 = arith.maximumf %372, %373 : vector<10x16xf32>
    %375 = tpu.concatenate %357, %367, %371 in 1 : vector<10x10xf32>, vector<10x10xf32>, vector<10x10xf32> -> vector<10x30xf32>
    %c4 = arith.constant 4 : index
    %c0_105 = arith.constant 0 : index
    %c0_106 = arith.constant 0 : index
    %376 = vector.load %arg2[%c4, %c0_105, %c0_106] : memref<7x10x30xf32, #tpu.memory_space<vmem>>, vector<1x10x30xf32>
    %377 = vector.shape_cast %376 : vector<1x10x30xf32> to vector<10x30xf32>
    %378 = vector.shape_cast %375 : vector<10x30xf32> to vector<1x10x30xf32>
    tpu.vector_store %arg2[%c4, %c0_105, %c0_106], %378 {strides = array<i32>} : memref<7x10x30xf32, #tpu.memory_space<vmem>>, vector<1x10x30xf32>,
    %379 = tpu.concatenate %374, %322 in 1 : vector<10x16xf32>, vector<10x32xf32> -> vector<10x48xf32>
    %cst_107 = arith.constant dense<0.000000e+00> : vector<10x128xf32>
    %380 = tpu.matmul %379, %1, %cst_107 {dimension_numbers = #tpu.dot_dimension_numbers<[1], [0], [0], [1], [0, 0, 1, 1], [], []>} : vector<10x48xf32>, vector<48x128xf32>, vector<10x128xf32> -> vector<10x128xf32>
    %381 = arith.addf %380, %4 : vector<10x128xf32>
    %382 = vector.extract_strided_slice %381 {offsets = [0, 0], sizes = [10, 96], strides = [1, 1]} : vector<10x128xf32> to vector<10x96xf32>
    %383 = arith.negf %382 : vector<10x96xf32>
    %384 = math.exp %383 : vector<10x96xf32>
    %cst_108 = arith.constant 1.000000e+00 : f32
    %385 = vector.broadcast %cst_108 : f32 to vector<10x96xf32>
    %386 = arith.addf %385, %384 : vector<10x96xf32>
    %387 = arith.divf %385, %386 : vector<10x96xf32>
    %388 = vector.extract_strided_slice %387 {offsets = [0, 0], sizes = [10, 32], strides = [1, 1]} : vector<10x96xf32> to vector<10x32xf32>
    %389 = vector.extract_strided_slice %387 {offsets = [0, 32], sizes = [10, 32], strides = [1, 1]} : vector<10x96xf32> to vector<10x32xf32>
    %390 = vector.extract_strided_slice %387 {offsets = [0, 64], sizes = [10, 32], strides = [1, 1]} : vector<10x96xf32> to vector<10x32xf32>
    %391 = vector.extract_strided_slice %381 {offsets = [0, 96], sizes = [10, 32], strides = [1, 1]} : vector<10x128xf32> to vector<10x32xf32>
    %392 = math.tanh %391 : vector<10x32xf32>
    %393 = arith.mulf %389, %320 : vector<10x32xf32>
    %394 = arith.mulf %388, %392 : vector<10x32xf32>
    %395 = arith.addf %393, %394 : vector<10x32xf32>
    %396 = math.tanh %395 : vector<10x32xf32>
    %397 = arith.mulf %390, %396 : vector<10x32xf32>
    %c50 = arith.constant 50 : index
    %c0_109 = arith.constant 0 : index
    %398 = vector.load %arg4[%c50, %c0_109] : memref<70x128xf32, #tpu.memory_space<vmem>>, vector<10x128xf32>
    %cst_110 = arith.constant dense<0.000000e+00> : vector<10x128xf32>
    %399 = tpu.matmul %341, %0, %cst_110 {dimension_numbers = #tpu.dot_dimension_numbers<[1], [0], [0], [1], [0, 0, 1, 1], [], []>} : vector<10x32xf32>, vector<32x128xf32>, vector<10x128xf32> -> vector<10x128xf32>
    %400 = arith.addf %398, %399 : vector<10x128xf32>
    %401 = vector.extract_strided_slice %400 {offsets = [0, 0], sizes = [10, 96], strides = [1, 1]} : vector<10x128xf32> to vector<10x96xf32>
    %402 = arith.negf %401 : vector<10x96xf32>
    %403 = math.exp %402 : vector<10x96xf32>
    %cst_111 = arith.constant 1.000000e+00 : f32
    %404 = vector.broadcast %cst_111 : f32 to vector<10x96xf32>
    %405 = arith.addf %404, %403 : vector<10x96xf32>
    %406 = arith.divf %404, %405 : vector<10x96xf32>
    %407 = vector.extract_strided_slice %406 {offsets = [0, 0], sizes = [10, 32], strides = [1, 1]} : vector<10x96xf32> to vector<10x32xf32>
    %408 = vector.extract_strided_slice %406 {offsets = [0, 32], sizes = [10, 32], strides = [1, 1]} : vector<10x96xf32> to vector<10x32xf32>
    %409 = vector.extract_strided_slice %406 {offsets = [0, 64], sizes = [10, 32], strides = [1, 1]} : vector<10x96xf32> to vector<10x32xf32>
    %410 = vector.extract_strided_slice %400 {offsets = [0, 96], sizes = [10, 32], strides = [1, 1]} : vector<10x128xf32> to vector<10x32xf32>
    %411 = math.tanh %410 : vector<10x32xf32>
    %412 = arith.mulf %408, %339 : vector<10x32xf32>
    %413 = arith.mulf %407, %411 : vector<10x32xf32>
    %414 = arith.addf %412, %413 : vector<10x32xf32>
    %415 = math.tanh %414 : vector<10x32xf32>
    %416 = arith.mulf %409, %415 : vector<10x32xf32>
    %cst_112 = arith.constant dense<0.000000e+00> : vector<10x18xf32>
    %417 = tpu.matmul %416, %5, %cst_112 {dimension_numbers = #tpu.dot_dimension_numbers<[1], [0], [0], [1], [0, 0, 1, 1], [], []>} : vector<10x32xf32>, vector<32x18xf32>, vector<10x18xf32> -> vector<10x18xf32>
    %418 = arith.addf %417, %8 : vector<10x18xf32>
    %419 = vector.extract_strided_slice %418 {offsets = [0, 0], sizes = [10, 16], strides = [1, 1]} : vector<10x18xf32> to vector<10x16xf32>
    %420 = vector.extract_strided_slice %418 {offsets = [0, 16], sizes = [10, 1], strides = [1, 1]} : vector<10x18xf32> to vector<10x1xf32>
    %421 = vector.extract_strided_slice %418 {offsets = [0, 17], sizes = [10, 1], strides = [1, 1]} : vector<10x18xf32> to vector<10x1xf32>
    %422 = tpu.concatenate %11, %420 in 1 : vector<10x1xf32>, vector<10x1xf32> -> vector<10x2xf32>
    %423 = tpu.concatenate %421, %11 in 1 : vector<10x1xf32>, vector<10x1xf32> -> vector<10x2xf32>
    %cst_113 = arith.constant dense<0.000000e+00> : vector<10x10xf32>
    %424 = tpu.matmul %422, %423, %cst_113 {dimension_numbers = #tpu.dot_dimension_numbers<[1], [1], [0], [0], [0, 0, 1, 0], [], []>} : vector<10x2xf32>, vector<10x2xf32>, vector<10x10xf32> -> vector<10x10xf32>
    %cst_114 = arith.constant dense<0.000000e+00> : vector<10x10xf32>
    %425 = tpu.matmul %423, %422, %cst_114 {dimension_numbers = #tpu.dot_dimension_numbers<[1], [1], [0], [0], [0, 0, 1, 0], [], []>} : vector<10x2xf32>, vector<10x2xf32>, vector<10x10xf32> -> vector<10x10xf32>
    %cst_115 = arith.constant 0.000000e+00 : f32
    %426 = vector.broadcast %cst_115 : f32 to vector<10x10xf32>
    %427 = arith.cmpf oge, %424, %426 : vector<10x10xf32>
    %cst_116 = arith.constant 2.000000e-01 : f32
    %428 = vector.broadcast %cst_116 : f32 to vector<10x10xf32>
    %429 = arith.mulf %428, %424 : vector<10x10xf32>
    %430 = arith.select %427, %424, %429 : vector<10x10xi1>, vector<10x10xf32>
    %431 = math.exp %430 : vector<10x10xf32>
    %432 = arith.mulf %9, %431 : vector<10x10xf32>
    %cst_117 = arith.constant 0.000000e+00 : f32
    %433 = vector.broadcast %cst_117 : f32 to vector<10x10xf32>
    %434 = arith.cmpf oge, %425, %433 : vector<10x10xf32>
    %cst_118 = arith.constant 2.000000e-01 : f32
    %435 = vector.broadcast %cst_118 : f32 to vector<10x10xf32>
    %436 = arith.mulf %435, %425 : vector<10x10xf32>
    %437 = arith.select %434, %425, %436 : vector<10x10xi1>, vector<10x10xf32>
    %438 = math.exp %437 : vector<10x10xf32>
    %439 = arith.mulf %10, %438 : vector<10x10xf32>
    %440 = arith.addf %432, %439 : vector<10x10xf32>
    %cst_119 = arith.constant 5.000000e-01 : f32
    %441 = vector.broadcast %cst_119 : f32 to vector<10x10xf32>
    %442 = arith.mulf %441, %440 : vector<10x10xf32>
    %cst_120 = arith.constant dense<0.000000e+00> : vector<10xf32>
    %443 = vector.multi_reduction <add>, %432, %cst_120 [1] : vector<10x10xf32> to vector<10xf32>
    %444 = vector.shape_cast %443 : vector<10xf32> to vector<10x1xf32>
    %445 = vector.broadcast %444 : vector<10x1xf32> to vector<10x10xf32>
    %446 = arith.divf %432, %445 : vector<10x10xf32>
    %cst_121 = arith.constant dense<0.000000e+00> : vector<10x16xf32>
    %447 = tpu.matmul %446, %419, %cst_121 {dimension_numbers = #tpu.dot_dimension_numbers<[1], [0], [0], [1], [0, 0, 1, 1], [], []>} : vector<10x10xf32>, vector<10x16xf32>, vector<10x16xf32> -> vector<10x16xf32>
    %cst_122 = arith.constant 0.000000e+00 : f32
    %448 = vector.broadcast %cst_122 : f32 to vector<10x16xf32>
    %449 = arith.maximumf %447, %448 : vector<10x16xf32>
    %450 = tpu.concatenate %432, %442, %446 in 1 : vector<10x10xf32>, vector<10x10xf32>, vector<10x10xf32> -> vector<10x30xf32>
    %c5 = arith.constant 5 : index
    %c0_123 = arith.constant 0 : index
    %c0_124 = arith.constant 0 : index
    %451 = vector.load %arg2[%c5, %c0_123, %c0_124] : memref<7x10x30xf32, #tpu.memory_space<vmem>>, vector<1x10x30xf32>
    %452 = vector.shape_cast %451 : vector<1x10x30xf32> to vector<10x30xf32>
    %453 = vector.shape_cast %450 : vector<10x30xf32> to vector<1x10x30xf32>
    tpu.vector_store %arg2[%c5, %c0_123, %c0_124], %453 {strides = array<i32>} : memref<7x10x30xf32, #tpu.memory_space<vmem>>, vector<1x10x30xf32>,
    %454 = tpu.concatenate %449, %397 in 1 : vector<10x16xf32>, vector<10x32xf32> -> vector<10x48xf32>
    %cst_125 = arith.constant dense<0.000000e+00> : vector<10x128xf32>
    %455 = tpu.matmul %454, %1, %cst_125 {dimension_numbers = #tpu.dot_dimension_numbers<[1], [0], [0], [1], [0, 0, 1, 1], [], []>} : vector<10x48xf32>, vector<48x128xf32>, vector<10x128xf32> -> vector<10x128xf32>
    %456 = arith.addf %455, %4 : vector<10x128xf32>
    %457 = vector.extract_strided_slice %456 {offsets = [0, 0], sizes = [10, 96], strides = [1, 1]} : vector<10x128xf32> to vector<10x96xf32>
    %458 = arith.negf %457 : vector<10x96xf32>
    %459 = math.exp %458 : vector<10x96xf32>
    %cst_126 = arith.constant 1.000000e+00 : f32
    %460 = vector.broadcast %cst_126 : f32 to vector<10x96xf32>
    %461 = arith.addf %460, %459 : vector<10x96xf32>
    %462 = arith.divf %460, %461 : vector<10x96xf32>
    %463 = vector.extract_strided_slice %462 {offsets = [0, 0], sizes = [10, 32], strides = [1, 1]} : vector<10x96xf32> to vector<10x32xf32>
    %464 = vector.extract_strided_slice %462 {offsets = [0, 32], sizes = [10, 32], strides = [1, 1]} : vector<10x96xf32> to vector<10x32xf32>
    %465 = vector.extract_strided_slice %462 {offsets = [0, 64], sizes = [10, 32], strides = [1, 1]} : vector<10x96xf32> to vector<10x32xf32>
    %466 = vector.extract_strided_slice %456 {offsets = [0, 96], sizes = [10, 32], strides = [1, 1]} : vector<10x128xf32> to vector<10x32xf32>
    %467 = math.tanh %466 : vector<10x32xf32>
    %468 = arith.mulf %464, %395 : vector<10x32xf32>
    %469 = arith.mulf %463, %467 : vector<10x32xf32>
    %470 = arith.addf %468, %469 : vector<10x32xf32>
    %471 = math.tanh %470 : vector<10x32xf32>
    %472 = arith.mulf %465, %471 : vector<10x32xf32>
    %c60 = arith.constant 60 : index
    %c0_127 = arith.constant 0 : index
    %473 = vector.load %arg4[%c60, %c0_127] : memref<70x128xf32, #tpu.memory_space<vmem>>, vector<10x128xf32>
    %cst_128 = arith.constant dense<0.000000e+00> : vector<10x128xf32>
    %474 = tpu.matmul %416, %0, %cst_128 {dimension_numbers = #tpu.dot_dimension_numbers<[1], [0], [0], [1], [0, 0, 1, 1], [], []>} : vector<10x32xf32>, vector<32x128xf32>, vector<10x128xf32> -> vector<10x128xf32>
    %475 = arith.addf %473, %474 : vector<10x128xf32>
    %476 = vector.extract_strided_slice %475 {offsets = [0, 0], sizes = [10, 96], strides = [1, 1]} : vector<10x128xf32> to vector<10x96xf32>
    %477 = arith.negf %476 : vector<10x96xf32>
    %478 = math.exp %477 : vector<10x96xf32>
    %cst_129 = arith.constant 1.000000e+00 : f32
    %479 = vector.broadcast %cst_129 : f32 to vector<10x96xf32>
    %480 = arith.addf %479, %478 : vector<10x96xf32>
    %481 = arith.divf %479, %480 : vector<10x96xf32>
    %482 = vector.extract_strided_slice %481 {offsets = [0, 0], sizes = [10, 32], strides = [1, 1]} : vector<10x96xf32> to vector<10x32xf32>
    %483 = vector.extract_strided_slice %481 {offsets = [0, 32], sizes = [10, 32], strides = [1, 1]} : vector<10x96xf32> to vector<10x32xf32>
    %484 = vector.extract_strided_slice %481 {offsets = [0, 64], sizes = [10, 32], strides = [1, 1]} : vector<10x96xf32> to vector<10x32xf32>
    %485 = vector.extract_strided_slice %475 {offsets = [0, 96], sizes = [10, 32], strides = [1, 1]} : vector<10x128xf32> to vector<10x32xf32>
    %486 = math.tanh %485 : vector<10x32xf32>
    %487 = arith.mulf %483, %414 : vector<10x32xf32>
    %488 = arith.mulf %482, %486 : vector<10x32xf32>
    %489 = arith.addf %487, %488 : vector<10x32xf32>
    %490 = math.tanh %489 : vector<10x32xf32>
    %491 = arith.mulf %484, %490 : vector<10x32xf32>
    %cst_130 = arith.constant dense<0.000000e+00> : vector<10x18xf32>
    %492 = tpu.matmul %491, %5, %cst_130 {dimension_numbers = #tpu.dot_dimension_numbers<[1], [0], [0], [1], [0, 0, 1, 1], [], []>} : vector<10x32xf32>, vector<32x18xf32>, vector<10x18xf32> -> vector<10x18xf32>
    %493 = arith.addf %492, %8 : vector<10x18xf32>
    %494 = vector.extract_strided_slice %493 {offsets = [0, 0], sizes = [10, 16], strides = [1, 1]} : vector<10x18xf32> to vector<10x16xf32>
    %495 = vector.extract_strided_slice %493 {offsets = [0, 16], sizes = [10, 1], strides = [1, 1]} : vector<10x18xf32> to vector<10x1xf32>
    %496 = vector.extract_strided_slice %493 {offsets = [0, 17], sizes = [10, 1], strides = [1, 1]} : vector<10x18xf32> to vector<10x1xf32>
    %497 = tpu.concatenate %11, %495 in 1 : vector<10x1xf32>, vector<10x1xf32> -> vector<10x2xf32>
    %498 = tpu.concatenate %496, %11 in 1 : vector<10x1xf32>, vector<10x1xf32> -> vector<10x2xf32>
    %cst_131 = arith.constant dense<0.000000e+00> : vector<10x10xf32>
    %499 = tpu.matmul %497, %498, %cst_131 {dimension_numbers = #tpu.dot_dimension_numbers<[1], [1], [0], [0], [0, 0, 1, 0], [], []>} : vector<10x2xf32>, vector<10x2xf32>, vector<10x10xf32> -> vector<10x10xf32>
    %cst_132 = arith.constant dense<0.000000e+00> : vector<10x10xf32>
    %500 = tpu.matmul %498, %497, %cst_132 {dimension_numbers = #tpu.dot_dimension_numbers<[1], [1], [0], [0], [0, 0, 1, 0], [], []>} : vector<10x2xf32>, vector<10x2xf32>, vector<10x10xf32> -> vector<10x10xf32>
    %cst_133 = arith.constant 0.000000e+00 : f32
    %501 = vector.broadcast %cst_133 : f32 to vector<10x10xf32>
    %502 = arith.cmpf oge, %499, %501 : vector<10x10xf32>
    %cst_134 = arith.constant 2.000000e-01 : f32
    %503 = vector.broadcast %cst_134 : f32 to vector<10x10xf32>
    %504 = arith.mulf %503, %499 : vector<10x10xf32>
    %505 = arith.select %502, %499, %504 : vector<10x10xi1>, vector<10x10xf32>
    %506 = math.exp %505 : vector<10x10xf32>
    %507 = arith.mulf %9, %506 : vector<10x10xf32>
    %cst_135 = arith.constant 0.000000e+00 : f32
    %508 = vector.broadcast %cst_135 : f32 to vector<10x10xf32>
    %509 = arith.cmpf oge, %500, %508 : vector<10x10xf32>
    %cst_136 = arith.constant 2.000000e-01 : f32
    %510 = vector.broadcast %cst_136 : f32 to vector<10x10xf32>
    %511 = arith.mulf %510, %500 : vector<10x10xf32>
    %512 = arith.select %509, %500, %511 : vector<10x10xi1>, vector<10x10xf32>
    %513 = math.exp %512 : vector<10x10xf32>
    %514 = arith.mulf %10, %513 : vector<10x10xf32>
    %515 = arith.addf %507, %514 : vector<10x10xf32>
    %cst_137 = arith.constant 5.000000e-01 : f32
    %516 = vector.broadcast %cst_137 : f32 to vector<10x10xf32>
    %517 = arith.mulf %516, %515 : vector<10x10xf32>
    %cst_138 = arith.constant dense<0.000000e+00> : vector<10xf32>
    %518 = vector.multi_reduction <add>, %507, %cst_138 [1] : vector<10x10xf32> to vector<10xf32>
    %519 = vector.shape_cast %518 : vector<10xf32> to vector<10x1xf32>
    %520 = vector.broadcast %519 : vector<10x1xf32> to vector<10x10xf32>
    %521 = arith.divf %507, %520 : vector<10x10xf32>
    %cst_139 = arith.constant dense<0.000000e+00> : vector<10x16xf32>
    %522 = tpu.matmul %521, %494, %cst_139 {dimension_numbers = #tpu.dot_dimension_numbers<[1], [0], [0], [1], [0, 0, 1, 1], [], []>} : vector<10x10xf32>, vector<10x16xf32>, vector<10x16xf32> -> vector<10x16xf32>
    %cst_140 = arith.constant 0.000000e+00 : f32
    %523 = vector.broadcast %cst_140 : f32 to vector<10x16xf32>
    %524 = arith.maximumf %522, %523 : vector<10x16xf32>
    %525 = tpu.concatenate %507, %517, %521 in 1 : vector<10x10xf32>, vector<10x10xf32>, vector<10x10xf32> -> vector<10x30xf32>
    %c6 = arith.constant 6 : index
    %c0_141 = arith.constant 0 : index
    %c0_142 = arith.constant 0 : index
    %526 = vector.load %arg2[%c6, %c0_141, %c0_142] : memref<7x10x30xf32, #tpu.memory_space<vmem>>, vector<1x10x30xf32>
    %527 = vector.shape_cast %526 : vector<1x10x30xf32> to vector<10x30xf32>
    %528 = vector.shape_cast %525 : vector<10x30xf32> to vector<1x10x30xf32>
    tpu.vector_store %arg2[%c6, %c0_141, %c0_142], %528 {strides = array<i32>} : memref<7x10x30xf32, #tpu.memory_space<vmem>>, vector<1x10x30xf32>,
    %529 = tpu.concatenate %524, %472 in 1 : vector<10x16xf32>, vector<10x32xf32> -> vector<10x48xf32>
    %cst_143 = arith.constant dense<0.000000e+00> : vector<10x128xf32>
    %530 = tpu.matmul %529, %1, %cst_143 {dimension_numbers = #tpu.dot_dimension_numbers<[1], [0], [0], [1], [0, 0, 1, 1], [], []>} : vector<10x48xf32>, vector<48x128xf32>, vector<10x128xf32> -> vector<10x128xf32>
    %531 = arith.addf %530, %4 : vector<10x128xf32>
    %532 = vector.extract_strided_slice %531 {offsets = [0, 0], sizes = [10, 96], strides = [1, 1]} : vector<10x128xf32> to vector<10x96xf32>
    %533 = arith.negf %532 : vector<10x96xf32>
    %534 = math.exp %533 : vector<10x96xf32>
    %cst_144 = arith.constant 1.000000e+00 : f32
    %535 = vector.broadcast %cst_144 : f32 to vector<10x96xf32>
    %536 = arith.addf %535, %534 : vector<10x96xf32>
    %537 = arith.divf %535, %536 : vector<10x96xf32>
    %538 = vector.extract_strided_slice %537 {offsets = [0, 0], sizes = [10, 32], strides = [1, 1]} : vector<10x96xf32> to vector<10x32xf32>
    %539 = vector.extract_strided_slice %537 {offsets = [0, 32], sizes = [10, 32], strides = [1, 1]} : vector<10x96xf32> to vector<10x32xf32>
    %540 = vector.extract_strided_slice %537 {offsets = [0, 64], sizes = [10, 32], strides = [1, 1]} : vector<10x96xf32> to vector<10x32xf32>
    %541 = vector.extract_strided_slice %531 {offsets = [0, 96], sizes = [10, 32], strides = [1, 1]} : vector<10x128xf32> to vector<10x32xf32>
    %542 = math.tanh %541 : vector<10x32xf32>
    %543 = arith.mulf %539, %470 : vector<10x32xf32>
    %544 = arith.mulf %538, %542 : vector<10x32xf32>
    %545 = arith.addf %543, %544 : vector<10x32xf32>
    %546 = math.tanh %545 : vector<10x32xf32>
    %547 = arith.mulf %540, %546 : vector<10x32xf32>
    %548 = tpu.concatenate %491, %547 in 1 : vector<10x32xf32>, vector<10x32xf32> -> vector<10x64xf32>
    %c216 = arith.constant 216 : index
    %c0_145 = arith.constant 0 : index
    %549 = vector.load %arg1[%c216, %c0_145] : memref<456x128xf32, #tpu.memory_space<vmem>>, vector<64x128xf32>
    %cst_146 = arith.constant dense<0.000000e+00> : vector<10x128xf32>
    %550 = tpu.matmul %548, %549, %cst_146 {dimension_numbers = #tpu.dot_dimension_numbers<[1], [0], [0], [1], [0, 0, 1, 1], [], []>} : vector<10x64xf32>, vector<64x128xf32>, vector<10x128xf32> -> vector<10x128xf32>
    %c280 = arith.constant 280 : index
    %c0_147 = arith.constant 0 : index
    %551 = vector.load %arg1[%c280, %c0_147] : memref<456x128xf32, #tpu.memory_space<vmem>>, vector<1x128xf32>
    %552 = vector.broadcast %551 : vector<1x128xf32> to vector<10x128xf32>
    %553 = arith.addf %550, %552 : vector<10x128xf32>
    %cst_148 = arith.constant 0.000000e+00 : f32
    %554 = vector.broadcast %cst_148 : f32 to vector<10x128xf32>
    %555 = arith.maximumf %553, %554 : vector<10x128xf32>
    %c288 = arith.constant 288 : index
    %c0_149 = arith.constant 0 : index
    %556 = vector.load %arg1[%c288, %c0_149] : memref<456x128xf32, #tpu.memory_space<vmem>>, vector<128x40xf32>
    %cst_150 = arith.constant dense<0.000000e+00> : vector<10x40xf32>
    %557 = tpu.matmul %555, %556, %cst_150 {dimension_numbers = #tpu.dot_dimension_numbers<[1], [0], [0], [1], [0, 0, 1, 1], [], []>} : vector<10x128xf32>, vector<128x40xf32>, vector<10x40xf32> -> vector<10x40xf32>
    %c416 = arith.constant 416 : index
    %c0_151 = arith.constant 0 : index
    %558 = vector.load %arg1[%c416, %c0_151] : memref<456x128xf32, #tpu.memory_space<vmem>>, vector<1x40xf32>
    %559 = vector.broadcast %558 : vector<1x40xf32> to vector<10x40xf32>
    %560 = arith.addf %557, %559 : vector<10x40xf32>
    %cst_152 = arith.constant 0.000000e+00 : f32
    %561 = vector.broadcast %cst_152 : f32 to vector<10x40xf32>
    %562 = arith.maximumf %560, %561 : vector<10x40xf32>
    %c0_153 = arith.constant 0 : index
    %c0_154 = arith.constant 0 : index
    %563 = vector.load %arg3[%c0_153, %c0_154] : memref<10x40xf32, #tpu.memory_space<vmem>>, vector<10x40xf32>
    tpu.vector_store %arg3[%c0_153, %c0_154], %562 {strides = array<i32>} : memref<10x40xf32, #tpu.memory_space<vmem>>, vector<10x40xf32>,
    return
  }
  func.func @transform_0(%arg0: i32) -> (i32, i32) {
    %c0_i32 = arith.constant 0 : i32
    %c0_i32_0 = arith.constant 0 : i32
    %c0_i32_1 = arith.constant 0 : i32
    return %c0_i32, %c0_i32_0 : i32, i32
  }
  func.func @transform_1(%arg0: i32) -> (i32, i32, i32) {
    %c0_i32 = arith.constant 0 : i32
    %c0_i32_0 = arith.constant 0 : i32
    %c0_i32_1 = arith.constant 0 : i32
    %c0_i32_2 = arith.constant 0 : i32
    return %c0_i32, %c0_i32_0, %c0_i32_1 : i32, i32, i32
  }
  func.func @transform_2(%arg0: i32) -> (i32, i32) {
    %c0_i32 = arith.constant 0 : i32
    %c0_i32_0 = arith.constant 0 : i32
    %c0_i32_1 = arith.constant 0 : i32
    return %c0_i32, %c0_i32_0 : i32, i32
  }
}

</mosaic_0001>

<bundles_post_ra>
// kernel: stgat_forward.1
= control target key start
LH: loop header
LB: loop body
LE: loop exit
PB: predicated region body
PF: predicated region fallthrough
CT: control target
= control target key end

     0   :  { %vm72_vm0 = vcmask 1043456   ;;  %vm44_vm1 = vcmask 31744   ;;  %v3853_v9 = vmov 0.0   ;;  %s3854_s11 = smov 32   ;;  %s3855_s20 = smov 64   ;;  %vm131_vm10 = vcmask 261120   ;;  %s5335_s0 = inlined_call_operand.vmem [shape: f32[456,128], index: 0, kind: input, shape index: {}]   ;;  %s5336_s1 = inlined_call_operand.vmem [shape: f32[7,10,30], index: 1, kind: output, shape index: {0}]   ;;  %s5337_s2 = inlined_call_operand.vmem [shape: f32[10,40], index: 2, kind: output, shape index: {1}]  }
   0x1   :  { %v41_v0 = vld [vmem:[%s5335_s0 + $0x48] sm:$0xf]  ;;  %v32_v1 = vld [vmem:[%s5335_s0] sm:$0xff]  ;;  %v39_v3 = vld [vmem:[%s5335_s0 + $0x38] sm:$0xff]  ;;  %s3856_s23 = smov 113   ;;  %s3857_s24 = smov 111  }
   0x2   :  { %v40_v2 = vld [vmem:[%s5335_s0 + $0x40] sm:$0x3f]  ;;  %3330 = vmatpush.msk.msra.mxu0 %vm72_vm0, %v41_v0  ;;  %3500 = vmatpush.msk.msra.mxu2 %vm72_vm0, %v41_v0  ;;  %v3894_v4 = vld [vmem:[%s5335_s0 + $0x70] sm:$0xff]  ;;  %v3900_v5 = vld [vmem:[%s5335_s0 + $0x68] sm:$0xff]  ;;  %vm417_vm11 = vcmask 1041408   ;;  %vm275_vm12 = vcmask 7168  }
   0x3   :  { %3331 = vmatmul.msk.f32.vlgmr.msra.gmra.mxu0 %vm44_vm1, %v32_v1  ;;  %3339 = vmatmul.msk.f32.vlgmr.msra.gmra.mxu2 %vm44_vm1, %v40_v2  ;;  %v3906_v6 = vld [vmem:[%s5335_s0 + $0x60] sm:$0xff]  ;;  %v33_v7 = vld [vmem:[%s5335_s0 + $0x8] sm:$0xff]  ;;  %v3915_v8 = vld [vmem:[%s5335_s0 + $0x58] sm:$0xff]  ;;  %vm286_vm13 = vcmask 15360   ;;  %s3858_s16 = smov 80   ;;  %s3859_s4 = smov 10  }
   0x4   :  { %3499 = vmatpush.msk.msra.mxu1 %vm72_vm0, %v41_v0  ;;  %v34_v10 = vld [vmem:[%s5335_s0 + $0x10] sm:$0xff]  ;;  %v35_v11 = vld [vmem:[%s5335_s0 + $0x18] sm:$0xff]  ;;  %v36_v12 = vld [vmem:[%s5335_s0 + $0x20] sm:$0xff]  ;;  %s3861_s7 = smov 96  }
   0x5   :  { %3338 = vmatmul.msk.f32.vlgmr.msra.gmra.mxu1 %vm44_vm1, %v39_v3  ;;  %v37_v13 = vld [vmem:[%s5335_s0 + $0x28] sm:$0xff]  ;;  %v38_v14 = vld [vmem:[%s5335_s0 + $0x30] sm:$0xff] }
   0x6   :  { %147 = vmatpush.msrb.mxu1 %v3894_v4  ;;  %v3510_v15 = vld [vmem:[%s5335_s0 + $0x50] ss:$0 sm:$0xff] }
   0x8   :  { %148 = vmatpush.msrb.mxu1 %v3900_v5 }
   0xa   :  { %149 = vmatpush.msrb.mxu1 %v3906_v6 }
   0xb   :  { %3332 = vmatmul.msk.f32.gmra.mxu0 %vm44_vm1, %v33_v7 }
   0xc   :  { %150 = vmatpush.msrb.mxu1 %v3915_v8 }
   0xd   :  { %151 = vmatmul.f32.vlgmr.msrb.gmra.mxu1 %v3853_v9 }
  0x13   :  { %3333 = vmatmul.msk.f32.gmra.mxu0 %vm44_vm1, %v34_v10 }
  0x15   :  { %154 = vmatmul.f32.gmra.mxu1 %v3853_v9 }
  0x1b   :  { %3334 = vmatmul.msk.f32.gmra.mxu0 %vm44_vm1, %v35_v11 }
  0x23   :  { %3335 = vmatmul.msk.f32.gmra.mxu0 %vm44_vm1, %v36_v12 }
  0x2b   :  { %3336 = vmatmul.msk.f32.gmra.mxu0 %vm44_vm1, %v37_v13 }
  0x33   :  { %3337 = vmatmul.msk.f32.gmra.mxu0 %vm44_vm1, %v38_v14 }
  0x80   :  { %v93_v16 = vpop.f32.mrf.mxu0 }
  0x81   :  { %v94_v17 = vadd.f32 %v3510_v15, %v93_v16 }
  0x82   :  { %v114_v18 = vpop.f32.mrf.mxu1 }
  0x83   :  { %v115_v19 = vadd.f32 %v3510_v15, %v114_v18 }
  0x85   :  { %127 = vst [vmem:[#allocation2 + $0x38] sm:$0xff] %v115_v19  ;;  %v3958_v19 = vld [vmem:[%s5335_s0 + $0xc8] sm:$0xff] }
  0x86   :  { %v117_v20 = vpop.f32.mrf.mxu2  ;;  %256 = vmatpush.msrb.mxu2 %v3958_v19 }
  0x87   :  { %v118_v21 = vadd.f32 %v3510_v15, %v117_v20  ;;  %v3963_v20 = vld [vmem:[%s5335_s0 + $0xc0] sm:$0xff] }
  0x88   :  { %v96_v22 = vpop.f32.mrf.mxu0  ;;  %257 = vmatpush.msrb.mxu2 %v3963_v20 }
  0x89   :  { %128 = vst [vmem:[#allocation2 + $0x40] sm:$0x3f] %v118_v21  ;;  %v97_v23 = vadd.f32 %v3510_v15, %v96_v22  ;;  %v3969_v21 = vld [vmem:[%s5335_s0 + $0xb8] sm:$0xff]  ;;  %v3975_v22 = vld [vmem:[%s5335_s0 + $0xb0] sm:$0xff] }
  0x8a   :  { %v152_v24 = vpop.f32.mrf.mxu1  ;;  %258 = vmatpush.msrb.mxu2 %v3969_v21 }
  0x8b   :  { %121 = vst [vmem:[#allocation2 + $0x8] sm:$0xff] %v97_v23  ;;  %v158_v25 = vadd.f32 %v152_v24, %v94_v17 }
  0x8c   :  { %259 = vmatpush.msrb.mxu2 %v3975_v22 }
  0x8d   :  { %3515 = vtanh.f32 %v158_v25  ;;  %v3340_v41 = vmul.f32 -1.442695, %v158_v25 }
  0x90   :  { %v99_v26 = vpop.f32.mrf.mxu0 }
  0x91   :  { %v100_v27 = vadd.f32 %v3510_v15, %v99_v26 }
  0x92   :  { %v130_v28 = vld [vmem:[#allocation2 + $0x8] sm:$0x3]  ;;  %v155_v29 = vpop.f32.mrf.mxu1 }
  0x93   :  { %v3516_v30 = vpop.eup %3515  ;;  %122 = vst [vmem:[#allocation2 + $0x10] sm:$0xff] %v100_v27  ;;  %v159_v31 = vadd.f32 %v155_v29, %v130_v28  ;;  %v3986_v29 = vld [vmem:[%s5335_s0 + $0xd0] ss:$0 sm:$0xff] }
  0x94   :  { %204 = vrot.lane.b32.xlu0 %v3516_v30, %s3854_s11 }
  0x95   :  { %3517 = vtanh.f32 %v159_v31  ;;  %v3341_v42 = vmul.f32 -1.442695, %v159_v31 }
  0x96   :  { %3519 = vpow2.f32 %v3340_v41 }
  0x97   :  { %3521 = vpow2.f32 %v3341_v42 }
  0x98   :  { %v102_v32 = vpop.f32.mrf.mxu0 }
  0x99   :  { %v103_v33 = vadd.f32 %v3510_v15, %v102_v32 }
  0x9b   :  { %v3518_v34 = vpop.eup %3517  ;;  %123 = vst [vmem:[#allocation2 + $0x18] sm:$0xff] %v103_v33 }
  0x9c   :  { %206 = vrot.lane.b32.xlu0 %v3518_v34, %s3854_s11  ;;  %v3520_v43 = vpop.eup %3519 }
  0x9d   :  { %v166_v44 = vadd.f32 1.0, %v3520_v43  ;;  %v3522_v45 = vpop.eup %3521 }
  0x9e   :  { %v167_v46 = vadd.f32 1.0, %v3522_v45 }
  0x9f   :  { %3523 = vrcp.f32 %v166_v44  ;;  %v179_v55 = vand.u32 2147483648, %v166_v44  ;;  %vm173_vm3 = vweird.f32 %v166_v44  ;;  %v177_v56 = vand.u32 2147483647, %v166_v44 }
  0xa0   :  { %v105_v35 = vpop.f32.mrf.mxu0  ;;  %3525 = vrcp.f32 %v167_v46  ;;  %vm188_vm6 = vweird.f32 %v167_v46  ;;  %v194_v0 = vand.u32 2147483648, %v167_v46  ;;  %v192_v1 = vand.u32 2147483647, %v167_v46 }
  0xa1   :  { %v106_v36 = vadd.f32 %v3510_v15, %v105_v35  ;;  %v180_v59 = vor.u32 1.1754944e-38, %v179_v55  ;;  %vm178_vm5 = vcmp.eq.f32.partialorder %v177_v56, 8.507059e+37 }
  0xa2   :  { %v195_v3 = vor.u32 1.1754944e-38, %v194_v0  ;;  %vm193_vm9 = vcmp.eq.f32.partialorder %v192_v1, 8.507059e+37 }
  0xa3   :  { %124 = vst [vmem:[#allocation2 + $0x20] sm:$0xff] %v106_v36 }
  0xa5   :  { %v3524_v47 = vpop.eup %3523 }
  0xa6   :  { %v169_v48 = vmul.f32 %v3524_v47, %v166_v44  ;;  %v3526_v50 = vpop.eup %3525  ;;  %vm174_vm2 = vweird.f32 %v3524_v47  ;;  %v575_v44 = vld [vmem:[#allocation2 + $0xa] sm:$0xff] }
  0xa7   :  { %v184_v52 = vmul.f32 %v3526_v50, %v167_v46  ;;  %vm175_vm4 = vmor %vm173_vm3, %vm174_vm2  ;;  %vm189_vm7 = vweird.f32 %v3526_v50 }
  0xa8   :  { %v108_v37 = vpop.f32.mrf.mxu0  ;;  %v170_v49 = vsub.f32 1.0, %v169_v48  ;;  %vm190_vm8 = vmor %vm188_vm6, %vm189_vm7  ;;  %vm373_vm7 = vcmask 80896  }
  0xa9   :  { %v109_v38 = vadd.f32 %v3510_v15, %v108_v37  ;;  %v185_v54 = vsub.f32 1.0, %v184_v52 }
  0xaa   :  { %v171_v51 = vmul.f32 %v3524_v47, %v170_v49 }
  0xab   :  { %125 = vst [vmem:[#allocation2 + $0x28] sm:$0xff] %v109_v38  ;;  %v186_v58 = vmul.f32 %v3526_v50, %v185_v54 }
  0xac   :  { %v172_v53 = vadd.f32 %v3524_v47, %v171_v51 }
  0xad   :  { %v187_v63 = vadd.f32 %v3526_v50, %v186_v58 }
  0xae   :  { %v176_v57 = vsel %vm175_vm4, %v3524_v47, %v172_v53  ;;  %v576_v47 = vld [vmem:[#allocation2 + $0x12] sm:$0x3] }
  0xaf   :  { %v181_v61 = vsel %vm178_vm5, %v180_v59, %v176_v57  ;;  %v191_v2 = vsel %vm190_vm8, %v3526_v50, %v187_v63 }
  0xb0   :  { %v111_v39 = vpop.f32.mrf.mxu0  ;;  %v196_v9 = vsel %vm193_vm9, %v195_v3, %v191_v2  ;;  %v200_v11 = vmul.f32 0.0, %v181_v61  ;;  %vm377_vm9 = vcmask 74752  }
  0xb1   :  { %v112_v40 = vadd.f32 %v3510_v15, %v111_v39  ;;  %v201_v14 = vmul.f32 0.0, %v196_v9 }
  0xb3   :  { %126 = vst [vmem:[#allocation2 + $0x30] sm:$0xff] %v112_v40 }
 0x106   :  { %v205_v60 = vpop.permute.xlu0 %204 }
 0x107   :  { %v210_v62 = vmul.f32 %v205_v60, %v181_v61 }
 0x109   :  { %214 = vrot.lane.b32.xlu1 %v210_v62, %s3854_s11 }
 0x10e   :  { %v207_v7 = vpop.permute.xlu0 %206 }
 0x10f   :  { %v211_v10 = vmul.f32 %v207_v7, %v196_v9 }
 0x111   :  { %216 = vrot.lane.b32.xlu1 %v211_v10, %s3854_s11 }
 0x17b   :  { %v215_v12 = vpop.permute.xlu1 %214 }
 0x17c   :  { %v3947_v13 = vadd.f32 %v215_v12, %v200_v11 }
 0x17e   :  { %3527 = vtanh.f32 %v3947_v13 }
 0x183   :  { %v217_v15 = vpop.permute.xlu1 %216 }
 0x184   :  { %v3528_v16 = vpop.eup %3527  ;;  %v3950_v17 = vadd.f32 %v217_v15, %v201_v14 }
 0x185   :  { %226 = vrot.lane.b32.xlu2 %v3528_v16, %s3854_s11 }
 0x186   :  { %3529 = vtanh.f32 %v3950_v17 }
 0x18c   :  { %v3530_v18 = vpop.eup %3529 }
 0x18d   :  { %228 = vrot.lane.b32.xlu2 %v3530_v18, %s3854_s11 }
 0x1df   :  { %v227_v23 = vpop.permute.xlu2 %226 }
 0x1e0   :  { %v232_v24 = vmul.f32 %v227_v23, %v181_v61 }
 0x1e2   :  { %236 = vrot.lane.b32.xlu0 %v232_v24, %s3855_s20 }
 0x1e7   :  { %v229_v25 = vpop.permute.xlu2 %228 }
 0x1e8   :  { %v233_v26 = vmul.f32 %v229_v25, %v196_v9 }
 0x1ea   :  { %238 = vrot.lane.b32.xlu1 %v233_v26, %s3855_s20 }
 0x254   :  { %v237_v27 = vpop.permute.xlu0 %236 }
 0x255   :  { %3342 = vmatmul.msk.f32.vlgmr.msrb.gmra.mxu2 %vm131_vm10, %v237_v27 }
 0x25c   :  { %v239_v28 = vpop.permute.xlu1 %238 }
 0x25d   :  { %3343 = vmatmul.msk.f32.gmra.mxu2 %vm131_vm10, %v239_v28 }
 0x2d8   :  { %v261_v30 = vpop.f32.mrf.mxu2 }
 0x2d9   :  { %v262_v31 = vadd.f32 %v3986_v29, %v261_v30 }
 0x2db   :  { %269 = vrot.lane.b32.xlu0 %v262_v31, %s3856_s23  ;;  %278 = vrot.lane.b32.xlu1 %v262_v31, %s3857_s24 }
 0x2e0   :  { %v264_v32 = vpop.f32.mrf.mxu2 }
 0x2e1   :  { %v265_v33 = vadd.f32 %v3986_v29, %v264_v32 }
 0x2e3   :  { %271 = vrot.lane.b32.xlu2 %v265_v33, %s3856_s23  ;;  %3352 = vmatpush.msk.msra.mxu2 %vm417_vm11, %v265_v33 }
 0x2e5   :  { %435 = vmatpush.msra.mxu2 %v262_v31 }
 0x2e7   :  { %698 = vmatpush.msrb.mxu2 %v3958_v19 }
 0x2e9   :  { %699 = vmatpush.msrb.mxu2 %v3963_v20 }
 0x2eb   :  { %700 = vmatpush.msrb.mxu2 %v3969_v21  ;;  %280 = vrot.lane.b32.xlu2 %v265_v33, %s3857_s24 }
 0x2ed   :  { %701 = vmatpush.msrb.mxu2 %v3975_v22 }
 0x33d   :  { %v272_v34 = vpop.permute.xlu2 %271 }
 0x33e   :  { %v277_v35 = vsel %vm275_vm12, 1.0, %v272_v34  ;;  %v4034_v34 = vld [vmem:[%s5335_s0 + $0x1a8] sm:$0xff] }
 0x33f   :  { %3348 = vmatpush.xpose.msk.msra.mxu1 %vm286_vm13, %v277_v35 }
 0x345   :  { %v281_v36 = vpop.permute.xlu2 %280 }
 0x346   :  { %v285_v37 = vsel %vm275_vm12, %v281_v36, 1.0 }
 0x347   :  { %3344 = vmatpush.xpose.msk.msra.mxu3 %vm286_vm13, %v285_v37 }
 0x34d   :  { %v270_v38 = vpop.permute.xlu0 %269  ;;  %v279_v39 = vpop.permute.xlu1 %278 }
 0x34e   :  { %v276_v40 = vsel %vm275_vm12, 1.0, %v270_v38  ;;  %v284_v41 = vsel %vm275_vm12, %v279_v39, 1.0 }
 0x34f   :  { %3345 = vmatpush.xpose.msk.msra.mxu3 %vm286_vm13, %v284_v41  ;;  %3349 = vmatpush.xpose.msk.msra.mxu1 %vm286_vm13, %v276_v40 }
 0x352   :  { %3346 = vmatmul.msk.f32.vlgmr.msra.gmra.mxu3 %vm286_vm13, %v276_v40  ;;  %3350 = vmatmul.msk.f32.vlgmr.msra.gmra.mxu1 %vm286_vm13, %v284_v41 }
 0x353   :  { %589 = vmatpush.msrb.mxu1 %v3894_v4 }
 0x355   :  { %590 = vmatpush.msrb.mxu1 %v3900_v5 }
 0x357   :  { %591 = vmatpush.msrb.mxu1 %v3906_v6 }
 0x359   :  { %592 = vmatpush.msrb.mxu1 %v3915_v8 }
 0x35a   :  { %3347 = vmatmul.msk.f32.gmra.mxu3 %vm286_vm13, %v277_v35  ;;  %3351 = vmatmul.msk.f32.gmra.mxu1 %vm286_vm13, %v285_v37 }
 0x362   :  { %3359 = vmatmul.msk.f32.vlgmr.msrb.gmra.mxu1 %vm131_vm10, %v237_v27 }
 0x36a   :  { %3360 = vmatmul.msk.f32.gmra.mxu1 %vm131_vm10, %v239_v28 }
 0x3cf   :  { %v4017_v42 = vpop.f32.mrf.mxu1 }
 0x3d5   :  { %v316_v28 = vpop.f32.mrf.mxu3 }
 0x3d6   :  { %v347_v30 = vmul.f32 0.2, %v316_v28  ;;  %vm345_vm6 = vcmp.ge.f32.partialorder %v316_v28, 0.0 }
 0x3d7   :  { %v4019_v43 = vpop.f32.mrf.mxu1 }
 0x3d8   :  { %v349_v31 = vsel %vm345_vm6, %v316_v28, %v347_v30  ;;  %vm468_vm6 = vcmask 130048  }
 0x3d9   :  { %v351_v32 = vmul.f32 1.442695, %v349_v31 }
 0x3dd   :  { %v319_v41 = vpop.f32.mrf.mxu3 }
 0x3de   :  { %vm346_vm8 = vcmp.ge.f32.partialorder %v319_v41, 0.0 }
 0x3df   :  { %v594_v45 = vpop.f32.mrf.mxu1 }
 0x3e0   :  { %v600_v46 = vadd.f32 %v594_v45, %v575_v44  ;;  %v348_v44 = vmul.f32 0.2, %v319_v41 }
 0x3e2   :  { %3531 = vtanh.f32 %v600_v46  ;;  %v3361_v52 = vmul.f32 -1.442695, %v600_v46  ;;  %v350_v45 = vsel %vm346_vm8, %v319_v41, %v348_v44  ;;  %vm471_vm8 = vcmask 392192  }
 0x3e7   :  { %v597_v48 = vpop.f32.mrf.mxu1 }
 0x3e8   :  { %v3532_v49 = vpop.eup %3531  ;;  %v601_v50 = vadd.f32 %v597_v48, %v576_v47 }
 0x3e9   :  { %646 = vrot.lane.b32.xlu0 %v3532_v49, %s3854_s11  ;;  %v353_v49 = vmul.f32 1.442695, %v350_v45 }
 0x3ea   :  { %3533 = vtanh.f32 %v601_v50  ;;  %v3362_v53 = vmul.f32 -1.442695, %v601_v50 }
 0x3eb   :  { %3535 = vpow2.f32 %v3361_v52 }
 0x3ec   :  { %3537 = vpow2.f32 %v3362_v53 }
 0x3f0   :  { %v3534_v51 = vpop.eup %3533 }
 0x3f1   :  { %648 = vrot.lane.b32.xlu1 %v3534_v51, %s3854_s11  ;;  %v3536_v54 = vpop.eup %3535  ;;  %v4056_v51 = vld [vmem:[%s5335_s0 + $0x1b0] sm:$0x3] }
 0x3f2   :  { %v608_v55 = vadd.f32 1.0, %v3536_v54  ;;  %v3538_v56 = vpop.eup %3537 }
 0x3f3   :  { %v609_v57 = vadd.f32 1.0, %v3538_v56 }
 0x3f4   :  { %3539 = vrcp.f32 %v608_v55  ;;  %v621_v2 = vand.u32 2147483648, %v608_v55  ;;  %vm615_vm15 = vweird.f32 %v608_v55  ;;  %v619_v3 = vand.u32 2147483647, %v608_v55 }
 0x3f5   :  { %3541 = vrcp.f32 %v609_v57  ;;  %v636_v16 = vand.u32 2147483648, %v609_v57  ;;  %vm630_vm3 = vweird.f32 %v609_v57  ;;  %v634_v18 = vand.u32 2147483647, %v609_v57 }
 0x3f6   :  { %v622_v10 = vor.u32 1.1754944e-38, %v621_v2  ;;  %vm620_vm1 = vcmp.eq.f32.partialorder %v619_v3, 8.507059e+37  ;;  %3543 = vpow2.f32 %v351_v32  ;;  %v4073_v3 = vld [vmem:[%s5335_s0 + $0xa0] sm:$0xff] }
 0x3f7   :  { %v637_v24 = vor.u32 1.1754944e-38, %v636_v16  ;;  %vm635_vm5 = vcmp.eq.f32.partialorder %v634_v18, 8.507059e+37  ;;  %488 = vmatpush.msrb.mxu3 %v4073_v3  ;;  %v4102_v32 = vld [vmem:[%s5335_s0 + $0x80] sm:$0xff] }
 0x3fa   :  { %v3540_v58 = vpop.eup %3539 }
 0x3fb   :  { %v611_v59 = vmul.f32 %v3540_v58, %v608_v55  ;;  %v3542_v61 = vpop.eup %3541  ;;  %vm616_vm14 = vweird.f32 %v3540_v58 }
 0x3fc   :  { %v626_v63 = vmul.f32 %v3542_v61, %v609_v57  ;;  %vm617_vm0 = vmor %vm615_vm15, %vm616_vm14  ;;  %vm631_vm2 = vweird.f32 %v3542_v61  ;;  %v3544_v33 = vpop.eup %3543 }
 0x3fd   :  { %v612_v60 = vsub.f32 1.0, %v611_v59  ;;  %vm632_vm4 = vmor %vm630_vm3, %vm631_vm2  ;;  %v4037_v35 = vmul.f32 %v3544_v33, %v4034_v34  ;;  %v4110_v33 = vld [vmem:[%s5335_s0 + $0x78] sm:$0xff] }
 0x3fe   :  { %v627_v1 = vsub.f32 1.0, %v626_v63 }
 0x3ff   :  { %v613_v62 = vmul.f32 %v3540_v58, %v612_v60  ;;  %v374_v36 = vsel %vm373_vm7, %v4037_v35, 0.0 }
 0x400   :  { %v628_v9 = vmul.f32 %v3542_v61, %v627_v1 }
 0x401   :  { %v614_v0 = vadd.f32 %v3540_v58, %v613_v62 }
 0x402   :  { %v629_v15 = vadd.f32 %v3542_v61, %v628_v9 }
 0x403   :  { %v618_v7 = vsel %vm617_vm0, %v3540_v58, %v614_v0 }
 0x404   :  { %v4023_v12 = vsel %vm620_vm1, %v622_v10, %v618_v7  ;;  %v633_v23 = vsel %vm632_vm4, %v3542_v61, %v629_v15  ;;  %v4078_v7 = vld [vmem:[%s5335_s0 + $0x98] sm:$0xff] }
 0x405   :  { %v4027_v26 = vsel %vm635_vm5, %v637_v24, %v633_v23  ;;  %v642_v37 = vmul.f32 %v4023_v12, %v3947_v13  ;;  %489 = vmatpush.msrb.mxu3 %v4078_v7 }
 0x406   :  { %v643_v46 = vmul.f32 %v4027_v26, %v3950_v17 }
 0x45b   :  { %v647_v11 = vpop.permute.xlu0 %646 }
 0x45c   :  { %v652_v14 = vmul.f32 %v647_v11, %v4023_v12  ;;  %v4085_v11 = vld [vmem:[%s5335_s0 + $0x90] sm:$0xff] }
 0x45d   :  { %490 = vmatpush.msrb.mxu3 %v4085_v11 }
 0x45e   :  { %656 = vrot.lane.b32.xlu2 %v652_v14, %s3854_s11 }
 0x463   :  { %v649_v25 = vpop.permute.xlu1 %648 }
 0x464   :  { %v653_v27 = vmul.f32 %v649_v25, %v4027_v26 }
 0x466   :  { %658 = vrot.lane.b32.xlu0 %v653_v27, %s3854_s11 }
 0x487   :  { %375 = vadd.xlane.f32.xlu2 %v374_v36 }
 0x4b8   :  { %v657_v38 = vpop.permute.xlu2 %656 }
 0x4b9   :  { %v4043_v39 = vadd.f32 %v657_v38, %v642_v37 }
 0x4bb   :  { %3545 = vtanh.f32 %v4043_v39 }
 0x4c1   :  { %v3546_v40 = vpop.eup %3545 }
 0x4c2   :  { %668 = vrot.lane.b32.xlu1 %v3546_v40, %s3854_s11 }
 0x4d8   :  { %v659_v47 = vpop.permute.xlu0 %658 }
 0x4d9   :  { %v4049_v48 = vadd.f32 %v659_v47, %v643_v46 }
 0x4db   :  { %3547 = vtanh.f32 %v4049_v48 }
 0x4dc   :  { %3549 = vpow2.f32 %v353_v49 }
 0x4e1   :  { %v3548_v13 = vpop.eup %3547 }
 0x4e2   :  { %670 = vrot.lane.b32.xlu0 %v3548_v13, %s3854_s11  ;;  %v3550_v50 = vpop.eup %3549 }
 0x4e3   :  { %v4059_v52 = vmul.f32 %v3550_v50, %v4056_v51 }
 0x4e5   :  { %v378_v17 = vsel %vm377_vm9, %v4059_v52, 0.0 }
 0x4ec   :  { %379 = vadd.xlane.f32.xlu1 %v378_v17 }
 0x4fa   :  { %v376_v53 = vpop.xlane.xlu2 %375 }
 0x4fb   :  { %3551 = vrcp.f32 %v376_v53  ;;  %v392_v57 = vand.u32 2147483648, %v376_v53  ;;  %v390_v59 = vand.u32 2147483647, %v376_v53  ;;  %vm386_vm15 = vweird.f32 %v376_v53 }
 0x4fd   :  { %v393_v61 = vor.u32 1.1754944e-38, %v392_v57  ;;  %vm391_vm1 = vcmp.eq.f32.partialorder %v390_v59, 8.507059e+37  ;;  %v1017_v57 = vld [vmem:[#allocation2 + $0x1c] sm:$0x3] }
 0x501   :  { %v3552_v54 = vpop.eup %3551 }
 0x502   :  { %v382_v55 = vmul.f32 %v3552_v54, %v376_v53  ;;  %vm387_vm14 = vweird.f32 %v3552_v54 }
 0x503   :  { %vm388_vm0 = vmor %vm386_vm15, %vm387_vm14 }
 0x504   :  { %v383_v56 = vsub.f32 1.0, %v382_v55 }
 0x506   :  { %v384_v58 = vmul.f32 %v3552_v54, %v383_v56 }
 0x508   :  { %v385_v60 = vadd.f32 %v3552_v54, %v384_v58 }
 0x50a   :  { %v389_v62 = vsel %vm388_vm0, %v3552_v54, %v385_v60 }
 0x50b   :  { %v394_v63 = vsel %vm391_vm1, %v393_v61, %v389_v62 }
 0x50c   :  { %v4064_v0 = vmul.f32 %v394_v63, %v4037_v35 }
 0x50e   :  { %5350 = vst [vmem:[#allocation3_spill] sm:$0xff] %v4064_v0  ;;  %3353 = vmatmul.msk.f32.vlgmr.msra.gmra.mxu2 %vm373_vm7, %v4064_v0 }
 0x534   :  { %v669_v1 = vpop.permute.xlu1 %668 }
 0x535   :  { %v674_v2 = vmul.f32 %v669_v1, %v4023_v12  ;;  %v4092_v12 = vld [vmem:[%s5335_s0 + $0x88] sm:$0xff] }
 0x536   :  { %491 = vmatpush.msrb.mxu3 %v4092_v12 }
 0x537   :  { %678 = vrot.lane.b32.xlu0 %v674_v2, %s3855_s20 }
 0x538   :  { %492 = vmatpush.msrb.mxu3 %v4102_v32 }
 0x53a   :  { %493 = vmatpush.msrb.mxu3 %v4110_v33 }
 0x554   :  { %v671_v9 = vpop.permute.xlu0 %670 }
 0x555   :  { %v675_v10 = vmul.f32 %v671_v9, %v4027_v26 }
 0x557   :  { %680 = vrot.lane.b32.xlu0 %v675_v10, %s3855_s20 }
 0x55f   :  { %v380_v14 = vpop.xlane.xlu1 %379 }
 0x560   :  { %3553 = vrcp.f32 %v380_v14  ;;  %v407_v23 = vand.u32 2147483648, %v380_v14  ;;  %v405_v25 = vand.u32 2147483647, %v380_v14  ;;  %vm401_vm3 = vweird.f32 %v380_v14 }
 0x562   :  { %v408_v27 = vor.u32 1.1754944e-38, %v407_v23  ;;  %vm406_vm5 = vcmp.eq.f32.partialorder %v405_v25, 8.507059e+37 }
 0x566   :  { %v3554_v15 = vpop.eup %3553 }
 0x567   :  { %v397_v16 = vmul.f32 %v3554_v15, %v380_v14  ;;  %vm402_vm2 = vweird.f32 %v3554_v15 }
 0x568   :  { %vm403_vm4 = vmor %vm401_vm3, %vm402_vm2 }
 0x569   :  { %v398_v18 = vsub.f32 1.0, %v397_v16 }
 0x56b   :  { %v399_v24 = vmul.f32 %v3554_v15, %v398_v18 }
 0x56d   :  { %v400_v26 = vadd.f32 %v3554_v15, %v399_v24 }
 0x56f   :  { %v404_v28 = vsel %vm403_vm4, %v3554_v15, %v400_v26 }
 0x570   :  { %v409_v30 = vsel %vm406_vm5, %v408_v27, %v404_v28 }
 0x571   :  { %v4097_v31 = vmul.f32 %v409_v30, %v4059_v52 }
 0x573   :  { %3354 = vmatmul.msk.f32.gmra.mxu2 %vm373_vm7, %v4097_v31 }
 0x591   :  { %v437_v36 = vpop.f32.mrf.mxu2 }
 0x592   :  { %v443_v37 = vmax.f32 %v437_v36, 0.0 }
 0x594   :  { %v469_v38 = vsel %vm468_vm6, %v443_v37, 0.0 }
 0x595   :  { %3355 = vmatmul.msk.f32.vlgmr.msrb.gmra.mxu3 %vm471_vm8, %v469_v38 }
 0x5a9   :  { %v679_v40 = vpop.permute.xlu0 %678 }
 0x5aa   :  { %3363 = vmatmul.msk.f32.vlgmr.msrb.gmra.mxu2 %vm131_vm10, %v679_v40 }
 0x5c9   :  { %v681_v41 = vpop.permute.xlu0 %680 }
 0x5ca   :  { %3364 = vmatmul.msk.f32.gmra.mxu2 %vm131_vm10, %v681_v41 }
 0x5f6   :  { %v440_v44 = vpop.f32.mrf.mxu2 }
 0x5f7   :  { %v444_v45 = vmax.f32 %v440_v44, 0.0 }
 0x5f9   :  { %v470_v46 = vsel %vm468_vm6, %v444_v45, 0.0 }
 0x5fa   :  { %3356 = vmatmul.msk.f32.gmra.mxu3 %vm471_vm8, %v470_v46 }
 0x62d   :  { %v703_v47 = vpop.f32.mrf.mxu2 }
 0x62e   :  { %v704_v49 = vadd.f32 %v3986_v29, %v703_v47 }
 0x630   :  { %719 = vrot.lane.b32.xlu2 %v704_v49, %s3857_s24 }
 0x64d   :  { %v706_v13 = vpop.f32.mrf.mxu2 }
 0x64e   :  { %v707_v50 = vadd.f32 %v3986_v29, %v706_v13  ;;  %v4164_v13 = vpop.f32.mrf.mxu3 }
 0x650   :  { %713 = vrot.lane.b32.xlu0 %v707_v50, %s3856_s23  ;;  %3373 = vmatpush.msk.msra.mxu2 %vm417_vm11, %v707_v50 }
 0x652   :  { %872 = vmatpush.msra.mxu2 %v704_v49 }
 0x654   :  { %1139 = vmatpush.msrb.mxu2 %v3958_v19 }
 0x656   :  { %1140 = vmatpush.msrb.mxu2 %v3963_v20 }
 0x658   :  { %1141 = vmatpush.msrb.mxu2 %v3969_v21  ;;  %711 = vrot.lane.b32.xlu0 %v704_v49, %s3856_s23 }
 0x65a   :  { %1142 = vmatpush.msrb.mxu2 %v3975_v22 }
 0x660   :  { %721 = vrot.lane.b32.xlu0 %v707_v50, %s3857_s24 }
 0x68a   :  { %v720_v55 = vpop.permute.xlu2 %719 }
 0x68b   :  { %v725_v19 = vsel %vm275_vm12, %v720_v55, 1.0 }
 0x6c2   :  { %v714_v17 = vpop.permute.xlu0 %713 }
 0x6c3   :  { %v718_v53 = vsel %vm275_vm12, 1.0, %v714_v17 }
 0x6c4   :  { %3369 = vmatpush.xpose.msk.msra.mxu1 %vm286_vm13, %v718_v53 }
 0x6ca   :  { %v712_v54 = vpop.permute.xlu0 %711 }
 0x6cb   :  { %v717_v56 = vsel %vm275_vm12, 1.0, %v712_v54  ;;  %v4170_v54 = vpop.f32.mrf.mxu3 }
 0x6cc   :  { %3370 = vmatpush.xpose.msk.msra.mxu1 %vm286_vm13, %v717_v56 }
 0x6cf   :  { %3371 = vmatmul.msk.f32.vlgmr.msra.gmra.mxu1 %vm286_vm13, %v725_v19 }
 0x6d0   :  { %1030 = vmatpush.msrb.mxu1 %v3894_v4 }
 0x6d2   :  { %1031 = vmatpush.msrb.mxu1 %v3900_v5  ;;  %v722_v20 = vpop.permute.xlu0 %721 }
 0x6d3   :  { %v726_v21 = vsel %vm275_vm12, %v722_v20, 1.0 }
 0x6d4   :  { %1032 = vmatpush.msrb.mxu1 %v3906_v6  ;;  %3365 = vmatpush.xpose.msk.msra.mxu3 %vm286_vm13, %v726_v21  ;;  %v1016_v6 = vld [vmem:[#allocation2 + $0x14] sm:$0xff] }
 0x6d6   :  { %1033 = vmatpush.msrb.mxu1 %v3915_v8 }
 0x6d7   :  { %3372 = vmatmul.msk.f32.gmra.mxu1 %vm286_vm13, %v726_v21 }
 0x6d8   :  { %3366 = vmatpush.xpose.msk.msra.mxu3 %vm286_vm13, %v725_v19 }
 0x6db   :  { %3367 = vmatmul.msk.f32.vlgmr.msra.gmra.mxu3 %vm286_vm13, %v717_v56 }
 0x6dc   :  { %929 = vmatpush.msrb.mxu3 %v4073_v3 }
 0x6de   :  { %930 = vmatpush.msrb.mxu3 %v4078_v7 }
 0x6df   :  { %3382 = vmatmul.msk.f32.vlgmr.msrb.gmra.mxu1 %vm131_vm10, %v679_v40 }
 0x6e0   :  { %931 = vmatpush.msrb.mxu3 %v4085_v11 }
 0x6e2   :  { %932 = vmatpush.msrb.mxu3 %v4092_v12 }
 0x6e3   :  { %3368 = vmatmul.msk.f32.gmra.mxu3 %vm286_vm13, %v718_v53 }
 0x6e4   :  { %933 = vmatpush.msrb.mxu3 %v4102_v32 }
 0x6e6   :  { %934 = vmatpush.msrb.mxu3 %v4110_v33 }
 0x6e7   :  { %3383 = vmatmul.msk.f32.gmra.mxu1 %vm131_vm10, %v681_v41 }
 0x74c   :  { %v4154_v4 = vpop.f32.mrf.mxu1 }
 0x754   :  { %v4156_v5 = vpop.f32.mrf.mxu1 }
 0x75c   :  { %v1035_v8 = vpop.f32.mrf.mxu1 }
 0x75d   :  { %v1041_v22 = vadd.f32 %v1035_v8, %v1016_v6 }
 0x75e   :  { %v756_v55 = vpop.f32.mrf.mxu3 }
 0x75f   :  { %3555 = vtanh.f32 %v1041_v22  ;;  %v3384_v62 = vmul.f32 -1.442695, %v1041_v22  ;;  %v787_v56 = vmul.f32 0.2, %v756_v55 }
 0x764   :  { %v1038_v58 = vpop.f32.mrf.mxu1 }
 0x765   :  { %v3556_v59 = vpop.eup %3555  ;;  %v1042_v60 = vadd.f32 %v1038_v58, %v1017_v57 }
 0x766   :  { %1087 = vrot.lane.b32.xlu1 %v3556_v59, %s3854_s11 }
 0x767   :  { %3557 = vtanh.f32 %v1042_v60  ;;  %v3385_v63 = vmul.f32 -1.442695, %v1042_v60 }
 0x768   :  { %3559 = vpow2.f32 %v3384_v62 }
 0x769   :  { %3561 = vpow2.f32 %v3385_v63 }
 0x76d   :  { %v3558_v61 = vpop.eup %3557 }
 0x76e   :  { %1089 = vrot.lane.b32.xlu0 %v3558_v61, %s3854_s11  ;;  %v3560_v1 = vpop.eup %3559 }
 0x76f   :  { %v1049_v2 = vadd.f32 1.0, %v3560_v1  ;;  %v3562_v9 = vpop.eup %3561 }
 0x770   :  { %v1050_v10 = vadd.f32 1.0, %v3562_v9 }
 0x771   :  { %3563 = vrcp.f32 %v1049_v2  ;;  %v1062_v27 = vand.u32 2147483648, %v1049_v2  ;;  %vm1056_vm15 = vweird.f32 %v1049_v2  ;;  %v1060_v28 = vand.u32 2147483647, %v1049_v2 }
 0x772   :  { %3565 = vrcp.f32 %v1050_v10  ;;  %v1077_v45 = vand.u32 2147483648, %v1050_v10  ;;  %vm1071_vm3 = vweird.f32 %v1050_v10  ;;  %v1075_v46 = vand.u32 2147483647, %v1050_v10 }
 0x773   :  { %v1063_v37 = vor.u32 1.1754944e-38, %v1062_v27  ;;  %vm1061_vm1 = vcmp.eq.f32.partialorder %v1060_v28, 8.507059e+37 }
 0x774   :  { %v1078_v49 = vor.u32 1.1754944e-38, %v1077_v45  ;;  %vm1076_vm5 = vcmp.eq.f32.partialorder %v1075_v46, 8.507059e+37 }
 0x777   :  { %v3564_v14 = vpop.eup %3563 }
 0x778   :  { %v1052_v15 = vmul.f32 %v3564_v14, %v1049_v2  ;;  %v3566_v18 = vpop.eup %3565  ;;  %vm1057_vm14 = vweird.f32 %v3564_v14 }
 0x779   :  { %v1067_v24 = vmul.f32 %v3566_v18, %v1050_v10  ;;  %vm1058_vm0 = vmor %vm1056_vm15, %vm1057_vm14  ;;  %vm1072_vm2 = vweird.f32 %v3566_v18  ;;  %vm785_vm14 = vcmp.ge.f32.partialorder %v756_v55, 0.0 }
 0x77a   :  { %v1053_v16 = vsub.f32 1.0, %v1052_v15  ;;  %vm1073_vm4 = vmor %vm1071_vm3, %vm1072_vm2  ;;  %v789_v19 = vsel %vm785_vm14, %v756_v55, %v787_v56 }
 0x77b   :  { %v1068_v26 = vsub.f32 1.0, %v1067_v24  ;;  %v791_v20 = vmul.f32 1.442695, %v789_v19 }
 0x77c   :  { %v1054_v23 = vmul.f32 %v3564_v14, %v1053_v16 }
 0x77d   :  { %v1069_v36 = vmul.f32 %v3566_v18, %v1068_v26  ;;  %3567 = vpow2.f32 %v791_v20 }
 0x77e   :  { %v1055_v25 = vadd.f32 %v3564_v14, %v1054_v23 }
 0x77f   :  { %v1070_v44 = vadd.f32 %v3566_v18, %v1069_v36 }
 0x780   :  { %v1059_v30 = vsel %vm1058_vm0, %v3564_v14, %v1055_v25 }
 0x781   :  { %v4160_v40 = vsel %vm1061_vm1, %v1063_v37, %v1059_v30  ;;  %v1074_v47 = vsel %vm1073_vm4, %v3566_v18, %v1070_v44  ;;  %v4210_v44 = vld [vmem:[%s5335_s0 + $0xa8] ss:$0 sm:$0xff] }
 0x782   :  { %v4166_v17 = vsel %vm1076_vm5, %v1078_v49, %v1074_v47  ;;  %v1083_v60 = vmul.f32 %v4160_v40, %v4043_v39  ;;  %v496_v46 = vadd.f32 %v4210_v44, %v4164_v13  ;;  %v499_v49 = vadd.f32 %v4210_v44, %v4170_v54 }
 0x783   :  { %v3568_v21 = vpop.eup %3567  ;;  %v1084_v22 = vmul.f32 %v4166_v17, %v4049_v48  ;;  %v759_v48 = vpop.f32.mrf.mxu3 }
 0x784   :  { %v4173_v6 = vmul.f32 %v3568_v21, %v4034_v34  ;;  %v788_v1 = vmul.f32 0.2, %v759_v48  ;;  %vm786_vm15 = vcmp.ge.f32.partialorder %v759_v48, 0.0 }
 0x786   :  { %v813_v8 = vsel %vm373_vm7, %v4173_v6, 0.0  ;;  %v790_v2 = vsel %vm786_vm15, %v759_v48, %v788_v1 }
 0x787   :  { %v793_v9 = vmul.f32 1.442695, %v790_v2 }
 0x7d8   :  { %v1088_v38 = vpop.permute.xlu1 %1087 }
 0x7d9   :  { %v1093_v41 = vmul.f32 %v1088_v38, %v4160_v40 }
 0x7db   :  { %1097 = vrot.lane.b32.xlu0 %v1093_v41, %s3854_s11 }
 0x7e0   :  { %v1090_v50 = vpop.permute.xlu0 %1089 }
 0x7e1   :  { %v1094_v53 = vmul.f32 %v1090_v50, %v4166_v17 }
 0x7e3   :  { %1099 = vrot.lane.b32.xlu2 %v1094_v53, %s3854_s11 }
 0x80c   :  { %814 = vadd.xlane.f32.xlu2 %v813_v8 }
 0x83d   :  { %v1100_v57 = vpop.permute.xlu2 %1099 }
 0x83e   :  { %v4179_v58 = vadd.f32 %v1100_v57, %v1084_v22 }
 0x840   :  { %3569 = vtanh.f32 %v4179_v58 }
 0x846   :  { %v3570_v59 = vpop.eup %3569 }
 0x847   :  { %1111 = vrot.lane.b32.xlu1 %v3570_v59, %s3854_s11  ;;  %v3357_v59 = vmul.f32 -1.442695, %v496_v46 }
 0x84d   :  { %v1098_v61 = vpop.permute.xlu0 %1097 }
 0x84e   :  { %v4185_v62 = vadd.f32 %v1098_v61, %v1083_v60  ;;  %v3358_v60 = vmul.f32 -1.442695, %v499_v49 }
 0x850   :  { %3571 = vtanh.f32 %v4185_v62 }
 0x851   :  { %3573 = vpow2.f32 %v793_v9 }
 0x856   :  { %v3572_v63 = vpop.eup %3571 }
 0x857   :  { %1109 = vrot.lane.b32.xlu0 %v3572_v63, %s3854_s11  ;;  %v3574_v10 = vpop.eup %3573 }
 0x858   :  { %v4190_v14 = vmul.f32 %v3574_v10, %v4056_v51 }
 0x85a   :  { %5351 = vst [vmem:[#allocation4_spill] sm:$0xff] %v4190_v14  ;;  %v816_v39 = vsel %vm377_vm9, %v4190_v14, 0.0 }
 0x87f   :  { %v815_v15 = vpop.xlane.xlu2 %814 }
 0x880   :  { %3575 = vrcp.f32 %v815_v15  ;;  %v830_v24 = vand.u32 2147483648, %v815_v15  ;;  %v828_v26 = vand.u32 2147483647, %v815_v15  ;;  %vm824_vm1 = vweird.f32 %v815_v15 }
 0x881   :  { %817 = vadd.xlane.f32.xlu0 %v816_v39  ;;  %3577 = vtanh.f32 %v496_v46 }
 0x882   :  { %v831_v28 = vor.u32 1.1754944e-38, %v830_v24  ;;  %vm829_vm3 = vcmp.eq.f32.partialorder %v828_v26, 8.507059e+37  ;;  %3579 = vtanh.f32 %v499_v49 }
 0x886   :  { %v3576_v16 = vpop.eup %3575 }
 0x887   :  { %v820_v18 = vmul.f32 %v3576_v16, %v815_v15  ;;  %vm825_vm0 = vweird.f32 %v3576_v16 }
 0x888   :  { %vm826_vm2 = vmor %vm824_vm1, %vm825_vm0 }
 0x889   :  { %v821_v23 = vsub.f32 1.0, %v820_v18 }
 0x88b   :  { %v822_v25 = vmul.f32 %v3576_v16, %v821_v23 }
 0x88d   :  { %v823_v27 = vadd.f32 %v3576_v16, %v822_v25 }
 0x88f   :  { %v827_v30 = vsel %vm826_vm2, %v3576_v16, %v823_v27 }
 0x890   :  { %v832_v36 = vsel %vm829_vm3, %v831_v28, %v827_v30 }
 0x891   :  { %v4195_v37 = vmul.f32 %v832_v36, %v4173_v6 }
 0x893   :  { %3374 = vmatmul.msk.f32.vlgmr.msra.gmra.mxu2 %vm373_vm7, %v4195_v37 }
 0x894   :  { %1370 = vmatpush.msra.mxu2 %v4073_v3 }
 0x896   :  { %1371 = vmatpush.msra.mxu2 %v4078_v7 }
 0x898   :  { %1372 = vmatpush.msra.mxu2 %v4085_v11 }
 0x89a   :  { %1373 = vmatpush.msra.mxu2 %v4092_v12 }
 0x89c   :  { %1374 = vmatpush.msra.mxu2 %v4102_v32 }
 0x89e   :  { %1375 = vmatpush.msra.mxu2 %v4110_v33 }
 0x8b9   :  { %v1112_v45 = vpop.permute.xlu1 %1111 }
 0x8ba   :  { %v1116_v47 = vmul.f32 %v1112_v45, %v4166_v17 }
 0x8c9   :  { %v1110_v38 = vpop.permute.xlu0 %1109 }
 0x8ca   :  { %v1115_v41 = vmul.f32 %v1110_v38, %v4160_v40  ;;  %v3578_v40 = vpop.eup %3577 }
 0x8cb   :  { %v3580_v50 = vpop.eup %3579 }
 0x8cc   :  { %1119 = vrot.lane.b32.xlu1 %v1115_v41, %s3855_s20 }
 0x8d4   :  { %1121 = vrot.lane.b32.xlu1 %v1116_v47, %s3855_s20 }
 0x8dc   :  { %545 = vrot.lane.b32.xlu1 %v3578_v40, %s3854_s11 }
 0x8e4   :  { %547 = vrot.lane.b32.xlu1 %v3580_v50, %s3854_s11 }
 0x8f4   :  { %v818_v53 = vpop.xlane.xlu0 %817 }
 0x8f5   :  { %3581 = vrcp.f32 %v818_v53  ;;  %v845_v19 = vand.u32 2147483648, %v818_v53  ;;  %v843_v20 = vand.u32 2147483647, %v818_v53  ;;  %vm839_vm5 = vweird.f32 %v818_v53 }
 0x8f6   :  { %3583 = vpow2.f32 %v3357_v59 }
 0x8f7   :  { %v846_v54 = vor.u32 1.1754944e-38, %v845_v19  ;;  %vm844_vm15 = vcmp.eq.f32.partialorder %v843_v20, 8.507059e+37  ;;  %3585 = vpow2.f32 %v3358_v60 }
 0x8fb   :  { %v3582_v55 = vpop.eup %3581 }
 0x8fc   :  { %v835_v56 = vmul.f32 %v3582_v55, %v818_v53  ;;  %vm840_vm4 = vweird.f32 %v3582_v55  ;;  %v3584_v61 = vpop.eup %3583 }
 0x8fd   :  { %vm841_vm14 = vmor %vm839_vm5, %vm840_vm4  ;;  %v507_v63 = vadd.f32 1.0, %v3584_v61  ;;  %v3586_v48 = vpop.eup %3585 }
 0x8fe   :  { %v836_v13 = vsub.f32 1.0, %v835_v56  ;;  %v508_v1 = vadd.f32 1.0, %v3586_v48 }
 0x8ff   :  { %3587 = vrcp.f32 %v507_v63  ;;  %v520_v26 = vand.u32 2147483648, %v507_v63  ;;  %vm514_vm1 = vweird.f32 %v507_v63  ;;  %v518_v27 = vand.u32 2147483647, %v507_v63 }
 0x900   :  { %v837_v17 = vmul.f32 %v3582_v55, %v836_v13  ;;  %3589 = vrcp.f32 %v508_v1  ;;  %v535_v47 = vand.u32 2147483648, %v508_v1  ;;  %vm529_vm5 = vweird.f32 %v508_v1 }
 0x901   :  { %v521_v36 = vor.u32 1.1754944e-38, %v520_v26  ;;  %vm519_vm3 = vcmp.eq.f32.partialorder %v518_v27, 8.507059e+37  ;;  %v533_v49 = vand.u32 2147483647, %v508_v1 }
 0x902   :  { %v838_v21 = vadd.f32 %v3582_v55, %v837_v17  ;;  %v536_v50 = vor.u32 1.1754944e-38, %v535_v47 }
 0x904   :  { %v842_v8 = vsel %vm841_vm14, %v3582_v55, %v838_v21 }
 0x905   :  { %v847_v22 = vsel %vm844_vm15, %v846_v54, %v842_v8  ;;  %v3588_v2 = vpop.eup %3587  ;;  %vm534_vm15 = vcmp.eq.f32.partialorder %v533_v49, 8.507059e+37  ;;  %v4273_v49 = vld [vmem:[%s5335_s0 + $0x68] sm:$0xff] }
 0x906   :  { %v4221_v57 = vmul.f32 %v847_v22, %v4190_v14  ;;  %v510_v9 = vmul.f32 %v3588_v2, %v507_v63  ;;  %v3590_v39 = vpop.eup %3589  ;;  %vm515_vm0 = vweird.f32 %v3588_v2 }
 0x907   :  { %v525_v18 = vmul.f32 %v3590_v39, %v508_v1  ;;  %vm516_vm2 = vmor %vm514_vm1, %vm515_vm0  ;;  %vm530_vm4 = vweird.f32 %v3590_v39 }
 0x908   :  { %5352 = vst [vmem:[#allocation5_spill] sm:$0xff] %v4221_v57  ;;  %3375 = vmatmul.msk.f32.gmra.mxu2 %vm373_vm7, %v4221_v57  ;;  %v511_v15 = vsub.f32 1.0, %v510_v9  ;;  %vm531_vm14 = vmor %vm529_vm5, %vm530_vm4 }
 0x909   :  { %v526_v25 = vsub.f32 1.0, %v525_v18 }
 0x90a   :  { %v512_v16 = vmul.f32 %v3588_v2, %v511_v15 }
 0x90b   :  { %v527_v30 = vmul.f32 %v3590_v39, %v526_v25 }
 0x90c   :  { %v513_v24 = vadd.f32 %v3588_v2, %v512_v16 }
 0x90d   :  { %v528_v46 = vadd.f32 %v3590_v39, %v527_v30 }
 0x90e   :  { %v517_v28 = vsel %vm516_vm2, %v3588_v2, %v513_v24 }
 0x90f   :  { %v522_v38 = vsel %vm519_vm3, %v521_v36, %v517_v28  ;;  %v532_v40 = vsel %vm531_vm14, %v3590_v39, %v528_v46 }
 0x910   :  { %v537_v55 = vsel %vm534_vm15, %v536_v50, %v532_v40  ;;  %v541_v13 = vmul.f32 0.0, %v522_v38  ;;  %v4279_v40 = vld [vmem:[%s5335_s0 + $0x60] sm:$0xff]  ;;  %v4286_v50 = vld [vmem:[%s5335_s0 + $0x58] sm:$0xff] }
 0x911   :  { %v542_v60 = vmul.f32 0.0, %v537_v55 }
 0x916   :  { %v874_v20 = vpop.f32.mrf.mxu2 }
 0x917   :  { %v880_v39 = vmax.f32 %v874_v20, 0.0 }
 0x93e   :  { %v4225_v10 = vpop.permute.xlu1 %1119 }
 0x93f   :  { %3386 = vmatmul.msk.f32.vlgmr.msrb.gmra.mxu2 %vm131_vm10, %v4225_v10 }
 0x946   :  { %v4229_v23 = vpop.permute.xlu1 %1121 }
 0x947   :  { %3387 = vmatmul.msk.f32.gmra.mxu2 %vm131_vm10, %v4229_v23 }
 0x94e   :  { %v546_v41 = vpop.permute.xlu1 %545 }
 0x94f   :  { %v551_v45 = vmul.f32 %v546_v41, %v522_v38 }
 0x951   :  { %555 = vrot.lane.b32.xlu2 %v551_v45, %s3854_s11  ;;  %v4263_v45 = vld [vmem:[%s5335_s0 + $0x70] sm:$0xff] }
 0x956   :  { %v548_v53 = vpop.permute.xlu1 %547 }
 0x957   :  { %v552_v56 = vmul.f32 %v548_v53, %v537_v55  ;;  %v4292_v53 = vld [vmem:[%s5335_s0 + $0xc8] sm:$0xff] }
 0x959   :  { %557 = vrot.lane.b32.xlu1 %v552_v56, %s3854_s11  ;;  %v4306_v56 = vld [vmem:[%s5335_s0 + $0xb8] sm:$0xff] }
 0x98b   :  { %v877_v54 = vpop.f32.mrf.mxu2 }
 0x98c   :  { %v881_v24 = vmax.f32 %v877_v54, 0.0 }
 0x9ab   :  { %v556_v19 = vpop.permute.xlu2 %555 }
 0x9ac   :  { %v4235_v17 = vadd.f32 %v556_v19, %v541_v13  ;;  %v4312_v13 = vld [vmem:[%s5335_s0 + $0xb0] sm:$0xff] }
 0x9ae   :  { %3591 = vtanh.f32 %v4235_v17 }
 0x9b4   :  { %v3592_v21 = vpop.eup %3591 }
 0x9b5   :  { %567 = vrot.lane.b32.xlu0 %v3592_v21, %s3854_s11 }
 0x9c2   :  { %v1144_v8 = vpop.f32.mrf.mxu2 }
 0x9c3   :  { %v1145_v22 = vadd.f32 %v3986_v29, %v1144_v8 }
 0x9c5   :  { %1160 = vrot.lane.b32.xlu0 %v1145_v22, %s3857_s24 }
 0x9ca   :  { %v1147_v59 = vpop.f32.mrf.mxu2 }
 0x9cb   :  { %v1148_v61 = vadd.f32 %v3986_v29, %v1147_v59  ;;  %v558_v63 = vpop.permute.xlu1 %557 }
 0x9cc   :  { %v4242_v48 = vadd.f32 %v558_v63, %v542_v60 }
 0x9cd   :  { %3396 = vmatpush.msk.msra.mxu1 %vm417_vm11, %v1148_v61 }
 0x9ce   :  { %3593 = vtanh.f32 %v4242_v48 }
 0x9cf   :  { %1313 = vmatpush.msra.mxu1 %v1145_v22 }
 0x9d4   :  { %v3594_v1 = vpop.eup %3593 }
 0x9d5   :  { %569 = vrot.lane.b32.xlu1 %v3594_v1, %s3854_s11 }
 0xa27   :  { %v568_v2 = vpop.permute.xlu0 %567 }
 0xa28   :  { %v573_v9 = vmul.f32 %v568_v2, %v522_v38 }
 0xa2a   :  { %905 = vrot.lane.b32.xlu1 %v573_v9, %s3858_s16 }
 0xa32   :  { %1162 = vrot.lane.b32.xlu1 %v1148_v61, %s3857_s24 }
 0xa37   :  { %v1161_v30 = vpop.permute.xlu0 %1160 }
 0xa38   :  { %v1166_v36 = vsel %vm275_vm12, %v1161_v30, 1.0 }
 0xa3a   :  { %1154 = vrot.lane.b32.xlu1 %v1148_v61, %s3856_s23 }
 0xa47   :  { %v570_v29 = vpop.permute.xlu1 %569 }
 0xa48   :  { %v574_v15 = vmul.f32 %v570_v29, %v537_v55  ;;  %v4300_v55 = vld [vmem:[%s5335_s0 + $0xc0] sm:$0xff] }
 0xa4a   :  { %907 = vrot.lane.b32.xlu2 %v574_v15, %s3858_s16 }
 0xa52   :  { %1152 = vrot.lane.b32.xlu2 %v1145_v22, %s3856_s23 }
 0xa9c   :  { %v906_v16 = vpop.permute.xlu1 %905 }
 0xa9d   :  { %v911_v18 = vsel %vm468_vm6, %v880_v39, %v906_v16 }
 0xa9e   :  { %3378 = vmatmul.msk.f32.vlgmr.msrb.gmra.mxu3 %vm471_vm8, %v911_v18 }
 0xaa4   :  { %v908_v25 = vpop.permute.xlu2 %907  ;;  %v1163_v26 = vpop.permute.xlu1 %1162 }
 0xaa5   :  { %v1167_v27 = vsel %vm275_vm12, %v1163_v26, 1.0  ;;  %v912_v28 = vsel %vm468_vm6, %v881_v24, %v908_v25 }
 0xaa6   :  { %3379 = vmatmul.msk.f32.gmra.mxu3 %vm471_vm8, %v912_v28 }
 0xaa7   :  { %3388 = vmatpush.xpose.msk.msra.mxu3 %vm286_vm13, %v1167_v27 }
 0xaab   :  { %3389 = vmatpush.xpose.msk.msra.mxu3 %vm286_vm13, %v1166_v36 }
 0xaac   :  { %v1153_v38 = vpop.permute.xlu2 %1152  ;;  %v1155_v41 = vpop.permute.xlu1 %1154 }
 0xaad   :  { %v1158_v46 = vsel %vm275_vm12, 1.0, %v1153_v38  ;;  %v1159_v47 = vsel %vm275_vm12, 1.0, %v1155_v41 }
 0xaae   :  { %3390 = vmatmul.msk.f32.vlgmr.msra.gmra.mxu3 %vm286_vm13, %v1158_v46  ;;  %3392 = vmatpush.xpose.msk.msrb.mxu0 %vm286_vm13, %v1159_v47 }
 0xaaf   :  { %1471 = vmatpush.msrb.mxu3 %v4263_v45 }
 0xab1   :  { %1472 = vmatpush.msrb.mxu3 %v4273_v49 }
 0xab2   :  { %3393 = vmatpush.xpose.msk.msrb.mxu0 %vm286_vm13, %v1158_v46 }
 0xab3   :  { %1473 = vmatpush.msrb.mxu3 %v4279_v40 }
 0xab5   :  { %1474 = vmatpush.msrb.mxu3 %v4286_v50  ;;  %3394 = vmatmul.msk.f32.vlgmr.msrb.gmra.mxu0 %vm286_vm13, %v1166_v36 }
 0xab6   :  { %1580 = vmatpush.msra.mxu0 %v4292_v53  ;;  %3391 = vmatmul.msk.f32.gmra.mxu3 %vm286_vm13, %v1159_v47 }
 0xab8   :  { %1581 = vmatpush.msra.mxu0 %v4300_v55 }
 0xaba   :  { %1582 = vmatpush.msra.mxu0 %v4306_v56 }
 0xabc   :  { %1583 = vmatpush.msra.mxu0 %v4312_v13 }
 0xabd   :  { %3395 = vmatmul.msk.f32.gmra.mxu0 %vm286_vm13, %v1167_v27 }
 0xabe   :  { %1811 = vmatpush.msrb.mxu0 %v4073_v3  ;;  %3405 = vmatmul.msk.f32.vlgmr.msrb.gmra.mxu3 %vm131_vm10, %v4225_v10 }
 0xac0   :  { %1812 = vmatpush.msrb.mxu0 %v4078_v7  ;;  %v1457_v7 = vld [vmem:[#allocation2 + $0x1e] sm:$0xff] }
 0xac2   :  { %1813 = vmatpush.msrb.mxu0 %v4085_v11 }
 0xac4   :  { %1814 = vmatpush.msrb.mxu0 %v4092_v12  ;;  %v1458_v12 = vld [vmem:[#allocation2 + $0x26] sm:$0x3] }
 0xac6   :  { %1815 = vmatpush.msrb.mxu0 %v4102_v32  ;;  %3406 = vmatmul.msk.f32.gmra.mxu3 %vm131_vm10, %v4229_v23 }
 0xac8   :  { %1816 = vmatpush.msrb.mxu0 %v4110_v33 }
 0xb21   :  { %v4326_v19 = vpop.f32.mrf.mxu3 }
 0xb29   :  { %v4328_v3 = vpop.f32.mrf.mxu3 }
 0xb31   :  { %v4330_v20 = vpop.f32.mrf.mxu3 }
 0xb39   :  { %v4332_v10 = vpop.f32.mrf.mxu3 }
 0xb41   :  { %v1476_v21 = vpop.f32.mrf.mxu3 }
 0xb42   :  { %v1482_v11 = vadd.f32 %v1476_v21, %v1457_v7 }
 0xb44   :  { %3595 = vtanh.f32 %v1482_v11  ;;  %v3407_v60 = vmul.f32 -1.442695, %v1482_v11 }
 0xb49   :  { %v1479_v54 = vpop.f32.mrf.mxu3 }
 0xb4a   :  { %v3596_v32 = vpop.eup %3595  ;;  %v1483_v8 = vadd.f32 %v1479_v54, %v1458_v12 }
 0xb4b   :  { %1528 = vrot.lane.b32.xlu0 %v3596_v32, %s3854_s11 }
 0xb4c   :  { %3597 = vtanh.f32 %v1483_v8  ;;  %v3408_v23 = vmul.f32 -1.442695, %v1483_v8 }
 0xb4e   :  { %3599 = vpow2.f32 %v3408_v23 }
 0xb52   :  { %v3598_v33 = vpop.eup %3597 }
 0xb53   :  { %1530 = vrot.lane.b32.xlu2 %v3598_v33, %s3854_s11 }
 0xb54   :  { %v3600_v22 = vpop.eup %3599 }
 0xb55   :  { %v1491_v59 = vadd.f32 1.0, %v3600_v22 }
 0xb57   :  { %3601 = vrcp.f32 %v1491_v59  ;;  %v1518_v16 = vand.u32 2147483648, %v1491_v59  ;;  %vm1512_vm1 = vweird.f32 %v1491_v59  ;;  %v1516_v18 = vand.u32 2147483647, %v1491_v59 }
 0xb58   :  { %3603 = vpow2.f32 %v3407_v60 }
 0xb59   :  { %v1519_v26 = vor.u32 1.1754944e-38, %v1518_v16  ;;  %vm1517_vm3 = vcmp.eq.f32.partialorder %v1516_v18, 8.507059e+37  ;;  %v1229_v18 = vmul.f32 0.2, %v4332_v10 }
 0xb5d   :  { %v3602_v61 = vpop.eup %3601 }
 0xb5e   :  { %v3604_v63 = vpop.eup %3603  ;;  %v1508_v1 = vmul.f32 %v3602_v61, %v1491_v59  ;;  %vm1513_vm0 = vweird.f32 %v3602_v61 }
 0xb5f   :  { %v1490_v2 = vadd.f32 1.0, %v3604_v63  ;;  %vm1514_vm2 = vmor %vm1512_vm1, %vm1513_vm0  ;;  %vm1226_vm0 = vcmp.ge.f32.partialorder %v4330_v20, 0.0  ;;  %vm1227_vm1 = vcmp.ge.f32.partialorder %v4332_v10, 0.0 }
 0xb60   :  { %v1509_v9 = vsub.f32 1.0, %v1508_v1 }
 0xb61   :  { %3605 = vrcp.f32 %v1490_v2  ;;  %v1503_v46 = vand.u32 2147483648, %v1490_v2  ;;  %vm1497_vm5 = vweird.f32 %v1490_v2  ;;  %v1501_v47 = vand.u32 2147483647, %v1490_v2 }
 0xb62   :  { %v1510_v29 = vmul.f32 %v3602_v61, %v1509_v9 }
 0xb63   :  { %v1504_v21 = vor.u32 1.1754944e-38, %v1503_v46  ;;  %vm1502_vm15 = vcmp.eq.f32.partialorder %v1501_v47, 8.507059e+37 }
 0xb64   :  { %v1511_v15 = vadd.f32 %v3602_v61, %v1510_v29  ;;  %v4358_v29 = vadd.f32 %v4210_v44, %v4328_v3  ;;  %v1231_v3 = vsel %vm1227_vm1, %v4332_v10, %v1229_v18 }
 0xb66   :  { %v1515_v24 = vsel %vm1514_vm2, %v3602_v61, %v1511_v15 }
 0xb67   :  { %v3606_v39 = vpop.eup %3605  ;;  %v1520_v28 = vsel %vm1517_vm3, %v1519_v26, %v1515_v24  ;;  %v1234_v24 = vmul.f32 1.442695, %v1231_v3 }
 0xb68   :  { %v1493_v25 = vmul.f32 %v3606_v39, %v1490_v2  ;;  %vm1498_vm4 = vweird.f32 %v3606_v39  ;;  %v1525_v32 = vmul.f32 %v1520_v28, %v4179_v58  ;;  %v1228_v58 = vmul.f32 0.2, %v4330_v20 }
 0xb69   :  { %vm1499_vm14 = vmor %vm1497_vm5, %vm1498_vm4 }
 0xb6a   :  { %v1494_v36 = vsub.f32 1.0, %v1493_v25  ;;  %v1230_v63 = vsel %vm1226_vm0, %v4330_v20, %v1228_v58 }
 0xb6b   :  { %v1232_v1 = vmul.f32 1.442695, %v1230_v63 }
 0xb6c   :  { %v1495_v38 = vmul.f32 %v3606_v39, %v1494_v36 }
 0xb6e   :  { %v1496_v41 = vadd.f32 %v3606_v39, %v1495_v38 }
 0xb70   :  { %v1500_v7 = vsel %vm1499_vm14, %v3606_v39, %v1496_v41 }
 0xb71   :  { %v1505_v12 = vsel %vm1502_vm15, %v1504_v21, %v1500_v7 }
 0xb72   :  { %v1524_v22 = vmul.f32 %v1505_v12, %v4185_v62 }
 0xbad   :  { %v1531_v27 = vpop.permute.xlu2 %1530 }
 0xbae   :  { %v1535_v30 = vmul.f32 %v1531_v27, %v1520_v28 }
 0xbb0   :  { %1540 = vrot.lane.b32.xlu0 %v1535_v30, %s3854_s11 }
 0xbbd   :  { %v1529_v11 = vpop.permute.xlu0 %1528 }
 0xbbe   :  { %v1534_v54 = vmul.f32 %v1529_v11, %v1505_v12 }
 0xbc0   :  { %1538 = vrot.lane.b32.xlu1 %v1534_v54, %s3854_s11 }
 0xc22   :  { %v1541_v8 = vpop.permute.xlu0 %1540 }
 0xc23   :  { %v4339_v33 = vadd.f32 %v1541_v8, %v1525_v32 }
 0xc25   :  { %3607 = vtanh.f32 %v4339_v33 }
 0xc2b   :  { %v3608_v23 = vpop.eup %3607 }
 0xc2c   :  { %1552 = vrot.lane.b32.xlu1 %v3608_v23, %s3854_s11 }
 0xc32   :  { %v1539_v59 = vpop.permute.xlu1 %1538 }
 0xc33   :  { %v4344_v60 = vadd.f32 %v1539_v59, %v1524_v22 }
 0xc35   :  { %3609 = vtanh.f32 %v4344_v60 }
 0xc36   :  { %3611 = vpow2.f32 %v1232_v1 }
 0xc37   :  { %3613 = vtanh.f32 %v4358_v29 }
 0xc38   :  { %3615 = vpow2.f32 %v1234_v24 }
 0xc3b   :  { %v3610_v61 = vpop.eup %3609 }
 0xc3c   :  { %1550 = vrot.lane.b32.xlu2 %v3610_v61, %s3854_s11  ;;  %v3612_v2 = vpop.eup %3611 }
 0xc3d   :  { %v4352_v9 = vmul.f32 %v3612_v2, %v4034_v34  ;;  %v3614_v15 = vpop.eup %3613 }
 0xc3e   :  { %v3616_v25 = vpop.eup %3615 }
 0xc3f   :  { %v1254_v62 = vsel %vm373_vm7, %v4352_v9, 0.0  ;;  %v4368_v26 = vmul.f32 %v3616_v25, %v4056_v51  ;;  %v937_v25 = vadd.f32 %v4210_v44, %v4326_v19 }
 0xc41   :  { %v1257_v27 = vsel %vm377_vm9, %v4368_v26, 0.0 }
 0xc56   :  { %1255 = vadd.xlane.f32.xlu1 %v1254_v62 }
 0xc6f   :  { %988 = vrot.lane.b32.xlu1 %v3614_v15, %s3854_s11 }
 0xc96   :  { %v1551_v20 = vpop.permute.xlu2 %1550 }
 0xc97   :  { %v1556_v39 = vmul.f32 %v1551_v20, %v1505_v12  ;;  %v4390_v20 = vpop.f32.mrf.mxu0 }
 0xc99   :  { %1560 = vrot.lane.b32.xlu0 %v1556_v39, %s3855_s20 }
 0xc9e   :  { %v1553_v16 = vpop.permute.xlu1 %1552 }
 0xc9f   :  { %v1557_v34 = vmul.f32 %v1553_v16, %v1520_v28  ;;  %v4392_v39 = vpop.f32.mrf.mxu0 }
 0xca1   :  { %1562 = vrot.lane.b32.xlu2 %v1557_v34, %s3855_s20  ;;  %v4397_v34 = vld [vmem:[%s5335_s0 + $0xd0] ss:$0 sm:$0xff] }
 0xcc3   :  { %1258 = vadd.xlane.f32.xlu0 %v1257_v27 }
 0xcc9   :  { %v1256_v30 = vpop.xlane.xlu1 %1255 }
 0xcca   :  { %3617 = vrcp.f32 %v1256_v30  ;;  %v1271_v41 = vand.u32 2147483648, %v1256_v30  ;;  %v1269_v47 = vand.u32 2147483647, %v1256_v30  ;;  %vm1265_vm3 = vweird.f32 %v1256_v30 }
 0xccc   :  { %v1272_v7 = vor.u32 1.1754944e-38, %v1271_v41  ;;  %vm1270_vm5 = vcmp.eq.f32.partialorder %v1269_v47, 8.507059e+37 }
 0xcd0   :  { %v3618_v28 = vpop.eup %3617 }
 0xcd1   :  { %v1261_v36 = vmul.f32 %v3618_v28, %v1256_v30  ;;  %vm1266_vm2 = vweird.f32 %v3618_v28  ;;  %v3380_v30 = vmul.f32 -1.442695, %v937_v25 }
 0xcd2   :  { %vm1267_vm4 = vmor %vm1265_vm3, %vm1266_vm2 }
 0xcd3   :  { %v1262_v38 = vsub.f32 1.0, %v1261_v36 }
 0xcd5   :  { %v1263_v46 = vmul.f32 %v3618_v28, %v1262_v38 }
 0xcd7   :  { %v1264_v10 = vadd.f32 %v3618_v28, %v1263_v46 }
 0xcd9   :  { %v1268_v21 = vsel %vm1267_vm4, %v3618_v28, %v1264_v10 }
 0xcda   :  { %v1273_v51 = vsel %vm1270_vm5, %v1272_v7, %v1268_v21 }
 0xcdb   :  { %v4373_v11 = vmul.f32 %v1273_v51, %v4352_v9 }
 0xcdd   :  { %3397 = vmatmul.msk.f32.vlgmr.msra.gmra.mxu1 %vm373_vm7, %v4373_v11 }
 0xcfb   :  { %v4381_v54 = vpop.permute.xlu2 %1562 }
 0xd0b   :  { %v4377_v12 = vpop.permute.xlu0 %1560 }
 0xd0c   :  { %3409 = vmatmul.msk.f32.vlgmr.msra.gmra.mxu0 %vm131_vm10, %v4377_v12 }
 0xd14   :  { %3410 = vmatmul.msk.f32.gmra.mxu0 %vm131_vm10, %v4381_v54 }
 0xd36   :  { %v1259_v32 = vpop.xlane.xlu0 %1258 }
 0xd37   :  { %3619 = vrcp.f32 %v1259_v32  ;;  %v1286_v59 = vand.u32 2147483648, %v1259_v32  ;;  %v1284_v58 = vand.u32 2147483647, %v1259_v32  ;;  %vm1280_vm15 = vweird.f32 %v1259_v32 }
 0xd38   :  { %3621 = vtanh.f32 %v937_v25 }
 0xd39   :  { %v1287_v1 = vor.u32 1.1754944e-38, %v1286_v59  ;;  %vm1285_vm1 = vcmp.eq.f32.partialorder %v1284_v58, 8.507059e+37  ;;  %3623 = vpow2.f32 %v3380_v30 }
 0xd3d   :  { %v3620_v8 = vpop.eup %3619 }
 0xd3e   :  { %v1276_v23 = vmul.f32 %v3620_v8, %v1259_v32  ;;  %vm1281_vm14 = vweird.f32 %v3620_v8  ;;  %v3622_v27 = vpop.eup %3621 }
 0xd3f   :  { %vm1282_vm0 = vmor %vm1280_vm15, %vm1281_vm14  ;;  %v3624_v28 = vpop.eup %3623 }
 0xd40   :  { %v1277_v22 = vsub.f32 1.0, %v1276_v23  ;;  %v948_v36 = vadd.f32 1.0, %v3624_v28 }
 0xd42   :  { %v1278_v61 = vmul.f32 %v3620_v8, %v1277_v22  ;;  %3625 = vrcp.f32 %v948_v36  ;;  %v961_v22 = vand.u32 2147483648, %v948_v36  ;;  %vm955_vm3 = vweird.f32 %v948_v36 }
 0xd43   :  { %v959_v59 = vand.u32 2147483647, %v948_v36 }
 0xd44   :  { %v1279_v63 = vadd.f32 %v3620_v8, %v1278_v61  ;;  %v962_v58 = vor.u32 1.1754944e-38, %v961_v22 }
 0xd45   :  { %vm960_vm5 = vcmp.eq.f32.partialorder %v959_v59, 8.507059e+37  ;;  %v989_v59 = vpop.permute.xlu1 %988 }
 0xd46   :  { %v1283_v2 = vsel %vm1282_vm0, %v3620_v8, %v1279_v63 }
 0xd47   :  { %v1288_v62 = vsel %vm1285_vm1, %v1287_v1, %v1283_v2 }
 0xd48   :  { %v4386_v15 = vmul.f32 %v1288_v62, %v4368_v26  ;;  %v3626_v47 = vpop.eup %3625 }
 0xd49   :  { %v951_v19 = vmul.f32 %v3626_v47, %v948_v36  ;;  %vm956_vm2 = vweird.f32 %v3626_v47 }
 0xd4a   :  { %3398 = vmatmul.msk.f32.gmra.mxu1 %vm373_vm7, %v4386_v15  ;;  %vm957_vm4 = vmor %vm955_vm3, %vm956_vm2 }
 0xd4b   :  { %v952_v21 = vsub.f32 1.0, %v951_v19 }
 0xd4d   :  { %v953_v51 = vmul.f32 %v3626_v47, %v952_v21 }
 0xd4f   :  { %v954_v23 = vadd.f32 %v3626_v47, %v953_v51 }
 0xd51   :  { %v958_v61 = vsel %vm957_vm4, %v3626_v47, %v954_v23 }
 0xd52   :  { %v4429_v63 = vsel %vm960_vm5, %v962_v58, %v958_v61 }
 0xd53   :  { %v982_v61 = vmul.f32 %v4429_v63, %v4235_v17 }
 0xd5a   :  { %v4437_v62 = vpop.f32.mrf.mxu1 }
 0xd89   :  { %v1585_v16 = vpop.f32.mrf.mxu0 }
 0xd8a   :  { %v1586_v18 = vadd.f32 %v4397_v34, %v1585_v16 }
 0xd8c   :  { %1601 = vrot.lane.b32.xlu2 %v1586_v18, %s3857_s24 }
 0xd91   :  { %v1588_v3 = vpop.f32.mrf.mxu0 }
 0xd92   :  { %v1589_v24 = vadd.f32 %v4397_v34, %v1588_v3 }
 0xd94   :  { %1603 = vrot.lane.b32.xlu2 %v1589_v24, %s3857_s24  ;;  %3419 = vmatpush.msk.msra.mxu3 %vm417_vm11, %v1589_v24 }
 0xd96   :  { %1754 = vmatpush.msra.mxu3 %v1586_v18 }
 0xd9c   :  { %1593 = vrot.lane.b32.xlu2 %v1586_v18, %s3856_s23  ;;  %v3381_v18 = vmul.f32 -1.442695, %v4358_v29 }
 0xd9e   :  { %3627 = vpow2.f32 %v3381_v18 }
 0xda4   :  { %1595 = vrot.lane.b32.xlu2 %v1589_v24, %s3856_s23  ;;  %v3628_v24 = vpop.eup %3627 }
 0xda5   :  { %v949_v25 = vadd.f32 1.0, %v3628_v24 }
 0xda7   :  { %3629 = vrcp.f32 %v949_v25  ;;  %v976_v51 = vand.u32 2147483648, %v949_v25  ;;  %vm970_vm15 = vweird.f32 %v949_v25 }
 0xda9   :  { %v977_v22 = vor.u32 1.1754944e-38, %v976_v51 }
 0xdac   :  { %986 = vrot.lane.b32.xlu2 %v3622_v27, %s3854_s11 }
 0xdad   :  { %v3630_v28 = vpop.eup %3629 }
 0xdae   :  { %vm971_vm14 = vweird.f32 %v3630_v28 }
 0xdaf   :  { %vm972_vm0 = vmor %vm970_vm15, %vm971_vm14 }
 0xdc7   :  { %v4439_v16 = vpop.f32.mrf.mxu1 }
 0xde6   :  { %v1602_v38 = vpop.permute.xlu2 %1601 }
 0xde7   :  { %v4415_v44 = vsel %vm275_vm12, %v1602_v38, 1.0 }
 0xdee   :  { %v1604_v41 = vpop.permute.xlu2 %1603 }
 0xdef   :  { %v4410_v46 = vsel %vm275_vm12, %v1604_v41, 1.0  ;;  %v1899_v41 = vld [vmem:[#allocation2 + $0x30] sm:$0x3] }
 0xdf0   :  { %3411 = vmatpush.xpose.msk.msrb.mxu1 %vm286_vm13, %v4410_v46 }
 0xdf4   :  { %3412 = vmatpush.xpose.msk.msrb.mxu1 %vm286_vm13, %v4415_v44 }
 0xdf6   :  { %v1594_v10 = vpop.permute.xlu2 %1593 }
 0xdf7   :  { %v1599_v7 = vsel %vm275_vm12, 1.0, %v1594_v10 }
 0xdf8   :  { %1912 = vmatpush.msra.mxu1 %v4263_v45 }
 0xdf9   :  { %3413 = vmatmul.msk.f32.vlgmr.msrb.gmra.mxu1 %vm286_vm13, %v1599_v7 }
 0xdfa   :  { %1913 = vmatpush.msra.mxu1 %v4273_v49 }
 0xdfc   :  { %1914 = vmatpush.msra.mxu1 %v4279_v40 }
 0xdfe   :  { %1915 = vmatpush.msra.mxu1 %v4286_v50  ;;  %v1596_v32 = vpop.permute.xlu2 %1595 }
 0xdff   :  { %v1600_v8 = vsel %vm275_vm12, 1.0, %v1596_v32  ;;  %v974_v32 = vand.u32 2147483647, %v949_v25 }
 0xe00   :  { %3415 = vmatpush.xpose.msk.msrb.mxu2 %vm286_vm13, %v1600_v8 }
 0xe01   :  { %3414 = vmatmul.msk.f32.gmra.mxu1 %vm286_vm13, %v1600_v8  ;;  %vm975_vm1 = vcmp.eq.f32.partialorder %v974_v32, 8.507059e+37 }
 0xe04   :  { %3416 = vmatpush.xpose.msk.msrb.mxu2 %vm286_vm13, %v1599_v7 }
 0xe06   :  { %v987_v1 = vpop.permute.xlu2 %986 }
 0xe07   :  { %v992_v2 = vmul.f32 %v987_v1, %v4429_v63 }
 0xe09   :  { %3428 = vmatmul.msk.f32.vlgmr.msra.gmra.mxu1 %vm131_vm10, %v4377_v12  ;;  %996 = vrot.lane.b32.xlu2 %v992_v2, %s3854_s11  ;;  %v1898_v12 = vld [vmem:[#allocation2 + $0x28] sm:$0xff] }
 0xe11   :  { %3429 = vmatmul.msk.f32.gmra.mxu1 %vm131_vm10, %v4381_v54  ;;  %v966_v54 = vmul.f32 %v3630_v28, %v949_v25 }
 0xe13   :  { %v967_v38 = vsub.f32 1.0, %v966_v54 }
 0xe15   :  { %v968_v29 = vmul.f32 %v3630_v28, %v967_v38 }
 0xe17   :  { %v969_v7 = vadd.f32 %v3630_v28, %v968_v29 }
 0xe19   :  { %v973_v8 = vsel %vm972_vm0, %v3630_v28, %v969_v7 }
 0xe1a   :  { %v4450_v58 = vsel %vm975_vm1, %v977_v22, %v973_v8 }
 0xe1b   :  { %v993_v2 = vmul.f32 %v989_v59, %v4450_v58 }
 0xe63   :  { %v997_v23 = vpop.permute.xlu2 %996 }
 0xe64   :  { %v4452_v1 = vadd.f32 %v997_v23, %v982_v61 }
 0xe76   :  { %v4442_v3 = vpop.f32.mrf.mxu1 }
 0xe7e   :  { %v4444_v27 = vpop.f32.mrf.mxu1 }
 0xe86   :  { %v1917_v30 = vpop.f32.mrf.mxu1 }
 0xe87   :  { %v1923_v36 = vadd.f32 %v1917_v30, %v1898_v12 }
 0xe89   :  { %3631 = vtanh.f32 %v1923_v36  ;;  %v3430_v30 = vmul.f32 -1.442695, %v1923_v36 }
 0xe8e   :  { %v1920_v47 = vpop.f32.mrf.mxu1 }
 0xe8f   :  { %v3632_v19 = vpop.eup %3631  ;;  %v1924_v10 = vadd.f32 %v1920_v47, %v1899_v41 }
 0xe90   :  { %1969 = vrot.lane.b32.xlu0 %v3632_v19, %s3854_s11 }
 0xe91   :  { %3633 = vtanh.f32 %v1924_v10  ;;  %v3431_v24 = vmul.f32 -1.442695, %v1924_v10 }
 0xe92   :  { %3635 = vtanh.f32 %v4452_v1 }
 0xe93   :  { %3637 = vpow2.f32 %v3431_v24 }
 0xe97   :  { %v3634_v21 = vpop.eup %3633 }
 0xe98   :  { %1971 = vrot.lane.b32.xlu2 %v3634_v21, %s3854_s11  ;;  %v3636_v18 = vpop.eup %3635 }
 0xe99   :  { %v3638_v25 = vpop.eup %3637 }
 0xe9a   :  { %v1932_v12 = vadd.f32 1.0, %v3638_v25 }
 0xe9c   :  { %3639 = vrcp.f32 %v1932_v12  ;;  %v1959_v7 = vand.u32 2147483648, %v1932_v12  ;;  %vm1953_vm3 = vweird.f32 %v1932_v12  ;;  %v1957_v21 = vand.u32 2147483647, %v1932_v12 }
 0xe9d   :  { %3641 = vpow2.f32 %v3430_v30 }
 0xe9e   :  { %v1960_v32 = vor.u32 1.1754944e-38, %v1959_v7  ;;  %vm1958_vm5 = vcmp.eq.f32.partialorder %v1957_v21, 8.507059e+37 }
 0xea0   :  { %998 = vrot.lane.b32.xlu2 %v993_v2, %s3854_s11 }
 0xea2   :  { %v3640_v17 = vpop.eup %3639 }
 0xea3   :  { %v3642_v28 = vpop.eup %3641  ;;  %v1949_v54 = vmul.f32 %v3640_v17, %v1932_v12  ;;  %vm1954_vm2 = vweird.f32 %v3640_v17  ;;  %v983_v12 = vmul.f32 %v4450_v58, %v4242_v48  ;;  %v1321_v48 = vmax.f32 %v4437_v62, 0.0 }
 0xea4   :  { %v1931_v38 = vadd.f32 1.0, %v3642_v28  ;;  %vm1955_vm4 = vmor %vm1953_vm3, %vm1954_vm2  ;;  %vm1667_vm2 = vcmp.ge.f32.partialorder %v4442_v3, 0.0  ;;  %vm1668_vm3 = vcmp.ge.f32.partialorder %v4444_v27, 0.0 }
 0xea5   :  { %v1950_v41 = vsub.f32 1.0, %v1949_v54 }
 0xea6   :  { %3643 = vrcp.f32 %v1931_v38  ;;  %vm1938_vm15 = vweird.f32 %v1931_v38  ;;  %v1942_v24 = vand.u32 2147483647, %v1931_v38 }
 0xea7   :  { %v1951_v47 = vmul.f32 %v3640_v17, %v1950_v41 }
 0xea8   :  { %1008 = vrot.lane.b32.xlu2 %v3636_v18, %s3854_s11  ;;  %v1944_v18 = vand.u32 2147483648, %v1931_v38  ;;  %vm1943_vm1 = vcmp.eq.f32.partialorder %v1942_v24, 8.507059e+37  ;;  %v1322_v24 = vmax.f32 %v4439_v16, 0.0  ;;  %v4518_v16 = vld [vmem:[%s5335_s0 + $0x98] sm:$0xff] }
 0xea9   :  { %v1952_v19 = vadd.f32 %v3640_v17, %v1951_v47 }
 0xeaa   :  { %v1945_v30 = vor.u32 1.1754944e-38, %v1944_v18 }
 0xeab   :  { %v1956_v10 = vsel %vm1955_vm4, %v3640_v17, %v1952_v19 }
 0xeac   :  { %v3644_v29 = vpop.eup %3643  ;;  %v1961_v8 = vsel %vm1958_vm5, %v1960_v32, %v1956_v10 }
 0xead   :  { %v1934_v51 = vmul.f32 %v3644_v29, %v1931_v38  ;;  %vm1939_vm14 = vweird.f32 %v3644_v29 }
 0xeae   :  { %vm1940_vm0 = vmor %vm1938_vm15, %vm1939_vm14 }
 0xeaf   :  { %v1935_v22 = vsub.f32 1.0, %v1934_v51 }
 0xeb1   :  { %v1936_v59 = vmul.f32 %v3644_v29, %v1935_v22  ;;  %v4493_v22 = vld [vmem:[%s5335_s0 + $0x1a8] sm:$0xff] }
 0xeb3   :  { %v1937_v2 = vadd.f32 %v3644_v29, %v1936_v59 }
 0xeb5   :  { %v1941_v25 = vsel %vm1940_vm0, %v3644_v29, %v1937_v2 }
 0xeb6   :  { %v1946_v54 = vsel %vm1943_vm1, %v1945_v30, %v1941_v25  ;;  %v1670_v30 = vmul.f32 0.2, %v4444_v27 }
 0xeb7   :  { %v1965_v51 = vmul.f32 %v1946_v54, %v4344_v60 }
 0xef2   :  { %v1972_v36 = vpop.permute.xlu2 %1971 }
 0xef3   :  { %v1976_v23 = vmul.f32 %v1972_v36, %v1961_v8 }
 0xef5   :  { %1981 = vrot.lane.b32.xlu1 %v1976_v23, %s3854_s11 }
 0xefa   :  { %v999_v61 = vpop.permute.xlu2 %998 }
 0xefb   :  { %v4461_v17 = vadd.f32 %v999_v61, %v983_v12 }
 0xefd   :  { %3645 = vtanh.f32 %v4461_v17 }
 0xf02   :  { %v1970_v28 = vpop.permute.xlu0 %1969  ;;  %v1009_v41 = vpop.permute.xlu2 %1008 }
 0xf03   :  { %v1975_v47 = vmul.f32 %v1970_v28, %v1946_v54  ;;  %v1014_v19 = vmul.f32 %v1009_v41, %v4429_v63  ;;  %v3646_v38 = vpop.eup %3645  ;;  %v1966_v63 = vmul.f32 %v1961_v8, %v4339_v33  ;;  %v4525_v28 = vld [vmem:[%s5335_s0 + $0x90] sm:$0xff] }
 0xf05   :  { %1979 = vrot.lane.b32.xlu0 %v1975_v47, %s3854_s11  ;;  %1346 = vrot.lane.b32.xlu2 %v1014_v19, %s3858_s16  ;;  %v4545_v47 = vld [vmem:[%s5335_s0 + $0x78] sm:$0xff] }
 0xf0d   :  { %1010 = vrot.lane.b32.xlu0 %v3646_v38, %s3854_s11 }
 0xf5f   :  { %v1347_v29 = vpop.permute.xlu2 %1346 }
 0xf60   :  { %v1352_v7 = vsel %vm468_vm6, %v1321_v48, %v1347_v29 }
 0xf61   :  { %3401 = vmatmul.msk.f32.vlgmr.msra.gmra.mxu2 %vm471_vm8, %v1352_v7 }
 0xf62   :  { %2021 = vmatpush.msra.mxu2 %v4292_v53 }
 0xf64   :  { %2022 = vmatpush.msra.mxu2 %v4300_v55 }
 0xf66   :  { %2023 = vmatpush.msra.mxu2 %v4306_v56 }
 0xf67   :  { %v1982_v21 = vpop.permute.xlu1 %1981 }
 0xf68   :  { %v4475_v10 = vadd.f32 %v1982_v21, %v1966_v63  ;;  %2024 = vmatpush.msra.mxu2 %v4312_v13  ;;  %v1669_v13 = vmul.f32 0.2, %v4442_v3 }
 0xf6a   :  { %3647 = vtanh.f32 %v4475_v10  ;;  %v1671_v36 = vsel %vm1667_vm2, %v4442_v3, %v1669_v13 }
 0xf6b   :  { %v1673_v60 = vmul.f32 1.442695, %v1671_v36 }
 0xf70   :  { %v3648_v62 = vpop.eup %3647 }
 0xf71   :  { %1993 = vrot.lane.b32.xlu0 %v3648_v62, %s3854_s11 }
 0xf77   :  { %v1980_v32 = vpop.permute.xlu0 %1979 }
 0xf78   :  { %v4481_v53 = vadd.f32 %v1980_v32, %v1965_v51 }
 0xf7a   :  { %3649 = vtanh.f32 %v4481_v53 }
 0xf7b   :  { %3651 = vpow2.f32 %v1673_v60 }
 0xf7f   :  { %v1011_v56 = vpop.permute.xlu0 %1010 }
 0xf80   :  { %v3650_v55 = vpop.eup %3649  ;;  %v1015_v33 = vmul.f32 %v1011_v56, %v4450_v58 }
 0xf81   :  { %1991 = vrot.lane.b32.xlu1 %v3650_v55, %s3854_s11  ;;  %v3652_v23 = vpop.eup %3651 }
 0xf82   :  { %v4496_v59 = vmul.f32 %v4493_v22, %v3652_v23 }
 0xf84   :  { %5353 = vst [vmem:[#allocation6_spill] sm:$0xff] %v4496_v59  ;;  %v1695_v58 = vsel %vm373_vm7, %v4496_v59, 0.0 }
 0xf89   :  { %1348 = vrot.lane.b32.xlu1 %v1015_v33, %s3858_s16 }
 0xfb3   :  { %1696 = vadd.xlane.f32.xlu1 %v1695_v58 }
 0xfe3   :  { %v1994_v61 = vpop.permute.xlu0 %1993 }
 0xfe4   :  { %v1998_v2 = vmul.f32 %v1994_v61, %v1961_v8  ;;  %v4511_v8 = vld [vmem:[%s5335_s0 + $0xa0] sm:$0xff]  ;;  %v1377_v58 = vpop.f32.mrf.mxu2 }
 0xfe6   :  { %2003 = vrot.lane.b32.xlu0 %v1998_v2, %s3855_s20  ;;  %v4574_v2 = vld [vmem:[%s5335_s0 + $0xa8] ss:$0 sm:$0xff] }
 0xff3   :  { %v1992_v3 = vpop.permute.xlu1 %1991 }
 0xff4   :  { %v1997_v18 = vmul.f32 %v1992_v3, %v1946_v54  ;;  %v4531_v54 = vld [vmem:[%s5335_s0 + $0x88] sm:$0xff] }
 0xff6   :  { %2001 = vrot.lane.b32.xlu2 %v1997_v18, %s3855_s20 }
 0xffb   :  { %v1349_v25 = vpop.permute.xlu1 %1348 }
 0xffc   :  { %v1353_v12 = vsel %vm468_vm6, %v1322_v24, %v1349_v25 }
 0xffd   :  { %3402 = vmatmul.msk.f32.gmra.mxu2 %vm471_vm8, %v1353_v12 }
0x1005   :  { %3417 = vmatmul.msk.f32.vlgmr.msrb.gmra.mxu2 %vm286_vm13, %v4415_v44  ;;  %v1672_v44 = vsel %vm1668_vm3, %v4444_v27, %v1670_v30  ;;  %v4539_v27 = vld [vmem:[%s5335_s0 + $0x80] sm:$0xff] }
0x1006   :  { %2252 = vmatpush.msrb.mxu2 %v4511_v8  ;;  %v1675_v41 = vmul.f32 1.442695, %v1672_v44 }
0x1008   :  { %2253 = vmatpush.msrb.mxu2 %v4518_v16  ;;  %3653 = vpow2.f32 %v1675_v41 }
0x100a   :  { %2254 = vmatpush.msrb.mxu2 %v4525_v28 }
0x100c   :  { %2255 = vmatpush.msrb.mxu2 %v4531_v54 }
0x100d   :  { %3418 = vmatmul.msk.f32.gmra.mxu2 %vm286_vm13, %v4410_v46  ;;  %v4551_v46 = vld [vmem:[%s5335_s0 + $0x1b0] sm:$0x3] }
0x100e   :  { %2256 = vmatpush.msrb.mxu2 %v4539_v27  ;;  %v3654_v19 = vpop.eup %3653 }
0x100f   :  { %v4554_v38 = vmul.f32 %v4551_v46, %v3654_v19 }
0x1010   :  { %2257 = vmatpush.msrb.mxu2 %v4545_v47 }
0x1011   :  { %v1698_v48 = vsel %vm377_vm9, %v4554_v38, 0.0 }
0x101f   :  { %1699 = vadd.xlane.f32.xlu2 %v1698_v48 }
0x1026   :  { %v1697_v29 = vpop.xlane.xlu1 %1696 }
0x1027   :  { %3655 = vrcp.f32 %v1697_v29  ;;  %v1712_v62 = vand.u32 2147483648, %v1697_v29  ;;  %v1710_v32 = vand.u32 2147483647, %v1697_v29  ;;  %vm1706_vm5 = vweird.f32 %v1697_v29 }
0x1029   :  { %v1713_v56 = vor.u32 1.1754944e-38, %v1712_v62  ;;  %vm1711_vm15 = vcmp.eq.f32.partialorder %v1710_v32, 8.507059e+37 }
0x102d   :  { %v3656_v7 = vpop.eup %3655 }
0x102e   :  { %v1702_v63 = vmul.f32 %v3656_v7, %v1697_v29  ;;  %vm1707_vm4 = vweird.f32 %v3656_v7 }
0x102f   :  { %vm1708_vm14 = vmor %vm1706_vm5, %vm1707_vm4 }
0x1030   :  { %v1703_v21 = vsub.f32 1.0, %v1702_v63 }
0x1032   :  { %v1704_v51 = vmul.f32 %v3656_v7, %v1703_v21 }
0x1034   :  { %v1705_v55 = vadd.f32 %v3656_v7, %v1704_v51 }
0x1036   :  { %v1709_v33 = vsel %vm1708_vm14, %v3656_v7, %v1705_v55 }
0x1037   :  { %v1714_v13 = vsel %vm1711_vm15, %v1713_v56, %v1709_v33 }
0x1038   :  { %v4559_v36 = vmul.f32 %v1714_v13, %v4496_v59  ;;  %v1378_v13 = vadd.f32 %v4574_v2, %v1377_v58 }
0x103a   :  { %5354 = vst [vmem:[#allocation7_spill] sm:$0xff] %v4559_v36  ;;  %3420 = vmatmul.msk.f32.vlgmr.msra.gmra.mxu3 %vm373_vm7, %v4559_v36 }
0x1050   :  { %v4563_v60 = vpop.permute.xlu2 %2001 }
0x1051   :  { %3432 = vmatmul.msk.f32.vlgmr.msra.gmra.mxu2 %vm131_vm10, %v4563_v60 }
0x1058   :  { %v4567_v23 = vpop.permute.xlu0 %2003 }
0x1059   :  { %3433 = vmatmul.msk.f32.gmra.mxu2 %vm131_vm10, %v4567_v23 }
0x1080   :  { %v1380_v61 = vpop.f32.mrf.mxu2 }
0x1081   :  { %v4577_v3 = vadd.f32 %v4574_v2, %v1380_v61 }
0x1083   :  { %3657 = vtanh.f32 %v4577_v3 }
0x1088   :  { %v4586_v62 = vpop.f32.mrf.mxu2 }
0x1089   :  { %v3658_v18 = vpop.eup %3657 }
0x108a   :  { %1429 = vrot.lane.b32.xlu1 %v3658_v18, %s3854_s11  ;;  %v3403_v18 = vmul.f32 -1.442695, %v1378_v13 }
0x1090   :  { %v4588_v51 = vpop.f32.mrf.mxu2 }
0x1092   :  { %v1700_v24 = vpop.xlane.xlu2 %1699 }
0x1093   :  { %3659 = vrcp.f32 %v1700_v24  ;;  %v1727_v44 = vand.u32 2147483648, %v1700_v24  ;;  %v1725_v19 = vand.u32 2147483647, %v1700_v24  ;;  %vm1721_vm1 = vweird.f32 %v1700_v24 }
0x1094   :  { %3661 = vtanh.f32 %v1378_v13 }
0x1095   :  { %v1728_v29 = vor.u32 1.1754944e-38, %v1727_v44  ;;  %vm1726_vm3 = vcmp.eq.f32.partialorder %v1725_v19, 8.507059e+37  ;;  %3663 = vpow2.f32 %v3403_v18 }
0x1099   :  { %v3660_v25 = vpop.eup %3659 }
0x109a   :  { %v1717_v12 = vmul.f32 %v3660_v25, %v1700_v24  ;;  %vm1722_vm0 = vweird.f32 %v3660_v25  ;;  %v3662_v61 = vpop.eup %3661 }
0x109b   :  { %vm1723_vm2 = vmor %vm1721_vm1, %vm1722_vm0  ;;  %v3664_v24 = vpop.eup %3663 }
0x109c   :  { %v1718_v30 = vsub.f32 1.0, %v1717_v12 }
0x109e   :  { %v1719_v41 = vmul.f32 %v3660_v25, %v1718_v30 }
0x10a0   :  { %v1720_v48 = vadd.f32 %v3660_v25, %v1719_v41 }
0x10a2   :  { %v1724_v7 = vsel %vm1723_vm2, %v3660_v25, %v1720_v48  ;;  %v1389_v25 = vadd.f32 1.0, %v3664_v24  ;;  %v3404_v24 = vmul.f32 -1.442695, %v4577_v3 }
0x10a3   :  { %v1729_v63 = vsel %vm1726_vm3, %v1728_v29, %v1724_v7 }
0x10a4   :  { %v4582_v21 = vmul.f32 %v1729_v63, %v4554_v38  ;;  %3665 = vrcp.f32 %v1389_v25  ;;  %vm1396_vm5 = vweird.f32 %v1389_v25 }
0x10a5   :  { %3667 = vpow2.f32 %v3404_v24 }
0x10a6   :  { %3421 = vmatmul.msk.f32.gmra.mxu3 %vm373_vm7, %v4582_v21 }
0x10aa   :  { %v3666_v44 = vpop.eup %3665 }
0x10ab   :  { %v1392_v41 = vmul.f32 %v3666_v44, %v1389_v25  ;;  %vm1397_vm4 = vweird.f32 %v3666_v44 }
0x10ac   :  { %vm1398_vm14 = vmor %vm1396_vm5, %vm1397_vm4 }
0x10ad   :  { %v1393_v29 = vsub.f32 1.0, %v1392_v41 }
0x10af   :  { %v1394_v7 = vmul.f32 %v3666_v44, %v1393_v29 }
0x10d4   :  { %v2026_v32 = vpop.f32.mrf.mxu2 }
0x10d5   :  { %v2027_v55 = vadd.f32 %v4397_v34, %v2026_v32 }
0x10d7   :  { %2042 = vrot.lane.b32.xlu0 %v2027_v55, %s3857_s24 }
0x10dc   :  { %v2029_v56 = vpop.f32.mrf.mxu2 }
0x10dd   :  { %v2030_v33 = vadd.f32 %v4397_v34, %v2029_v56 }
0x10df   :  { %3442 = vmatpush.msk.msrb.mxu1 %vm417_vm11, %v2030_v33  ;;  %2044 = vrot.lane.b32.xlu0 %v2030_v33, %s3857_s24 }
0x10e1   :  { %2195 = vmatpush.msrb.mxu1 %v2027_v55 }
0x10e7   :  { %2034 = vrot.lane.b32.xlu0 %v2027_v55, %s3856_s23  ;;  %v1395_v55 = vadd.f32 %v3666_v44, %v1394_v7  ;;  %v2340_v7 = vld [vmem:[#allocation2 + $0x3a] sm:$0x3] }
0x10e9   :  { %v1399_v56 = vsel %vm1398_vm14, %v3666_v44, %v1395_v55 }
0x10ef   :  { %2036 = vrot.lane.b32.xlu0 %v2030_v33, %s3856_s23 }
0x10f7   :  { %1427 = vrot.lane.b32.xlu0 %v3662_v61, %s3854_s11  ;;  %v4627_v61 = vpop.f32.mrf.mxu3 }
0x10fc   :  { %v1430_v24 = vpop.permute.xlu1 %1429 }
0x1129   :  { %v4629_v18 = vpop.f32.mrf.mxu3 }
0x1149   :  { %v2043_v34 = vpop.permute.xlu0 %2042 }
0x114a   :  { %v4605_v58 = vsel %vm275_vm12, %v2043_v34, 1.0  ;;  %v3668_v34 = vpop.eup %3667 }
0x1151   :  { %v2045_v12 = vpop.permute.xlu0 %2044 }
0x1152   :  { %v4600_v30 = vsel %vm275_vm12, %v2045_v12, 1.0  ;;  %v1390_v12 = vadd.f32 1.0, %v3668_v34 }
0x1153   :  { %3434 = vmatpush.xpose.msk.msrb.mxu3 %vm286_vm13, %v4600_v30 }
0x1154   :  { %3669 = vrcp.f32 %v1390_v12  ;;  %vm1411_vm1 = vweird.f32 %v1390_v12 }
0x1157   :  { %3435 = vmatpush.xpose.msk.msrb.mxu3 %vm286_vm13, %v4605_v58 }
0x1159   :  { %v2035_v19 = vpop.permute.xlu0 %2034 }
0x115a   :  { %v2040_v48 = vsel %vm275_vm12, 1.0, %v2035_v19  ;;  %v3670_v19 = vpop.eup %3669 }
0x115b   :  { %2353 = vmatpush.msra.mxu3 %v4263_v45  ;;  %v1402_v45 = vand.u32 2147483648, %v1389_v25  ;;  %vm1412_vm0 = vweird.f32 %v3670_v19 }
0x115c   :  { %3436 = vmatmul.msk.f32.vlgmr.msrb.gmra.mxu3 %vm286_vm13, %v2040_v48  ;;  %vm1413_vm2 = vmor %vm1411_vm1, %vm1412_vm0 }
0x115d   :  { %2354 = vmatpush.msra.mxu3 %v4273_v49  ;;  %v1400_v49 = vand.u32 2147483647, %v1389_v25 }
0x115f   :  { %2355 = vmatpush.msra.mxu3 %v4279_v40  ;;  %v1403_v40 = vor.u32 1.1754944e-38, %v1402_v45  ;;  %vm1401_vm15 = vcmp.eq.f32.partialorder %v1400_v49, 8.507059e+37 }
0x1161   :  { %2356 = vmatpush.msra.mxu3 %v4286_v50  ;;  %v2037_v63 = vpop.permute.xlu0 %2036  ;;  %v4619_v33 = vsel %vm1401_vm15, %v1403_v40, %v1399_v56  ;;  %v1417_v56 = vand.u32 2147483648, %v1390_v12  ;;  %v1415_v40 = vand.u32 2147483647, %v1390_v12 }
0x1162   :  { %v2041_v32 = vsel %vm275_vm12, 1.0, %v2037_v63 }
0x1163   :  { %3438 = vmatpush.xpose.msk.msra.mxu0 %vm286_vm13, %v2041_v32  ;;  %v1418_v34 = vor.u32 1.1754944e-38, %v1417_v56  ;;  %vm1416_vm3 = vcmp.eq.f32.partialorder %v1415_v40, 8.507059e+37 }
0x1164   :  { %3437 = vmatmul.msk.f32.gmra.mxu3 %vm286_vm13, %v2041_v32 }
0x1167   :  { %3439 = vmatpush.xpose.msk.msra.mxu0 %vm286_vm13, %v2040_v48 }
0x1169   :  { %v1428_v50 = vpop.permute.xlu0 %1427 }
0x116a   :  { %v1433_v13 = vmul.f32 %v1428_v50, %v4619_v33 }
0x116c   :  { %3451 = vmatmul.msk.f32.vlgmr.msra.gmra.mxu3 %vm131_vm10, %v4563_v60  ;;  %1437 = vrot.lane.b32.xlu0 %v1433_v13, %s3854_s11  ;;  %v2339_v60 = vld [vmem:[#allocation2 + $0x32] sm:$0xff] }
0x1174   :  { %3452 = vmatmul.msk.f32.gmra.mxu3 %vm131_vm10, %v4567_v23  ;;  %v1407_v23 = vmul.f32 %v3670_v19, %v1390_v12 }
0x1176   :  { %v1408_v29 = vsub.f32 1.0, %v1407_v23 }
0x1178   :  { %v1409_v3 = vmul.f32 %v3670_v19, %v1408_v29 }
0x117a   :  { %v1410_v45 = vadd.f32 %v3670_v19, %v1409_v3 }
0x117c   :  { %v1414_v50 = vsel %vm1413_vm2, %v3670_v19, %v1410_v45 }
0x11de   :  { %v1438_v13 = vpop.permute.xlu0 %1437 }
0x11df   :  { %v4632_v25 = vpop.f32.mrf.mxu3 }
0x11e7   :  { %v4634_v44 = vpop.f32.mrf.mxu3 }
0x11ef   :  { %v2358_v41 = vpop.f32.mrf.mxu3 }
0x11f0   :  { %v2364_v48 = vadd.f32 %v2358_v41, %v2339_v60  ;;  %v1423_v60 = vmul.f32 %v4619_v33, %v4452_v1  ;;  %v4640_v41 = vsel %vm1416_vm3, %v1418_v34, %v1414_v50 }
0x11f1   :  { %v1434_v29 = vmul.f32 %v1430_v24, %v4640_v41 }
0x11f2   :  { %3671 = vtanh.f32 %v2364_v48  ;;  %v4642_v23 = vadd.f32 %v1438_v13, %v1423_v60  ;;  %v3453_v19 = vmul.f32 -1.442695, %v2364_v48 }
0x11f7   :  { %v2361_v63 = vpop.f32.mrf.mxu3 }
0x11f8   :  { %v3672_v32 = vpop.eup %3671  ;;  %v2365_v55 = vadd.f32 %v2361_v63, %v2340_v7 }
0x11f9   :  { %2410 = vrot.lane.b32.xlu2 %v3672_v32, %s3854_s11 }
0x11fa   :  { %3673 = vtanh.f32 %v2365_v55  ;;  %v3454_v45 = vmul.f32 -1.442695, %v2365_v55 }
0x11fb   :  { %3675 = vtanh.f32 %v4642_v23 }
0x11fc   :  { %3677 = vpow2.f32 %v3453_v19 }
0x1200   :  { %v3674_v49 = vpop.eup %3673 }
0x1201   :  { %2412 = vrot.lane.b32.xlu0 %v3674_v49, %s3854_s11  ;;  %v3676_v12 = vpop.eup %3675 }
0x1202   :  { %v3678_v7 = vpop.eup %3677 }
0x1203   :  { %v2372_v63 = vadd.f32 1.0, %v3678_v7 }
0x1205   :  { %3679 = vrcp.f32 %v2372_v63  ;;  %v2385_v40 = vand.u32 2147483648, %v2372_v63  ;;  %vm2379_vm5 = vweird.f32 %v2372_v63  ;;  %v2383_v50 = vand.u32 2147483647, %v2372_v63 }
0x1206   :  { %3681 = vpow2.f32 %v3454_v45 }
0x1207   :  { %v2386_v34 = vor.u32 1.1754944e-38, %v2385_v40  ;;  %vm2384_vm15 = vcmp.eq.f32.partialorder %v2383_v50, 8.507059e+37 }
0x1209   :  { %1439 = vrot.lane.b32.xlu0 %v1434_v29, %s3854_s11 }
0x120b   :  { %v3680_v1 = vpop.eup %3679 }
0x120c   :  { %v2375_v32 = vmul.f32 %v3680_v1, %v2372_v63  ;;  %vm2380_vm4 = vweird.f32 %v3680_v1  ;;  %v3682_v13 = vpop.eup %3681 }
0x120d   :  { %vm2381_vm14 = vmor %vm2379_vm5, %vm2380_vm4  ;;  %v2373_v48 = vadd.f32 1.0, %v3682_v13  ;;  %v1424_v13 = vmul.f32 %v4640_v41, %v4461_v17  ;;  %vm2108_vm4 = vcmp.ge.f32.partialorder %v4632_v25, 0.0  ;;  %vm2109_vm5 = vcmp.ge.f32.partialorder %v4634_v44, 0.0 }
0x120e   :  { %v2376_v3 = vsub.f32 1.0, %v2375_v32 }
0x120f   :  { %3683 = vrcp.f32 %v2373_v48  ;;  %v2400_v63 = vand.u32 2147483648, %v2373_v48  ;;  %vm2394_vm1 = vweird.f32 %v2373_v48 }
0x1210   :  { %v2377_v49 = vmul.f32 %v3680_v1, %v2376_v3 }
0x1211   :  { %1449 = vrot.lane.b32.xlu0 %v3676_v12, %s3854_s11 }
0x1212   :  { %v2378_v56 = vadd.f32 %v3680_v1, %v2377_v49  ;;  %v2401_v49 = vor.u32 1.1754944e-38, %v2400_v63 }
0x1214   :  { %v2382_v24 = vsel %vm2381_vm14, %v3680_v1, %v2378_v56  ;;  %v2398_v1 = vand.u32 2147483647, %v2373_v48 }
0x1215   :  { %v4648_v29 = vsel %vm2384_vm15, %v2386_v34, %v2382_v24  ;;  %v3684_v55 = vpop.eup %3683 }
0x1216   :  { %v2390_v19 = vmul.f32 %v3684_v55, %v2373_v48  ;;  %vm2395_vm0 = vweird.f32 %v3684_v55  ;;  %vm2399_vm3 = vcmp.eq.f32.partialorder %v2398_v1, 8.507059e+37 }
0x1217   :  { %vm2396_vm2 = vmor %vm2394_vm1, %vm2395_vm0 }
0x1218   :  { %v2391_v7 = vsub.f32 1.0, %v2390_v19 }
0x121a   :  { %v2392_v32 = vmul.f32 %v3684_v55, %v2391_v7 }
0x121c   :  { %v2393_v3 = vadd.f32 %v3684_v55, %v2392_v32 }
0x121e   :  { %v2397_v45 = vsel %vm2396_vm2, %v3684_v55, %v2393_v3  ;;  %v2406_v55 = vmul.f32 %v4648_v29, %v4481_v53  ;;  %v1762_v53 = vmax.f32 %v4627_v61, 0.0  ;;  %v4686_v61 = vld [vmem:[%s5335_s0 + $0xc0] sm:$0xff] }
0x121f   :  { %v2402_v56 = vsel %vm2399_vm3, %v2401_v49, %v2397_v45 }
0x1220   :  { %v2407_v17 = vmul.f32 %v2402_v56, %v4475_v10  ;;  %v4680_v10 = vld [vmem:[%s5335_s0 + $0xc8] sm:$0xff] }
0x1253   :  { %v2411_v60 = vpop.permute.xlu2 %2410 }
0x1254   :  { %v2416_v12 = vmul.f32 %v2411_v60, %v4648_v29 }
0x1256   :  { %2420 = vrot.lane.b32.xlu1 %v2416_v12, %s3854_s11 }
0x1273   :  { %v2413_v40 = vpop.permute.xlu0 %2412 }
0x1274   :  { %v2417_v50 = vmul.f32 %v2413_v40, %v2402_v56 }
0x1276   :  { %2422 = vrot.lane.b32.xlu2 %v2417_v50, %s3854_s11  ;;  %v4698_v50 = vld [vmem:[%s5335_s0 + $0xb0] sm:$0xff] }
0x127b   :  { %v1440_v24 = vpop.permute.xlu0 %1439 }
0x127c   :  { %v4655_v34 = vadd.f32 %v1440_v24, %v1424_v13  ;;  %v2110_v13 = vmul.f32 0.2, %v4632_v25 }
0x127e   :  { %3685 = vtanh.f32 %v4655_v34  ;;  %v2112_v24 = vsel %vm2108_vm4, %v4632_v25, %v2110_v13 }
0x1283   :  { %v1450_v60 = vpop.permute.xlu0 %1449 }
0x1284   :  { %v3686_v12 = vpop.eup %3685  ;;  %v1455_v48 = vmul.f32 %v1450_v60, %v4619_v33  ;;  %v2114_v60 = vmul.f32 1.442695, %v2112_v24 }
0x1285   :  { %1451 = vrot.lane.b32.xlu1 %v3686_v12, %s3854_s11 }
0x1286   :  { %1787 = vrot.lane.b32.xlu0 %v1455_v48, %s3858_s16 }
0x12c8   :  { %v2421_v19 = vpop.permute.xlu1 %2420 }
0x12c9   :  { %v4663_v7 = vadd.f32 %v2421_v19, %v2406_v55 }
0x12cb   :  { %3687 = vtanh.f32 %v4663_v7 }
0x12d0   :  { %v2423_v32 = vpop.permute.xlu2 %2422 }
0x12d1   :  { %v3688_v3 = vpop.eup %3687  ;;  %v4667_v63 = vadd.f32 %v2423_v32, %v2407_v17  ;;  %v2111_v32 = vmul.f32 0.2, %v4634_v44 }
0x12d2   :  { %2432 = vrot.lane.b32.xlu2 %v3688_v3, %s3854_s11 }
0x12d3   :  { %3689 = vtanh.f32 %v4667_v63  ;;  %v2113_v25 = vsel %vm2109_vm5, %v4634_v44, %v2111_v32 }
0x12d4   :  { %3691 = vpow2.f32 %v2114_v60  ;;  %v2116_v3 = vmul.f32 1.442695, %v2113_v25 }
0x12d6   :  { %3693 = vpow2.f32 %v2116_v3 }
0x12d9   :  { %v3690_v33 = vpop.eup %3689 }
0x12da   :  { %2434 = vrot.lane.b32.xlu1 %v3690_v33, %s3854_s11  ;;  %v3692_v12 = vpop.eup %3691 }
0x12db   :  { %v4705_v48 = vmul.f32 %v4493_v22, %v3692_v12 }
0x12dd   :  { %v2136_v55 = vsel %vm373_vm7, %v4705_v48, 0.0 }
0x12f7   :  { %v1452_v1 = vpop.permute.xlu1 %1451 }
0x12f8   :  { %v1456_v45 = vmul.f32 %v1452_v1, %v4640_v41  ;;  %v1788_v49 = vpop.permute.xlu0 %1787  ;;  %v4692_v41 = vld [vmem:[%s5335_s0 + $0xb8] sm:$0xff]  ;;  %v1763_v1 = vmax.f32 %v4629_v18, 0.0 }
0x12f9   :  { %v1793_v40 = vsel %vm468_vm6, %v1762_v53, %v1788_v49  ;;  %v3694_v53 = vpop.eup %3693 }
0x12fa   :  { %3424 = vmatmul.msk.f32.vlgmr.msrb.gmra.mxu0 %vm471_vm8, %v1793_v40  ;;  %1789 = vrot.lane.b32.xlu2 %v1456_v45, %s3858_s16 }
0x12fb   :  { %2462 = vmatpush.msrb.mxu0 %v4680_v10 }
0x12fd   :  { %2463 = vmatpush.msrb.mxu0 %v4686_v61 }
0x12ff   :  { %2464 = vmatpush.msrb.mxu0 %v4692_v41 }
0x1301   :  { %2465 = vmatpush.msrb.mxu0 %v4698_v50 }
0x1323   :  { %2137 = vadd.xlane.f32.xlu2 %v2136_v55 }
0x132c   :  { %v2433_v19 = vpop.permute.xlu2 %2432 }
0x132d   :  { %v2438_v17 = vmul.f32 %v2433_v19, %v4648_v29  ;;  %v4717_v29 = vmul.f32 %v4551_v46, %v3694_v53 }
0x132f   :  { %2442 = vrot.lane.b32.xlu0 %v2438_v17, %s3855_s20  ;;  %5355 = vst [vmem:[#allocation8_spill] sm:$0xff] %v4717_v29  ;;  %v2139_v44 = vsel %vm377_vm9, %v4717_v29, 0.0 }
0x134c   :  { %v2435_v33 = vpop.permute.xlu1 %2434 }
0x134d   :  { %v2439_v22 = vmul.f32 %v2435_v33, %v2402_v56 }
0x134f   :  { %2444 = vrot.lane.b32.xlu1 %v2439_v22, %s3855_s20 }
0x1354   :  { %v1790_v45 = vpop.permute.xlu2 %1789 }
0x1355   :  { %v1794_v49 = vsel %vm468_vm6, %v1763_v1, %v1790_v45 }
0x1356   :  { %3425 = vmatmul.msk.f32.gmra.mxu0 %vm471_vm8, %v1794_v49 }
0x1359   :  { %2140 = vadd.xlane.f32.xlu0 %v2139_v44 }
0x135e   :  { %3440 = vmatmul.msk.f32.vlgmr.msra.gmra.mxu0 %vm286_vm13, %v4605_v58 }
0x135f   :  { %2693 = vmatpush.msra.mxu0 %v4511_v8 }
0x1361   :  { %2694 = vmatpush.msra.mxu0 %v4518_v16 }
0x1363   :  { %2695 = vmatpush.msra.mxu0 %v4525_v28 }
0x1365   :  { %2696 = vmatpush.msra.mxu0 %v4531_v54 }
0x1366   :  { %3441 = vmatmul.msk.f32.gmra.mxu0 %vm286_vm13, %v4600_v30 }
0x1367   :  { %2697 = vmatpush.msra.mxu0 %v4539_v27 }
0x1369   :  { %2698 = vmatpush.msra.mxu0 %v4545_v47 }
0x1377   :  { %v1818_v25 = vpop.f32.mrf.mxu0 }
0x1396   :  { %v2138_v46 = vpop.xlane.xlu2 %2137 }
0x1397   :  { %3695 = vrcp.f32 %v2138_v46  ;;  %v2153_v40 = vand.u32 2147483648, %v2138_v46  ;;  %v2151_v60 = vand.u32 2147483647, %v2138_v46  ;;  %vm2147_vm15 = vweird.f32 %v2138_v46 }
0x1399   :  { %v2154_v30 = vor.u32 1.1754944e-38, %v2153_v40  ;;  %vm2152_vm1 = vcmp.eq.f32.partialorder %v2151_v60, 8.507059e+37 }
0x139d   :  { %v3696_v18 = vpop.eup %3695 }
0x139e   :  { %v2143_v56 = vmul.f32 %v3696_v18, %v2138_v46  ;;  %vm2148_vm14 = vweird.f32 %v3696_v18 }
0x139f   :  { %vm2149_vm0 = vmor %vm2147_vm15, %vm2148_vm14 }
0x13a0   :  { %v2144_v58 = vsub.f32 1.0, %v2143_v56 }
0x13a1   :  { %v4733_v13 = vpop.permute.xlu0 %2442 }
0x13a2   :  { %v2145_v24 = vmul.f32 %v3696_v18, %v2144_v58  ;;  %3455 = vmatmul.msk.f32.vlgmr.msrb.gmra.mxu0 %vm131_vm10, %v4733_v13 }
0x13a4   :  { %v2146_v12 = vadd.f32 %v3696_v18, %v2145_v24 }
0x13a6   :  { %v2150_v55 = vsel %vm2149_vm0, %v3696_v18, %v2146_v12 }
0x13a7   :  { %v2155_v19 = vsel %vm2152_vm1, %v2154_v30, %v2150_v55 }
0x13a8   :  { %v4738_v17 = vmul.f32 %v2155_v19, %v4705_v48  ;;  %v4760_v19 = vld [vmem:[%s5335_s0 + $0xd0] ss:$0 sm:$0xff] }
0x13aa   :  { %5356 = vst [vmem:[#allocation9_spill] sm:$0xff] %v4738_v17  ;;  %3443 = vmatmul.msk.f32.vlgmr.msrb.gmra.mxu1 %vm373_vm7, %v4738_v17 }
0x13c1   :  { %v4742_v32 = vpop.permute.xlu1 %2444 }
0x13c2   :  { %3456 = vmatmul.msk.f32.gmra.mxu0 %vm131_vm10, %v4742_v32 }
0x13cc   :  { %v2141_v3 = vpop.xlane.xlu0 %2140 }
0x13cd   :  { %3697 = vrcp.f32 %v2141_v3  ;;  %v2168_v49 = vand.u32 2147483648, %v2141_v3  ;;  %v2166_v46 = vand.u32 2147483647, %v2141_v3  ;;  %vm2162_vm3 = vweird.f32 %v2141_v3 }
0x13cf   :  { %v2169_v56 = vor.u32 1.1754944e-38, %v2168_v49  ;;  %vm2167_vm5 = vcmp.eq.f32.partialorder %v2166_v46, 8.507059e+37 }
0x13d3   :  { %v3698_v33 = vpop.eup %3697  ;;  %v1821_v22 = vpop.f32.mrf.mxu0 }
0x13d4   :  { %v2158_v53 = vmul.f32 %v3698_v33, %v2141_v3  ;;  %v1822_v1 = vadd.f32 %v4574_v2, %v1821_v22  ;;  %vm2163_vm2 = vweird.f32 %v3698_v33 }
0x13d5   :  { %vm2164_vm4 = vmor %vm2162_vm3, %vm2163_vm2 }
0x13d6   :  { %v2159_v45 = vsub.f32 1.0, %v2158_v53  ;;  %3699 = vtanh.f32 %v1822_v1 }
0x13d8   :  { %v2160_v44 = vmul.f32 %v3698_v33, %v2159_v45 }
0x13da   :  { %v2161_v18 = vadd.f32 %v3698_v33, %v2160_v44 }
0x13db   :  { %v4753_v12 = vpop.f32.mrf.mxu0 }
0x13dc   :  { %v3700_v58 = vpop.eup %3699  ;;  %v2165_v40 = vsel %vm2164_vm4, %v3698_v33, %v2161_v18  ;;  %v3427_v33 = vmul.f32 -1.442695, %v1822_v1  ;;  %v1819_v18 = vadd.f32 %v4574_v2, %v1818_v25 }
0x13dd   :  { %1870 = vrot.lane.b32.xlu2 %v3700_v58, %s3854_s11  ;;  %v2170_v24 = vsel %vm2167_vm5, %v2169_v56, %v2165_v40 }
0x13de   :  { %v4749_v60 = vmul.f32 %v2170_v24, %v4717_v29  ;;  %3701 = vpow2.f32 %v3427_v33 }
0x13e0   :  { %5357 = vst [vmem:[#allocation10_spill] sm:$0xff] %v4749_v60  ;;  %3444 = vmatmul.msk.f32.gmra.mxu1 %vm373_vm7, %v4749_v60 }
0x13e3   :  { %v4755_v30 = vpop.f32.mrf.mxu0 }
0x13e4   :  { %5358 = vst [vmem:[#allocation11_spill] sm:$0xff] %v4755_v30  ;;  %v3702_v22 = vpop.eup %3701 }
0x13e5   :  { %v1831_v53 = vadd.f32 1.0, %v3702_v22 }
0x13e7   :  { %3703 = vrcp.f32 %v1831_v53  ;;  %v1858_v24 = vand.u32 2147483648, %v1831_v53  ;;  %vm1852_vm15 = vweird.f32 %v1831_v53 }
0x13e8   :  { %3705 = vtanh.f32 %v1819_v18 }
0x13e9   :  { %v1859_v22 = vor.u32 1.1754944e-38, %v1858_v24 }
0x13ed   :  { %v3704_v44 = vpop.eup %3703 }
0x13ee   :  { %v1848_v46 = vmul.f32 %v3704_v44, %v1831_v53  ;;  %vm1853_vm14 = vweird.f32 %v3704_v44  ;;  %v3706_v40 = vpop.eup %3705 }
0x13ef   :  { %vm1854_vm0 = vmor %vm1852_vm15, %vm1853_vm14 }
0x13f0   :  { %v1849_v56 = vsub.f32 1.0, %v1848_v46 }
0x13f2   :  { %v1850_v1 = vmul.f32 %v3704_v44, %v1849_v56 }
0x13f4   :  { %v1851_v58 = vadd.f32 %v3704_v44, %v1850_v1 }
0x13f6   :  { %v1855_v33 = vsel %vm1854_vm0, %v3704_v44, %v1851_v58 }
0x141f   :  { %v2467_v55 = vpop.f32.mrf.mxu0 }
0x1420   :  { %v2468_v3 = vadd.f32 %v4760_v19, %v2467_v55  ;;  %v1856_v55 = vand.u32 2147483647, %v1831_v53 }
0x1422   :  { %2483 = vrot.lane.b32.xlu1 %v2468_v3, %s3857_s24  ;;  %vm1857_vm1 = vcmp.eq.f32.partialorder %v1856_v55, 8.507059e+37 }
0x143f   :  { %v2470_v45 = vpop.f32.mrf.mxu0 }
0x1440   :  { %v2471_v49 = vadd.f32 %v4760_v19, %v2470_v45  ;;  %v4771_v45 = vsel %vm1857_vm1, %v1859_v22, %v1855_v33  ;;  %v3847_v22 = vld [vmem:[%s5335_s0 + $0x68] sm:$0xff] }
0x1442   :  { %2485 = vrot.lane.b32.xlu1 %v2471_v49, %s3857_s24  ;;  %3465 = vmatpush.msk.msrb.mxu3 %vm417_vm11, %v2471_v49 }
0x1444   :  { %2636 = vmatpush.msrb.mxu3 %v2468_v3 }
0x144a   :  { %2475 = vrot.lane.b32.xlu1 %v2468_v3, %s3856_s23  ;;  %v1871_v3 = vpop.permute.xlu2 %1870 }
0x144b   :  { %v1875_v25 = vmul.f32 %v1871_v3, %v4771_v45 }
0x1452   :  { %2477 = vrot.lane.b32.xlu1 %v2471_v49, %s3856_s23  ;;  %v3426_v49 = vmul.f32 -1.442695, %v1819_v18  ;;  %v3846_v18 = vld [vmem:[%s5335_s0 + $0x70] sm:$0xff] }
0x1454   :  { %3707 = vpow2.f32 %v3426_v49 }
0x145a   :  { %1868 = vrot.lane.b32.xlu1 %v3706_v40, %s3854_s11  ;;  %v3708_v46 = vpop.eup %3707 }
0x145b   :  { %v1830_v56 = vadd.f32 1.0, %v3708_v46  ;;  %v3849_v46 = vld [vmem:[%s5335_s0 + $0x58] sm:$0xff] }
0x145d   :  { %3709 = vrcp.f32 %v1830_v56  ;;  %vm1837_vm3 = vweird.f32 %v1830_v56 }
0x1462   :  { %1880 = vrot.lane.b32.xlu1 %v1875_v25, %s3854_s11  ;;  %v3848_v25 = vld [vmem:[%s5335_s0 + $0x60] sm:$0xff] }
0x1463   :  { %v3710_v44 = vpop.eup %3709 }
0x1464   :  { %v1833_v24 = vmul.f32 %v3710_v44, %v1830_v56  ;;  %vm1838_vm2 = vweird.f32 %v3710_v44 }
0x1465   :  { %vm1839_vm4 = vmor %vm1837_vm3, %vm1838_vm2 }
0x1466   :  { %v1834_v3 = vsub.f32 1.0, %v1833_v24  ;;  %v1843_v24 = vand.u32 2147483648, %v1830_v56 }
0x1468   :  { %v1835_v49 = vmul.f32 %v3710_v44, %v1834_v3  ;;  %v1844_v3 = vor.u32 1.1754944e-38, %v1843_v24 }
0x1494   :  { %v2484_v1 = vpop.permute.xlu1 %2483 }
0x1495   :  { %v4781_v58 = vsel %vm275_vm12, %v2484_v1, 1.0 }
0x14b4   :  { %v2486_v53 = vpop.permute.xlu1 %2485 }
0x14b5   :  { %v4776_v40 = vsel %vm275_vm12, %v2486_v53, 1.0 }
0x14b6   :  { %3457 = vmatpush.xpose.msk.msra.mxu1 %vm286_vm13, %v4776_v40 }
0x14ba   :  { %3458 = vmatpush.xpose.msk.msra.mxu1 %vm286_vm13, %v4781_v58 }
0x14bc   :  { %v2476_v55 = vpop.permute.xlu1 %2475 }
0x14bd   :  { %v2481_v33 = vsel %vm275_vm12, 1.0, %v2476_v55  ;;  %v1841_v55 = vand.u32 2147483647, %v1830_v56 }
0x14be   :  { %2794 = vmatpush.msrb.mxu1 %v3846_v18  ;;  %v1836_v18 = vadd.f32 %v3710_v44, %v1835_v49  ;;  %v1865_v49 = vmul.f32 %v4771_v45, %v4655_v34 }
0x14bf   :  { %3459 = vmatmul.msk.f32.vlgmr.msra.gmra.mxu1 %vm286_vm13, %v2481_v33  ;;  %vm1842_vm5 = vcmp.eq.f32.partialorder %v1841_v55, 8.507059e+37  ;;  %v2780_v55 = vld [vmem:[#allocation2 + $0x3c] sm:$0xff] }
0x14c0   :  { %2795 = vmatpush.msrb.mxu1 %v3847_v22  ;;  %v1840_v22 = vsel %vm1839_vm4, %v3710_v44, %v1836_v18  ;;  %v4814_v44 = vpop.f32.mrf.mxu1 }
0x14c2   :  { %2796 = vmatpush.msrb.mxu1 %v3848_v25  ;;  %v1845_v25 = vsel %vm1842_vm5, %v1844_v3, %v1840_v22 }
0x14c4   :  { %2797 = vmatpush.msrb.mxu1 %v3849_v46  ;;  %v2478_v1 = vpop.permute.xlu1 %2477 }
0x14c5   :  { %v2482_v53 = vsel %vm275_vm12, 1.0, %v2478_v1 }
0x14c6   :  { %3461 = vmatpush.xpose.msk.msra.mxu2 %vm286_vm13, %v2482_v53 }
0x14c7   :  { %3460 = vmatmul.msk.f32.gmra.mxu1 %vm286_vm13, %v2482_v53 }
0x14ca   :  { %3462 = vmatpush.xpose.msk.msra.mxu2 %vm286_vm13, %v2481_v33  ;;  %v4816_v33 = vpop.f32.mrf.mxu1 }
0x14cc   :  { %v1869_v46 = vpop.permute.xlu1 %1868 }
0x14cd   :  { %v1874_v60 = vmul.f32 %v1869_v46, %v1845_v25  ;;  %v2781_v46 = vld [vmem:[#allocation2 + $0x44] sm:$0x3] }
0x14cf   :  { %3474 = vmatmul.msk.f32.vlgmr.msrb.gmra.mxu1 %vm131_vm10, %v4733_v13  ;;  %1878 = vrot.lane.b32.xlu0 %v1874_v60, %s3854_s11  ;;  %v1864_v60 = vmul.f32 %v1845_v25, %v4642_v23 }
0x14d4   :  { %v1881_v1 = vpop.permute.xlu1 %1880 }
0x14d5   :  { %v4808_v53 = vadd.f32 %v1881_v1, %v1865_v49 }
0x14d7   :  { %3475 = vmatmul.msk.f32.gmra.mxu1 %vm131_vm10, %v4742_v32  ;;  %3711 = vtanh.f32 %v4808_v53 }
0x14dd   :  { %v3712_v56 = vpop.eup %3711 }
0x14de   :  { %1892 = vrot.lane.b32.xlu0 %v3712_v56, %s3854_s11 }
0x153c   :  { %v4818_v13 = vpop.f32.mrf.mxu1 }
0x1541   :  { %v1879_v34 = vpop.permute.xlu0 %1878 }
0x1542   :  { %v4821_v18 = vadd.f32 %v1879_v34, %v1864_v60 }
0x1544   :  { %v4823_v24 = vpop.f32.mrf.mxu1  ;;  %3713 = vtanh.f32 %v4821_v18 }
0x154a   :  { %v3714_v32 = vpop.eup %3713 }
0x154b   :  { %1890 = vrot.lane.b32.xlu1 %v3714_v32, %s3854_s11 }
0x154c   :  { %v2799_v22 = vpop.f32.mrf.mxu1 }
0x154d   :  { %v2805_v3 = vadd.f32 %v2799_v22, %v2780_v55 }
0x154f   :  { %3715 = vtanh.f32 %v2805_v3  ;;  %v3476_v57 = vmul.f32 -1.442695, %v2805_v3 }
0x1550   :  { %v1893_v60 = vpop.permute.xlu0 %1892 }
0x1551   :  { %v1897_v34 = vmul.f32 %v1893_v60, %v4771_v45 }
0x1554   :  { %v2802_v49 = vpop.f32.mrf.mxu1 }
0x1555   :  { %v3716_v1 = vpop.eup %3715  ;;  %v2806_v56 = vadd.f32 %v2802_v49, %v2781_v46 }
0x1556   :  { %2851 = vrot.lane.b32.xlu1 %v3716_v1, %s3854_s11 }
0x1557   :  { %3717 = vtanh.f32 %v2806_v56  ;;  %v3477_v36 = vmul.f32 -1.442695, %v2806_v56 }
0x1559   :  { %3719 = vpow2.f32 %v3477_v36 }
0x155a   :  { %3721 = vpow2.f32 %v3476_v57 }
0x155d   :  { %v3718_v23 = vpop.eup %3717 }
0x155e   :  { %2853 = vrot.lane.b32.xlu2 %v3718_v23, %s3854_s11 }
0x155f   :  { %v3720_v32 = vpop.eup %3719 }
0x1560   :  { %v3722_v55 = vpop.eup %3721  ;;  %v2814_v22 = vadd.f32 1.0, %v3720_v32 }
0x1561   :  { %v2813_v29 = vadd.f32 1.0, %v3722_v55 }
0x1562   :  { %3723 = vrcp.f32 %v2814_v22  ;;  %v2841_v36 = vand.u32 2147483648, %v2814_v22  ;;  %vm2835_vm15 = vweird.f32 %v2814_v22  ;;  %v2839_v57 = vand.u32 2147483647, %v2814_v22 }
0x1563   :  { %3725 = vrcp.f32 %v2813_v29  ;;  %v2826_v32 = vand.u32 2147483648, %v2813_v29  ;;  %vm2820_vm2 = vweird.f32 %v2813_v29  ;;  %v2824_v0 = vand.u32 2147483647, %v2813_v29 }
0x1564   :  { %vm2840_vm4 = vcmp.eq.f32.partialorder %v2839_v57, 8.507059e+37 }
0x1565   :  { %vm2825_vm5 = vcmp.eq.f32.partialorder %v2824_v0, 8.507059e+37  ;;  %v2204_v0 = vmax.f32 %v4816_v33, 0.0 }
0x1566   :  { %2230 = vrot.lane.b32.xlu2 %v1897_v34, %s3858_s16 }
0x1568   :  { %v3724_v46 = vpop.eup %3723 }
0x1569   :  { %v3726_v49 = vpop.eup %3725  ;;  %v2831_v1 = vmul.f32 %v3724_v46, %v2814_v22  ;;  %vm2836_vm14 = vweird.f32 %v3724_v46 }
0x156a   :  { %v2816_v59 = vmul.f32 %v3726_v49, %v2813_v29  ;;  %vm2821_vm0 = vweird.f32 %v3726_v49  ;;  %vm2837_vm1 = vmor %vm2835_vm15, %vm2836_vm14  ;;  %vm2549_vm14 = vcmp.ge.f32.partialorder %v4818_v13, 0.0  ;;  %vm2550_vm15 = vcmp.ge.f32.partialorder %v4823_v24, 0.0 }
0x156b   :  { %v2832_v23 = vsub.f32 1.0, %v2831_v1  ;;  %vm2822_vm3 = vmor %vm2820_vm2, %vm2821_vm0 }
0x156c   :  { %v2817_v14 = vsub.f32 1.0, %v2816_v59  ;;  %v2842_v59 = vor.u32 1.1754944e-38, %v2841_v36 }
0x156d   :  { %v2833_v17 = vmul.f32 %v3724_v46, %v2832_v23  ;;  %v2827_v23 = vor.u32 1.1754944e-38, %v2826_v32 }
0x156e   :  { %v2818_v45 = vmul.f32 %v3726_v49, %v2817_v14 }
0x156f   :  { %v2834_v34 = vadd.f32 %v3724_v46, %v2833_v17 }
0x1570   :  { %v2819_v56 = vadd.f32 %v3726_v49, %v2818_v45 }
0x1571   :  { %v2838_v55 = vsel %vm2837_vm1, %v3724_v46, %v2834_v34  ;;  %v2203_v46 = vmax.f32 %v4814_v44, 0.0 }
0x1572   :  { %v2823_v14 = vsel %vm2822_vm3, %v3726_v49, %v2819_v56  ;;  %v2843_v17 = vsel %vm2840_vm4, %v2842_v59, %v2838_v55  ;;  %v2552_v59 = vmul.f32 0.2, %v4823_v24 }
0x1573   :  { %v2848_v34 = vmul.f32 %v2843_v17, %v4667_v63 }
0x15b8   :  { %v2854_v1 = vpop.permute.xlu2 %2853 }
0x15bd   :  { %v1891_v60 = vpop.permute.xlu1 %1890 }
0x15be   :  { %v1896_v3 = vmul.f32 %v1891_v60, %v1845_v25  ;;  %v2858_v25 = vmul.f32 %v2854_v1, %v2843_v17  ;;  %v2828_v60 = vsel %vm2825_vm5, %v2827_v23, %v2823_v14  ;;  %v2554_v14 = vsel %vm2550_vm15, %v4823_v24, %v2552_v59 }
0x15bf   :  { %v2847_v44 = vmul.f32 %v2828_v60, %v4663_v7  ;;  %v2551_v7 = vmul.f32 0.2, %v4818_v13 }
0x15c0   :  { %2228 = vrot.lane.b32.xlu1 %v1896_v3, %s3858_s16  ;;  %v2231_v49 = vpop.permute.xlu2 %2230 }
0x15c1   :  { %v2235_v36 = vsel %vm468_vm6, %v2204_v0, %v2231_v49 }
0x15c8   :  { %v2852_v22 = vpop.permute.xlu1 %2851  ;;  %2863 = vrot.lane.b32.xlu1 %v2858_v25, %s3854_s11 }
0x15c9   :  { %v2857_v30 = vmul.f32 %v2852_v22, %v2828_v60 }
0x15cb   :  { %2861 = vrot.lane.b32.xlu0 %v2857_v30, %s3854_s11 }
0x1632   :  { %v2229_v45 = vpop.permute.xlu1 %2228 }
0x1633   :  { %v2234_v29 = vsel %vm468_vm6, %v2203_v46, %v2229_v45 }
0x1634   :  { %3447 = vmatmul.msk.f32.vlgmr.msrb.gmra.mxu2 %vm471_vm8, %v2234_v29 }
0x1635   :  { %2903 = vmatpush.msrb.mxu2 %v4680_v10 }
0x1637   :  { %2904 = vmatpush.msrb.mxu2 %v4686_v61 }
0x1639   :  { %2905 = vmatpush.msrb.mxu2 %v4692_v41 }
0x163a   :  { %v2864_v3 = vpop.permute.xlu1 %2863 }
0x163b   :  { %v2868_v30 = vadd.f32 %v2864_v3, %v2848_v34  ;;  %2906 = vmatpush.msrb.mxu2 %v4698_v50 }
0x163c   :  { %3448 = vmatmul.msk.f32.gmra.mxu2 %vm471_vm8, %v2235_v36 }
0x163d   :  { %v2862_v57 = vpop.permute.xlu0 %2861  ;;  %3727 = vtanh.f32 %v2868_v30 }
0x163e   :  { %v2867_v10 = vadd.f32 %v2862_v57, %v2847_v44 }
0x1640   :  { %3729 = vtanh.f32 %v2867_v10 }
0x1643   :  { %v3728_v61 = vpop.eup %3727 }
0x1644   :  { %3463 = vmatmul.msk.f32.vlgmr.msra.gmra.mxu2 %vm286_vm13, %v4781_v58  ;;  %2875 = vrot.lane.b32.xlu2 %v3728_v61, %s3854_s11 }
0x1645   :  { %3134 = vmatpush.msra.mxu2 %v4511_v8  ;;  %v2553_v8 = vsel %vm2549_vm14, %v4818_v13, %v2551_v7 }
0x1646   :  { %v3730_v63 = vpop.eup %3729  ;;  %v2555_v41 = vmul.f32 1.442695, %v2553_v8 }
0x1647   :  { %2873 = vrot.lane.b32.xlu0 %v3730_v63, %s3854_s11  ;;  %3135 = vmatpush.msra.mxu2 %v4518_v16 }
0x1648   :  { %3731 = vpow2.f32 %v2555_v41 }
0x1649   :  { %3136 = vmatpush.msra.mxu2 %v4525_v28  ;;  %v4864_v28 = vld [vmem:[%s5335_s0 + $0x1a8] sm:$0xff] }
0x164b   :  { %3137 = vmatpush.msra.mxu2 %v4531_v54 }
0x164c   :  { %3464 = vmatmul.msk.f32.gmra.mxu2 %vm286_vm13, %v4776_v40 }
0x164d   :  { %3138 = vmatpush.msra.mxu2 %v4539_v27 }
0x164e   :  { %v3732_v16 = vpop.eup %3731 }
0x164f   :  { %3139 = vmatpush.msra.mxu2 %v4545_v47  ;;  %v4867_v54 = vmul.f32 %v4864_v28, %v3732_v16 }
0x1651   :  { %v2577_v27 = vsel %vm373_vm7, %v4867_v54, 0.0 }
0x166d   :  { %2578 = vadd.xlane.f32.xlu2 %v2577_v27 }
0x169e   :  { %v2876_v47 = vpop.permute.xlu2 %2875 }
0x169f   :  { %v2880_v50 = vmul.f32 %v2876_v47, %v2843_v17  ;;  %v2557_v17 = vmul.f32 1.442695, %v2554_v14 }
0x16a1   :  { %2885 = vrot.lane.b32.xlu0 %v2880_v50, %s3855_s20 }
0x16b7   :  { %v2259_v40 = vpop.f32.mrf.mxu2 }
0x16b8   :  { %v2260_v58 = vadd.f32 %v4574_v2, %v2259_v40 }
0x16b9   :  { %v2874_v33 = vpop.permute.xlu0 %2873 }
0x16ba   :  { %v2879_v13 = vmul.f32 %v2874_v33, %v2828_v60  ;;  %3733 = vtanh.f32 %v2260_v58  ;;  %v3449_v57 = vmul.f32 -1.442695, %v2260_v58 }
0x16bc   :  { %2883 = vrot.lane.b32.xlu1 %v2879_v13, %s3855_s20 }
0x16bf   :  { %v2262_v56 = vpop.f32.mrf.mxu2 }
0x16c0   :  { %v3734_v32 = vpop.eup %3733  ;;  %v2263_v55 = vadd.f32 %v4574_v2, %v2262_v56  ;;  %v4883_v2 = vld [vmem:[%s5335_s0 + $0x1b0] sm:$0x3] }
0x16c1   :  { %2309 = vrot.lane.b32.xlu0 %v3734_v32, %s3854_s11 }
0x16c2   :  { %3735 = vtanh.f32 %v2263_v55  ;;  %v3450_v10 = vmul.f32 -1.442695, %v2263_v55 }
0x16c3   :  { %3737 = vpow2.f32 %v2557_v17 }
0x16c8   :  { %v3736_v1 = vpop.eup %3735 }
0x16c9   :  { %2311 = vrot.lane.b32.xlu0 %v3736_v1, %s3854_s11  ;;  %v3738_v23 = vpop.eup %3737 }
0x16ca   :  { %v4886_v60 = vmul.f32 %v4883_v2, %v3738_v23 }
0x16cc   :  { %v2580_v22 = vsel %vm377_vm9, %v4886_v60, 0.0 }
0x16e0   :  { %v2579_v25 = vpop.xlane.xlu2 %2578 }
0x16e1   :  { %3739 = vrcp.f32 %v2579_v25  ;;  %v2594_v29 = vand.u32 2147483648, %v2579_v25  ;;  %v2592_v0 = vand.u32 2147483647, %v2579_v25  ;;  %vm2588_vm1 = vweird.f32 %v2579_v25 }
0x16e2   :  { %3741 = vpow2.f32 %v3449_v57 }
0x16e3   :  { %v2595_v3 = vor.u32 1.1754944e-38, %v2594_v29  ;;  %vm2593_vm3 = vcmp.eq.f32.partialorder %v2592_v0, 8.507059e+37  ;;  %3743 = vpow2.f32 %v3450_v10 }
0x16e6   :  { %2581 = vadd.xlane.f32.xlu1 %v2580_v22 }
0x16e7   :  { %v3740_v46 = vpop.eup %3739 }
0x16e8   :  { %v2584_v45 = vmul.f32 %v3740_v46, %v2579_v25  ;;  %vm2589_vm0 = vweird.f32 %v3740_v46  ;;  %v3742_v61 = vpop.eup %3741 }
0x16e9   :  { %vm2590_vm2 = vmor %vm2588_vm1, %vm2589_vm0  ;;  %v2271_v63 = vadd.f32 1.0, %v3742_v61  ;;  %v3744_v7 = vpop.eup %3743 }
0x16ea   :  { %v2585_v24 = vsub.f32 1.0, %v2584_v45  ;;  %v2272_v8 = vadd.f32 1.0, %v3744_v7 }
0x16eb   :  { %3745 = vrcp.f32 %v2271_v63  ;;  %v2284_v32 = vand.u32 2147483648, %v2271_v63  ;;  %vm2278_vm5 = vweird.f32 %v2271_v63  ;;  %v2282_v55 = vand.u32 2147483647, %v2271_v63 }
0x16ec   :  { %v2586_v49 = vmul.f32 %v3740_v46, %v2585_v24  ;;  %3747 = vrcp.f32 %v2272_v8  ;;  %vm2293_vm1 = vweird.f32 %v2272_v8  ;;  %v2297_v45 = vand.u32 2147483647, %v2272_v8 }
0x16ed   :  { %v2285_v14 = vor.u32 1.1754944e-38, %v2284_v32  ;;  %vm2283_vm15 = vcmp.eq.f32.partialorder %v2282_v55, 8.507059e+37 }
0x16ee   :  { %v2587_v34 = vadd.f32 %v3740_v46, %v2586_v49 }
0x16f0   :  { %v2591_v30 = vsel %vm2590_vm2, %v3740_v46, %v2587_v34  ;;  %v2299_v46 = vand.u32 2147483648, %v2272_v8 }
0x16f1   :  { %v2596_v44 = vsel %vm2593_vm3, %v2595_v3, %v2591_v30  ;;  %v3746_v41 = vpop.eup %3745  ;;  %vm2298_vm3 = vcmp.eq.f32.partialorder %v2297_v45, 8.507059e+37 }
0x16f2   :  { %v4891_v36 = vmul.f32 %v2596_v44, %v4867_v54  ;;  %v2274_v16 = vmul.f32 %v3746_v41, %v2271_v63  ;;  %v3748_v47 = vpop.eup %3747  ;;  %vm2279_vm4 = vweird.f32 %v3746_v41  ;;  %v2300_v29 = vor.u32 1.1754944e-38, %v2299_v46 }
0x16f3   :  { %v2289_v40 = vmul.f32 %v3748_v47, %v2272_v8  ;;  %vm2280_vm14 = vmor %vm2278_vm5, %vm2279_vm4  ;;  %vm2294_vm0 = vweird.f32 %v3748_v47 }
0x16f4   :  { %3466 = vmatmul.msk.f32.vlgmr.msrb.gmra.mxu3 %vm373_vm7, %v4891_v36  ;;  %v2275_v27 = vsub.f32 1.0, %v2274_v16  ;;  %vm2295_vm2 = vmor %vm2293_vm1, %vm2294_vm0 }
0x16f5   :  { %v2290_v58 = vsub.f32 1.0, %v2289_v40 }
0x16f6   :  { %v2276_v50 = vmul.f32 %v3746_v41, %v2275_v27 }
0x16f7   :  { %v2291_v59 = vmul.f32 %v3748_v47, %v2290_v58 }
0x16f8   :  { %v2277_v13 = vadd.f32 %v3746_v41, %v2276_v50 }
0x16f9   :  { %v2292_v22 = vadd.f32 %v3748_v47, %v2291_v59 }
0x16fa   :  { %v2281_v1 = vsel %vm2280_vm14, %v3746_v41, %v2277_v13 }
0x16fb   :  { %v4901_v17 = vsel %vm2283_vm15, %v2285_v14, %v2281_v1  ;;  %v2296_v24 = vsel %vm2295_vm2, %v3748_v47, %v2292_v22  ;;  %v4913_v47 = vpop.f32.mrf.mxu2 }
0x16fc   :  { %v2301_v49 = vsel %vm2298_vm3, %v2300_v29, %v2296_v24  ;;  %v2305_v50 = vmul.f32 %v4901_v17, %v4821_v18 }
0x16fd   :  { %v2306_v32 = vmul.f32 %v2301_v49, %v4808_v53 }
0x1703   :  { %v4917_v13 = vpop.f32.mrf.mxu2 }
0x1713   :  { %v4895_v33 = vpop.permute.xlu0 %2885 }
0x172e   :  { %v4897_v56 = vpop.permute.xlu1 %2883 }
0x172f   :  { %3478 = vmatmul.msk.f32.vlgmr.msrb.gmra.mxu2 %vm131_vm10, %v4897_v56 }
0x1733   :  { %v2310_v23 = vpop.permute.xlu0 %2309 }
0x1734   :  { %v2315_v25 = vmul.f32 %v2310_v23, %v4901_v17 }
0x1736   :  { %2319 = vrot.lane.b32.xlu0 %v2315_v25, %s3854_s11 }
0x1737   :  { %3479 = vmatmul.msk.f32.gmra.mxu2 %vm131_vm10, %v4895_v33 }
0x173b   :  { %v2312_v0 = vpop.permute.xlu0 %2311 }
0x173c   :  { %v2316_v34 = vmul.f32 %v2312_v0, %v2301_v49 }
0x173e   :  { %2321 = vrot.lane.b32.xlu0 %v2316_v34, %s3854_s11 }
0x1759   :  { %v2582_v3 = vpop.xlane.xlu1 %2581 }
0x175a   :  { %3749 = vrcp.f32 %v2582_v3  ;;  %v2609_v10 = vand.u32 2147483648, %v2582_v3  ;;  %v2607_v63 = vand.u32 2147483647, %v2582_v3  ;;  %vm2603_vm5 = vweird.f32 %v2582_v3 }
0x175c   :  { %v2610_v8 = vor.u32 1.1754944e-38, %v2609_v10  ;;  %vm2608_vm15 = vcmp.eq.f32.partialorder %v2607_v63, 8.507059e+37 }
0x1760   :  { %v3750_v30 = vpop.eup %3749 }
0x1761   :  { %v2599_v44 = vmul.f32 %v3750_v30, %v2582_v3  ;;  %vm2604_vm4 = vweird.f32 %v3750_v30 }
0x1762   :  { %vm2605_vm14 = vmor %vm2603_vm5, %vm2604_vm4 }
0x1763   :  { %v2600_v57 = vsub.f32 1.0, %v2599_v44 }
0x1765   :  { %v2601_v61 = vmul.f32 %v3750_v30, %v2600_v57 }
0x1767   :  { %v2602_v7 = vadd.f32 %v3750_v30, %v2601_v61 }
0x1769   :  { %v2606_v41 = vsel %vm2605_vm14, %v3750_v30, %v2602_v7 }
0x176a   :  { %v2611_v16 = vsel %vm2608_vm15, %v2610_v8, %v2606_v41 }
0x176b   :  { %v4909_v27 = vmul.f32 %v2611_v16, %v4886_v60 }
0x176d   :  { %3467 = vmatmul.msk.f32.gmra.mxu3 %vm373_vm7, %v4909_v27 }
0x17a8   :  { %v2320_v40 = vpop.permute.xlu0 %2319 }
0x17a9   :  { %v4919_v58 = vadd.f32 %v2320_v40, %v2305_v50 }
0x17ab   :  { %3751 = vtanh.f32 %v4919_v58 }
0x17b0   :  { %v2322_v55 = vpop.permute.xlu0 %2321 }
0x17b1   :  { %v3752_v1 = vpop.eup %3751  ;;  %v4923_v59 = vadd.f32 %v2322_v55, %v2306_v32 }
0x17b2   :  { %v2908_v14 = vpop.f32.mrf.mxu2  ;;  %2331 = vrot.lane.b32.xlu0 %v3752_v1, %s3854_s11 }
0x17b3   :  { %v2909_v23 = vadd.f32 %v4760_v19, %v2908_v14  ;;  %3753 = vtanh.f32 %v4923_v59 }
0x17b5   :  { %2924 = vrot.lane.b32.xlu1 %v2909_v23, %s3857_s24 }
0x17b9   :  { %v3754_v18 = vpop.eup %3753 }
0x17ba   :  { %v2911_v25 = vpop.f32.mrf.mxu2  ;;  %2333 = vrot.lane.b32.xlu0 %v3754_v18, %s3854_s11 }
0x17bb   :  { %v2912_v22 = vadd.f32 %v4760_v19, %v2911_v25 }
0x17bd   :  { %2926 = vrot.lane.b32.xlu2 %v2912_v22, %s3857_s24  ;;  %3488 = vmatpush.msk.msra.mxu1 %vm417_vm11, %v2912_v22 }
0x17bf   :  { %3077 = vmatpush.msra.mxu1 %v2909_v23 }
0x17c2   :  { %2916 = vrot.lane.b32.xlu0 %v2909_v23, %s3856_s23 }
0x17ca   :  { %2918 = vrot.lane.b32.xlu0 %v2912_v22, %s3856_s23 }
0x1817   :  { %v2927_v53 = vpop.permute.xlu2 %2926 }
0x1818   :  { %v2931_v46 = vsel %vm275_vm12, %v2927_v53, 1.0 }
0x1819   :  { %3480 = vmatpush.xpose.msk.msra.mxu3 %vm286_vm13, %v2931_v46 }
0x1824   :  { %v2332_v45 = vpop.permute.xlu0 %2331 }
0x1825   :  { %v2337_v24 = vmul.f32 %v2332_v45, %v4901_v17  ;;  %v2638_v17 = vpop.f32.mrf.mxu3 }
0x1826   :  { %v2644_v10 = vmax.f32 %v2638_v17, 0.0 }
0x1827   :  { %v2925_v19 = vpop.permute.xlu1 %2924  ;;  %2669 = vrot.lane.b32.xlu2 %v2337_v24, %s3858_s16 }
0x1828   :  { %v2930_v29 = vsel %vm275_vm12, %v2925_v19, 1.0  ;;  %v4967_v19 = vld [vmem:[%s5335_s0 + $0xa8] ss:$0 sm:$0xff] }
0x1829   :  { %3481 = vmatpush.xpose.msk.msra.mxu3 %vm286_vm13, %v2930_v29 }
0x182c   :  { %v2334_v0 = vpop.permute.xlu0 %2333 }
0x182d   :  { %v2338_v34 = vmul.f32 %v2334_v0, %v2301_v49  ;;  %v2641_v63 = vpop.f32.mrf.mxu3 }
0x182e   :  { %v2645_v7 = vmax.f32 %v2641_v63, 0.0 }
0x182f   :  { %2671 = vrot.lane.b32.xlu0 %v2338_v34, %s3858_s16 }
0x1834   :  { %v2917_v3 = vpop.permute.xlu0 %2916 }
0x1835   :  { %v2922_v30 = vsel %vm275_vm12, 1.0, %v2917_v3 }
0x1836   :  { %3482 = vmatmul.msk.f32.vlgmr.msra.gmra.mxu3 %vm286_vm13, %v2922_v30 }
0x183c   :  { %v2919_v44 = vpop.permute.xlu0 %2918 }
0x183d   :  { %v2923_v57 = vsel %vm275_vm12, 1.0, %v2919_v44 }
0x183e   :  { %3483 = vmatmul.msk.f32.gmra.mxu3 %vm286_vm13, %v2923_v57  ;;  %3484 = vmatpush.xpose.msk.msrb.mxu0 %vm286_vm13, %v2923_v57 }
0x1842   :  { %3485 = vmatpush.xpose.msk.msrb.mxu0 %vm286_vm13, %v2922_v30 }
0x1881   :  { %v2670_v61 = vpop.permute.xlu2 %2669 }
0x1882   :  { %v2675_v49 = vsel %vm468_vm6, %v2644_v10, %v2670_v61 }
0x1883   :  { %3470 = vmatmul.msk.f32.vlgmr.msra.gmra.mxu0 %vm471_vm8, %v2675_v49 }
0x18a1   :  { %v2672_v8 = vpop.permute.xlu0 %2671 }
0x18a2   :  { %v2676_v41 = vsel %vm468_vm6, %v2645_v7, %v2672_v8 }
0x18a3   :  { %3471 = vmatmul.msk.f32.gmra.mxu0 %vm471_vm8, %v2676_v41 }
0x18ab   :  { %3486 = vmatmul.msk.f32.vlgmr.msrb.gmra.mxu0 %vm286_vm13, %v2930_v29 }
0x18b3   :  { %3487 = vmatmul.msk.f32.gmra.mxu0 %vm286_vm13, %v2931_v46 }
0x18b9   :  { %v2961_v16 = vpop.f32.mrf.mxu3 }
0x18ba   :  { %vm2990_vm11 = vcmp.ge.f32.partialorder %v2961_v16, 0.0  ;;  %v2992_v50 = vmul.f32 0.2, %v2961_v16 }
0x18bc   :  { %v2994_v40 = vsel %vm2990_vm11, %v2961_v16, %v2992_v50 }
0x18bd   :  { %v2996_v32 = vmul.f32 1.442695, %v2994_v40 }
0x18bf   :  { %3755 = vpow2.f32 %v2996_v32 }
0x18c1   :  { %v2964_v55 = vpop.f32.mrf.mxu3 }
0x18c2   :  { %vm2991_vm12 = vcmp.ge.f32.partialorder %v2964_v55, 0.0  ;;  %v2993_v1 = vmul.f32 0.2, %v2964_v55 }
0x18c4   :  { %v2995_v14 = vsel %vm2991_vm12, %v2964_v55, %v2993_v1 }
0x18c5   :  { %v3756_v23 = vpop.eup %3755  ;;  %v2998_v18 = vmul.f32 1.442695, %v2995_v14 }
0x18c6   :  { %v4955_v25 = vmul.f32 %v4864_v28, %v3756_v23 }
0x18c7   :  { %3757 = vpow2.f32 %v2998_v18 }
0x18c8   :  { %v3018_v22 = vsel %vm373_vm7, %v4955_v25, 0.0 }
0x18c9   :  { %3019 = vadd.xlane.f32.xlu1 %v3018_v22 }
0x18cd   :  { %v3758_v53 = vpop.eup %3757 }
0x18ce   :  { %v4960_v46 = vmul.f32 %v4883_v2, %v3758_v53 }
0x18d0   :  { %v3021_v45 = vsel %vm377_vm9, %v4960_v46, 0.0 }
0x18d1   :  { %3022 = vadd.xlane.f32.xlu2 %v3021_v45 }
0x1900   :  { %v2700_v24 = vpop.f32.mrf.mxu0 }
0x1901   :  { %v2701_v28 = vadd.f32 %v4967_v19, %v2700_v24 }
0x1903   :  { %3759 = vtanh.f32 %v2701_v28  ;;  %v3472_v55 = vmul.f32 -1.442695, %v2701_v28 }
0x1909   :  { %v3760_v29 = vpop.eup %3759 }
0x190a   :  { %2750 = vrot.lane.b32.xlu0 %v3760_v29, %s3854_s11 }
0x1920   :  { %v2703_v0 = vpop.f32.mrf.mxu0 }
0x1921   :  { %v2704_v2 = vadd.f32 %v4967_v19, %v2703_v0 }
0x1923   :  { %3761 = vtanh.f32 %v2704_v2 }
0x1929   :  { %v3762_v34 = vpop.eup %3761 }
0x192a   :  { %2752 = vrot.lane.b32.xlu0 %v3762_v34, %s3854_s11 }
0x193c   :  { %v3020_v3 = vpop.xlane.xlu1 %3019 }
0x193d   :  { %3763 = vrcp.f32 %v3020_v3  ;;  %v3035_v10 = vand.u32 2147483648, %v3020_v3  ;;  %v3033_v49 = vand.u32 2147483647, %v3020_v3  ;;  %vm3029_vm9 = vweird.f32 %v3020_v3 }
0x193f   :  { %v3036_v8 = vor.u32 1.1754944e-38, %v3035_v10  ;;  %vm3034_vm1 = vcmp.eq.f32.partialorder %v3033_v49, 8.507059e+37 }
0x1943   :  { %v3764_v30 = vpop.eup %3763 }
0x1944   :  { %v3025_v44 = vmul.f32 %v3764_v30, %v3020_v3  ;;  %v3023_v57 = vpop.xlane.xlu2 %3022  ;;  %vm3030_vm13 = vweird.f32 %v3764_v30 }
0x1945   :  { %3765 = vrcp.f32 %v3023_v57  ;;  %vm3031_vm0 = vmor %vm3029_vm9, %vm3030_vm13  ;;  %v3050_v1 = vand.u32 2147483648, %v3023_v57  ;;  %v3048_v23 = vand.u32 2147483647, %v3023_v57  ;;  %vm3044_vm3 = vweird.f32 %v3023_v57 }
0x1946   :  { %v3026_v17 = vsub.f32 1.0, %v3025_v44  ;;  %3767 = vpow2.f32 %v3472_v55 }
0x1947   :  { %v3051_v22 = vor.u32 1.1754944e-38, %v3050_v1  ;;  %vm3049_vm5 = vcmp.eq.f32.partialorder %v3048_v23, 8.507059e+37 }
0x1948   :  { %v3027_v61 = vmul.f32 %v3764_v30, %v3026_v17 }
0x194a   :  { %v3028_v63 = vadd.f32 %v3764_v30, %v3027_v61 }
0x194b   :  { %v3766_v7 = vpop.eup %3765 }
0x194c   :  { %v3032_v41 = vsel %vm3031_vm0, %v3764_v30, %v3028_v63  ;;  %v3040_v16 = vmul.f32 %v3766_v7, %v3023_v57  ;;  %vm3045_vm2 = vweird.f32 %v3766_v7  ;;  %v3768_v28 = vpop.eup %3767  ;;  %v3473_v30 = vmul.f32 -1.442695, %v2704_v2 }
0x194d   :  { %v3037_v50 = vsel %vm3034_vm1, %v3036_v8, %v3032_v41  ;;  %vm3046_vm4 = vmor %vm3044_vm3, %vm3045_vm2  ;;  %v2712_v29 = vadd.f32 1.0, %v3768_v28 }
0x194e   :  { %v3041_v40 = vsub.f32 1.0, %v3040_v16  ;;  %v4974_v32 = vmul.f32 %v3037_v50, %v4955_v25 }
0x194f   :  { %3769 = vrcp.f32 %v2712_v29  ;;  %v2725_v17 = vand.u32 2147483648, %v2712_v29  ;;  %vm2719_vm15 = vweird.f32 %v2712_v29  ;;  %v2723_v10 = vand.u32 2147483647, %v2712_v29 }
0x1950   :  { %v3042_v14 = vmul.f32 %v3766_v7, %v3041_v40  ;;  %3489 = vmatmul.msk.f32.vlgmr.msra.gmra.mxu1 %vm373_vm7, %v4974_v32  ;;  %3771 = vpow2.f32 %v3473_v30 }
0x1951   :  { %v2726_v63 = vor.u32 1.1754944e-38, %v2725_v17  ;;  %vm2724_vm12 = vcmp.eq.f32.partialorder %v2723_v10, 8.507059e+37 }
0x1952   :  { %v3043_v18 = vadd.f32 %v3766_v7, %v3042_v14 }
0x1954   :  { %v3047_v53 = vsel %vm3046_vm4, %v3766_v7, %v3043_v18 }
0x1955   :  { %v3052_v45 = vsel %vm3049_vm5, %v3051_v22, %v3047_v53  ;;  %v3770_v0 = vpop.eup %3769 }
0x1956   :  { %v4979_v24 = vmul.f32 %v3052_v45, %v4960_v46  ;;  %v2715_v34 = vmul.f32 %v3770_v0, %v2712_v29  ;;  %vm2720_vm14 = vweird.f32 %v3770_v0  ;;  %v3772_v61 = vpop.eup %3771 }
0x1957   :  { %vm2721_vm11 = vmor %vm2719_vm15, %vm2720_vm14  ;;  %v2713_v7 = vadd.f32 1.0, %v3772_v61 }
0x1958   :  { %3490 = vmatmul.msk.f32.gmra.mxu1 %vm373_vm7, %v4979_v24  ;;  %v2716_v3 = vsub.f32 1.0, %v2715_v34 }
0x1959   :  { %3773 = vrcp.f32 %v2713_v7  ;;  %v2740_v14 = vand.u32 2147483648, %v2713_v7  ;;  %vm2734_vm9 = vweird.f32 %v2713_v7  ;;  %v2738_v23 = vand.u32 2147483647, %v2713_v7 }
0x195a   :  { %v2717_v44 = vmul.f32 %v3770_v0, %v2716_v3 }
0x195b   :  { %v2741_v22 = vor.u32 1.1754944e-38, %v2740_v14  ;;  %vm2739_vm1 = vcmp.eq.f32.partialorder %v2738_v23, 8.507059e+37 }
0x195c   :  { %v2718_v57 = vadd.f32 %v3770_v0, %v2717_v44 }
0x195e   :  { %v2722_v49 = vsel %vm2721_vm11, %v3770_v0, %v2718_v57  ;;  %vm357_vm11 = vcmp.ge.f32.partialorder %v4017_v42, 0.0 }
0x195f   :  { %v2727_v8 = vsel %vm2724_vm12, %v2726_v63, %v2722_v49  ;;  %v3774_v2 = vpop.eup %3773  ;;  %vm1238_vm12 = vcmp.ge.f32.partialorder %v4390_v20, 0.0 }
0x1960   :  { %v2730_v50 = vmul.f32 %v3774_v2, %v2713_v7  ;;  %vm2735_vm13 = vweird.f32 %v3774_v2  ;;  %v2746_v29 = vmul.f32 %v2727_v8, %v4919_v58 }
0x1961   :  { %vm2736_vm0 = vmor %vm2734_vm9, %vm2735_vm13  ;;  %vm1680_vm13 = vcmp.ge.f32.partialorder %v4588_v51, 0.0  ;;  %vm2561_vm9 = vcmp.ge.f32.partialorder %v4913_v47, 0.0 }
0x1962   :  { %v2731_v40 = vsub.f32 1.0, %v2730_v50 }
0x1964   :  { %v2732_v55 = vmul.f32 %v3774_v2, %v2731_v40 }
0x1966   :  { %v2733_v1 = vadd.f32 %v3774_v2, %v2732_v55 }
0x1968   :  { %v2737_v18 = vsel %vm2736_vm0, %v3774_v2, %v2733_v1  ;;  %vm358_vm0 = vcmp.ge.f32.partialorder %v4019_v43, 0.0 }
0x1969   :  { %v2742_v45 = vsel %vm2739_vm1, %v2741_v22, %v2737_v18 }
0x196a   :  { %v2747_v30 = vmul.f32 %v2742_v45, %v4923_v59 }
0x197c   :  { %v2751_v41 = vpop.permute.xlu0 %2750 }
0x197d   :  { %v2756_v16 = vmul.f32 %v2751_v41, %v2727_v8 }
0x197f   :  { %2760 = vrot.lane.b32.xlu0 %v2756_v16, %s3854_s11 }
0x199c   :  { %v2753_v53 = vpop.permute.xlu0 %2752 }
0x199d   :  { %v2757_v28 = vmul.f32 %v2753_v53, %v2742_v45 }
0x199f   :  { %2762 = vrot.lane.b32.xlu0 %v2757_v28, %s3854_s11 }
0x19cd   :  { %v3079_v63 = vpop.f32.mrf.mxu1 }
0x19ce   :  { %v3085_v7 = vmax.f32 %v3079_v63, 0.0 }
0x19d5   :  { %v3082_v16 = vpop.f32.mrf.mxu1 }
0x19d6   :  { %v3086_v2 = vmax.f32 %v3082_v16, 0.0 }
0x19f1   :  { %v2761_v0 = vpop.permute.xlu0 %2760 }
0x19f2   :  { %v4986_v34 = vadd.f32 %v2761_v0, %v2746_v29 }
0x19f4   :  { %3775 = vtanh.f32 %v4986_v34 }
0x19fa   :  { %v3776_v3 = vpop.eup %3775 }
0x19fb   :  { %2772 = vrot.lane.b32.xlu0 %v3776_v3, %s3854_s11 }
0x1a11   :  { %v2763_v44 = vpop.permute.xlu0 %2762 }
0x1a12   :  { %v4991_v57 = vadd.f32 %v2763_v44, %v2747_v30 }
0x1a14   :  { %3777 = vtanh.f32 %v4991_v57 }
0x1a1a   :  { %v3778_v17 = vpop.eup %3777 }
0x1a1b   :  { %2774 = vrot.lane.b32.xlu1 %v3778_v17, %s3854_s11 }
0x1a6d   :  { %v2773_v10 = vpop.permute.xlu0 %2772 }
0x1a6e   :  { %v2778_v58 = vmul.f32 %v2773_v10, %v2727_v8 }
0x1a70   :  { %3110 = vrot.lane.b32.xlu2 %v2778_v58, %s3858_s16 }
0x1a8d   :  { %v2775_v61 = vpop.permute.xlu1 %2774 }
0x1a8e   :  { %v2779_v49 = vmul.f32 %v2775_v61, %v2742_v45 }
0x1a90   :  { %3112 = vrot.lane.b32.xlu0 %v2779_v49, %s3858_s16 }
0x1aca   :  { %v3111_v41 = vpop.permute.xlu2 %3110 }
0x1acb   :  { %v3116_v59 = vsel %vm468_vm6, %v3085_v7, %v3111_v41 }
0x1acc   :  { %3493 = vmatmul.msk.f32.vlgmr.msra.gmra.mxu2 %vm471_vm8, %v3116_v59 }
0x1b02   :  { %v3113_v50 = vpop.permute.xlu0 %3112 }
0x1b03   :  { %v3117_v40 = vsel %vm468_vm6, %v3086_v2, %v3113_v50 }
0x1b04   :  { %3494 = vmatmul.msk.f32.gmra.mxu2 %vm471_vm8, %v3117_v40 }
0x1b4f   :  { %v3141_v8 = vpop.f32.mrf.mxu2 }
0x1b50   :  { %v3142_v55 = vadd.f32 %v4967_v19, %v3141_v8 }
0x1b52   :  { %3779 = vtanh.f32 %v3142_v55  ;;  %v3495_v22 = vmul.f32 -1.442695, %v3142_v55 }
0x1b58   :  { %v3780_v1 = vpop.eup %3779 }
0x1b59   :  { %3191 = vrot.lane.b32.xlu0 %v3780_v1, %s3854_s11 }
0x1b87   :  { %v3144_v14 = vpop.f32.mrf.mxu2 }
0x1b88   :  { %v3145_v23 = vadd.f32 %v4967_v19, %v3144_v14 }
0x1b8a   :  { %3781 = vtanh.f32 %v3145_v23  ;;  %v3496_v63 = vmul.f32 -1.442695, %v3145_v23 }
0x1b8b   :  { %3783 = vpow2.f32 %v3495_v22 }
0x1b90   :  { %v3782_v18 = vpop.eup %3781 }
0x1b91   :  { %3193 = vrot.lane.b32.xlu0 %v3782_v18, %s3854_s11  ;;  %v3784_v53 = vpop.eup %3783 }
0x1b92   :  { %v3153_v45 = vadd.f32 1.0, %v3784_v53 }
0x1b94   :  { %3785 = vrcp.f32 %v3153_v45  ;;  %v3166_v44 = vand.u32 2147483648, %v3153_v45  ;;  %vm3160_vm8 = vweird.f32 %v3153_v45  ;;  %v3164_v17 = vand.u32 2147483647, %v3153_v45 }
0x1b95   :  { %3787 = vpow2.f32 %v3496_v63 }
0x1b96   :  { %v3167_v10 = vor.u32 1.1754944e-38, %v3166_v44  ;;  %vm3165_vm3 = vcmp.eq.f32.partialorder %v3164_v17, 8.507059e+37 }
0x1b9a   :  { %v3786_v28 = vpop.eup %3785 }
0x1b9b   :  { %v3156_v29 = vmul.f32 %v3786_v28, %v3153_v45  ;;  %vm3161_vm6 = vweird.f32 %v3786_v28  ;;  %v3788_v7 = vpop.eup %3787 }
0x1b9c   :  { %vm3162_vm2 = vmor %vm3160_vm8, %vm3161_vm6  ;;  %v3154_v41 = vadd.f32 1.0, %v3788_v7  ;;  %v1682_v7 = vmul.f32 0.2, %v4588_v51  ;;  %vm797_vm6 = vcmp.ge.f32.partialorder %v4154_v4, 0.0  ;;  %vm1239_vm8 = vcmp.ge.f32.partialorder %v4392_v39, 0.0 }
0x1b9d   :  { %v3157_v0 = vsub.f32 1.0, %v3156_v29 }
0x1b9e   :  { %3789 = vrcp.f32 %v3154_v41  ;;  %v3181_v8 = vand.u32 2147483648, %v3154_v41  ;;  %vm3175_vm5 = vweird.f32 %v3154_v41  ;;  %v3179_v55 = vand.u32 2147483647, %v3154_v41 }
0x1b9f   :  { %v3158_v3 = vmul.f32 %v3786_v28, %v3157_v0  ;;  %v359_v0 = vmul.f32 0.2, %v4017_v42 }
0x1ba0   :  { %v3182_v14 = vor.u32 1.1754944e-38, %v3181_v8  ;;  %vm3180_vm15 = vcmp.eq.f32.partialorder %v3179_v55, 8.507059e+37 }
0x1ba1   :  { %v3159_v30 = vadd.f32 %v3786_v28, %v3158_v3  ;;  %v361_v3 = vsel %vm357_vm11, %v4017_v42, %v359_v0  ;;  %vm461_vm11 = vcmask 162816  }
0x1ba3   :  { %v3163_v19 = vsel %vm3162_vm2, %v3786_v28, %v3159_v30  ;;  %v363_v30 = vmul.f32 1.442695, %v361_v3  ;;  %v799_v3 = vmul.f32 0.2, %v4154_v4  ;;  %vm2120_vm2 = vcmp.ge.f32.partialorder %v4753_v12, 0.0 }
0x1ba4   :  { %v5005_v61 = vsel %vm3165_vm3, %v3167_v10, %v3163_v19  ;;  %v3790_v59 = vpop.eup %3789  ;;  %vm2562_vm3 = vcmp.ge.f32.partialorder %v4917_v13, 0.0 }
0x1ba5   :  { %v3171_v16 = vmul.f32 %v3790_v59, %v3154_v41  ;;  %vm3176_vm4 = vweird.f32 %v3790_v59  ;;  %v3187_v53 = vmul.f32 %v5005_v61, %v4986_v34  ;;  %v1240_v34 = vmul.f32 0.2, %v4390_v20 }
0x1ba6   :  { %vm3177_vm14 = vmor %vm3175_vm5, %vm3176_vm4  ;;  %vm798_vm4 = vcmp.ge.f32.partialorder %v4156_v5, 0.0  ;;  %vm1679_vm5 = vcmp.ge.f32.partialorder %v4586_v62, 0.0 }
0x1ba7   :  { %v3172_v2 = vsub.f32 1.0, %v3171_v16  ;;  %v1242_v42 = vsel %vm1238_vm12, %v4390_v20, %v1240_v34  ;;  %v1684_v16 = vsel %vm1680_vm13, %v4588_v51, %v1682_v7  ;;  %v360_v51 = vmul.f32 0.2, %v4019_v43 }
0x1ba8   :  { %v1244_v63 = vmul.f32 1.442695, %v1242_v42  ;;  %v1687_v20 = vmul.f32 1.442695, %v1684_v16  ;;  %vm464_vm12 = vcmask 244736   ;;  %vm3243_vm13 = vcmask 523264  }
0x1ba9   :  { %v3173_v50 = vmul.f32 %v3790_v59, %v3172_v2 }
0x1bab   :  { %v3174_v40 = vadd.f32 %v3790_v59, %v3173_v50  ;;  %v2563_v50 = vmul.f32 0.2, %v4913_v47 }
0x1bad   :  { %v3178_v1 = vsel %vm3177_vm14, %v3790_v59, %v3174_v40  ;;  %v5034_v59 = vpop.f32.mrf.mxu0  ;;  %v2565_v8 = vsel %vm2561_vm9, %v4913_v47, %v2563_v50  ;;  %v5051_v47 = vld [vmem:[%s5335_s0 + $0x1c0] sm:$0x3]  ;;  %vm466_vm9 = vcmask 238592  }
0x1bae   :  { %v5009_v18 = vsel %vm3180_vm15, %v3182_v14, %v3178_v1  ;;  %v2567_v14 = vmul.f32 1.442695, %v2565_v8  ;;  %vm3002_vm15 = vcmp.ge.f32.partialorder %v5034_v59, 0.0 }
0x1baf   :  { %v3188_v44 = vmul.f32 %v5009_v18, %v4991_v57 }
0x1bb5   :  { %v2987_v1 = vpop.f32.mrf.mxu0 }
0x1bb6   :  { %vm3003_vm1 = vcmp.ge.f32.partialorder %v2987_v1, 0.0 }
0x1bcb   :  { %v3192_v58 = vpop.permute.xlu0 %3191 }
0x1bcc   :  { %v3197_v49 = vmul.f32 %v3192_v58, %v5005_v61  ;;  %v5026_v58 = vld [vmem:[%s5335_s0 + $0x1b8] sm:$0xff] }
0x1bce   :  { %3201 = vrot.lane.b32.xlu2 %v3197_v49, %s3854_s11 }
0x1c03   :  { %v3194_v23 = vpop.permute.xlu0 %3193 }
0x1c04   :  { %v3198_v22 = vmul.f32 %v3194_v23, %v5009_v18  ;;  %v3005_v23 = vmul.f32 0.2, %v2987_v1 }
0x1c06   :  { %3203 = vrot.lane.b32.xlu1 %v3198_v22, %s3854_s11 }
0x1c28   :  { %v3202_v45 = vpop.permute.xlu2 %3201 }
0x1c29   :  { %v3207_v28 = vadd.f32 %v3202_v45, %v3187_v53  ;;  %v362_v45 = vsel %vm358_vm0, %v4019_v43, %v360_v51 }
0x1c2a   :  { %v365_v0 = vmul.f32 1.442695, %v362_v45 }
0x1c2b   :  { %3791 = vtanh.f32 %v3207_v28  ;;  %v3007_v28 = vsel %vm3003_vm1, %v2987_v1, %v3005_v23 }
0x1c2c   :  { %3793 = vpow2.f32 %v363_v30  ;;  %v3010_v30 = vmul.f32 1.442695, %v3007_v28 }
0x1c31   :  { %v3792_v29 = vpop.eup %3791 }
0x1c32   :  { %3213 = vrot.lane.b32.xlu0 %v3792_v29, %s3854_s11  ;;  %v3794_v10 = vpop.eup %3793 }
0x1c33   :  { %v367_v57 = vmul.f32 %v3794_v10, %v5026_v58  ;;  %v1241_v10 = vmul.f32 0.2, %v4392_v39 }
0x1c35   :  { %v369_v41 = vadd.f32 %v367_v57, %v4037_v35 }
0x1c37   :  { %v371_v2 = vmul.f32 0.5, %v369_v41  ;;  %v1243_v41 = vsel %vm1239_vm8, %v4392_v39, %v1241_v10  ;;  %v800_v10 = vmul.f32 0.2, %v4156_v5 }
0x1c78   :  { %v3204_v17 = vpop.permute.xlu1 %3203 }
0x1c79   :  { %v3208_v19 = vadd.f32 %v3204_v17, %v3188_v44  ;;  %v801_v17 = vsel %vm797_vm6, %v4154_v4, %v799_v3 }
0x1c7a   :  { %v803_v42 = vmul.f32 1.442695, %v801_v17 }
0x1c7b   :  { %3795 = vtanh.f32 %v3208_v19 }
0x1c7c   :  { %3797 = vpow2.f32 %v1244_v63 }
0x1c7d   :  { %3799 = vpow2.f32 %v1687_v20 }
0x1c7e   :  { %3801 = vpow2.f32 %v2567_v14 }
0x1c7f   :  { %3803 = vpow2.f32 %v365_v0 }
0x1c80   :  { %3805 = vpow2.f32 %v3010_v30 }
0x1c81   :  { %v3796_v49 = vpop.eup %3795  ;;  %3807 = vpow2.f32 %v803_v42  ;;  %v1681_v42 = vmul.f32 0.2, %v4586_v62 }
0x1c82   :  { %3215 = vrot.lane.b32.xlu2 %v3796_v49, %s3854_s11  ;;  %v3798_v40 = vpop.eup %3797  ;;  %s3860_s11 = smov 20  }
0x1c83   :  { %v1248_v55 = vmul.f32 %v3798_v40, %v5026_v58  ;;  %v3800_v53 = vpop.eup %3799  ;;  %v2122_v40 = vmul.f32 0.2, %v4753_v12 }
0x1c84   :  { %v1690_v29 = vmul.f32 %v3800_v53, %v5051_v47  ;;  %v3802_v44 = vpop.eup %3801 }
0x1c85   :  { %v1250_v22 = vadd.f32 %v1248_v55, %v4352_v9  ;;  %v2571_v34 = vmul.f32 %v3802_v44, %v5026_v58  ;;  %v3804_v49 = vpop.eup %3803  ;;  %v2124_v55 = vsel %vm2120_vm2, %v4753_v12, %v2122_v40 }
0x1c86   :  { %v1692_v43 = vadd.f32 %v1690_v29, %v4554_v38  ;;  %v3806_v7 = vpop.eup %3805  ;;  %v368_v16 = vmul.f32 %v3804_v49, %v5051_v47  ;;  %v2126_v14 = vmul.f32 1.442695, %v2124_v55 }
0x1c87   :  { %v2573_v63 = vadd.f32 %v2571_v34, %v4867_v54  ;;  %v3013_v50 = vmul.f32 %v3806_v7, %v5051_v47  ;;  %v3808_v39 = vpop.eup %3807 }
0x1c88   :  { %v1694_v19 = vmul.f32 0.5, %v1692_v43  ;;  %v370_v8 = vadd.f32 %v368_v16, %v4059_v52  ;;  %v807_v51 = vmul.f32 %v3808_v39, %v5026_v58 }
0x1c89   :  { %v2575_v20 = vmul.f32 0.5, %v2573_v63 }
0x1c8a   :  { %447 = vrot.lane.b32.xlu2 %v371_v2, %s3859_s4  ;;  %v1246_v2 = vmul.f32 1.442695, %v1243_v41  ;;  %v372_v1 = vmul.f32 0.5, %v370_v8  ;;  %v809_v53 = vadd.f32 %v807_v51, %v4173_v6  ;;  %v3239_v51 = vld [vmem:[%s5335_s0 + $0x108] sm:$0xff] }
0x1c8c   :  { %3809 = vpow2.f32 %v1246_v2  ;;  %v811_v12 = vmul.f32 0.5, %v809_v53 }
0x1c8d   :  { %3811 = vpow2.f32 %v2126_v14  ;;  %v3238_v14 = vld [vmem:[%s5335_s0 + $0x100] sm:$0xff] }
0x1c92   :  { %455 = vrot.lane.b32.xlu2 %v4097_v31, %s3860_s11  ;;  %v1252_v31 = vmul.f32 0.5, %v1250_v22  ;;  %v2564_v22 = vmul.f32 0.2, %v4917_v13  ;;  %v3810_v45 = vpop.eup %3809 }
0x1c93   :  { %v3812_v3 = vpop.eup %3811 }
0x1c94   :  { %v2566_v28 = vsel %vm2562_vm3, %v4917_v13, %v2564_v22  ;;  %v2130_v43 = vmul.f32 %v3812_v3, %v5026_v58  ;;  %v5363_v22 = vld [vmem:[#allocation6_spill] sm:$0xff]  ;;  %v5364_v3 = vld [vmem:[#allocation8_spill] sm:$0xff] }
0x1c95   :  { %v2569_v29 = vmul.f32 1.442695, %v2566_v28 }
0x1c96   :  { %v2132_v13 = vadd.f32 %v2130_v43, %v4705_v48 }
0x1c97   :  { %3813 = vpow2.f32 %v2569_v29  ;;  %v3235_v29 = vld [vmem:[%s5335_s0 + $0xe8] sm:$0xff] }
0x1c98   :  { %v2134_v17 = vmul.f32 0.5, %v2132_v13  ;;  %v3233_v13 = vld [vmem:[%s5335_s0 + $0xd8] sm:$0xff] }
0x1c9a   :  { %1325 = vrot.lane.b32.xlu2 %v1252_v31, %s3859_s4  ;;  %v1249_v31 = vmul.f32 %v3810_v45, %v5051_v47  ;;  %v3236_v45 = vld [vmem:[%s5335_s0 + $0xf0] sm:$0xff] }
0x1c9c   :  { %v1251_v0 = vadd.f32 %v1249_v31, %v4368_v26 }
0x1c9d   :  { %v3814_v44 = vpop.eup %3813 }
0x1c9e   :  { %v1253_v30 = vmul.f32 0.5, %v1251_v0  ;;  %v3234_v0 = vld [vmem:[%s5335_s0 + $0xe0] sm:$0xff] }
0x1ca2   :  { %1768 = vrot.lane.b32.xlu2 %v1694_v19, %s3859_s4  ;;  %v2572_v19 = vmul.f32 %v3814_v44, %v5051_v47 }
0x1ca4   :  { %v3214_v57 = vpop.permute.xlu0 %3213  ;;  %v2574_v34 = vadd.f32 %v2572_v19, %v4886_v60 }
0x1ca5   :  { %v3219_v4 = vmul.f32 %v3214_v57, %v5005_v61  ;;  %v3015_v61 = vadd.f32 %v3013_v50, %v4960_v46  ;;  %v1683_v57 = vsel %vm1679_vm5, %v4586_v62, %v1681_v42  ;;  %v5360_v62 = vld [vmem:[#allocation3_spill] sm:$0xff]  ;;  %v5362_v50 = vld [vmem:[#allocation4_spill] sm:$0xff] }
0x1ca7   :  { %3225 = vrot.lane.b32.xlu1 %v3219_v4, %s3861_s7  ;;  %v3017_v23 = vmul.f32 0.5, %v3015_v61 }
0x1caa   :  { %2648 = vrot.lane.b32.xlu2 %v2575_v20, %s3859_s4  ;;  %v3004_v20 = vmul.f32 0.2, %v5034_v59 }
0x1cac   :  { %v3006_v61 = vsel %vm3002_vm15, %v5034_v59, %v3004_v20  ;;  %v3237_v59 = vld [vmem:[%s5335_s0 + $0xf8] sm:$0xff] }
0x1caf   :  { %449 = vrot.lane.b32.xlu1 %v372_v1, %s3859_s4 }
0x1cb2   :  { %3091 = vrot.lane.b32.xlu2 %v3017_v23, %s3859_s4  ;;  %v3008_v23 = vmul.f32 1.442695, %v3006_v61 }
0x1cb7   :  { %884 = vrot.lane.b32.xlu1 %v811_v12, %s3859_s4 }
0x1cba   :  { %1331 = vrot.lane.b32.xlu2 %v4373_v11, %s3860_s11  ;;  %v2576_v11 = vmul.f32 0.5, %v2574_v34 }
0x1cbf   :  { %1327 = vrot.lane.b32.xlu1 %v1253_v30, %s3859_s4 }
0x1cc2   :  { %1774 = vrot.lane.b32.xlu2 %v4582_v21, %s3860_s11  ;;  %v802_v21 = vsel %vm798_vm4, %v4156_v5, %v800_v10  ;;  %v1685_v5 = vmul.f32 1.442695, %v1683_v57 }
0x1cc3   :  { %v805_v49 = vmul.f32 1.442695, %v802_v21  ;;  %v5365_v21 = vld [vmem:[#allocation5_spill] sm:$0xff] }
0x1cc5   :  { %3815 = vpow2.f32 %v805_v49 }
0x1cc6   :  { %3817 = vpow2.f32 %v1685_v5 }
0x1cc7   :  { %2207 = vrot.lane.b32.xlu1 %v2134_v17, %s3859_s4 }
0x1cca   :  { %2654 = vrot.lane.b32.xlu2 %v4891_v36, %s3860_s11 }
0x1ccf   :  { %2650 = vrot.lane.b32.xlu1 %v2576_v11, %s3859_s4 }
0x1cd2   :  { %3097 = vrot.lane.b32.xlu2 %v4979_v24, %s3860_s11  ;;  %v5359_v24 = vld [vmem:[#allocation11_spill] sm:$0xff] }
0x1cd3   :  { %v2123_v7 = vmul.f32 0.2, %v5359_v24  ;;  %vm2121_vm14 = vcmp.ge.f32.partialorder %v5359_v24, 0.0 }
0x1cd5   :  { %v2125_v4 = vsel %vm2121_vm14, %v5359_v24, %v2123_v7  ;;  %v5367_v7 = vld [vmem:[#allocation10_spill] sm:$0xff] }
0x1cd6   :  { %v2128_v2 = vmul.f32 1.442695, %v2125_v4 }
0x1cd7   :  { %890 = vrot.lane.b32.xlu1 %v4195_v37, %s3860_s11  ;;  %v3816_v37 = vpop.eup %3815 }
0x1cd8   :  { %v808_v16 = vmul.f32 %v3816_v37, %v5051_v47  ;;  %v3818_v8 = vpop.eup %3817  ;;  %3819 = vpow2.f32 %v2128_v2 }
0x1cd9   :  { %v1689_v1 = vmul.f32 %v3818_v8, %v5026_v58  ;;  %3821 = vpow2.f32 %v3008_v23 }
0x1cda   :  { %v810_v40 = vadd.f32 %v808_v16, %v5362_v50 }
0x1cdb   :  { %v1691_v53 = vadd.f32 %v1689_v1, %v5363_v22 }
0x1cdc   :  { %v3216_v36 = vpop.permute.xlu2 %3215  ;;  %v812_v55 = vmul.f32 0.5, %v810_v40 }
0x1cdd   :  { %v3220_v63 = vmul.f32 %v3216_v36, %v5009_v18  ;;  %v5361_v18 = vld [vmem:[#allocation9_spill] sm:$0xff]  ;;  %v1693_v12 = vmul.f32 0.5, %v1691_v53  ;;  %v5366_v36 = vld [vmem:[#allocation7_spill] sm:$0xff] }
0x1cde   :  { %v3820_v28 = vpop.eup %3819 }
0x1cdf   :  { %3227 = vrot.lane.b32.xlu0 %v3220_v63, %s3861_s7  ;;  %1333 = vrot.lane.b32.xlu1 %v4386_v15, %s3860_s11  ;;  %v3240_v15 = vld [vmem:[%s5335_s0 + $0x110] sm:$0xff]  ;;  %v2131_v31 = vmul.f32 %v3820_v28, %v5051_v47  ;;  %v3822_v43 = vpop.eup %3821 }
0x1ce0   :  { %3258 = vmatpush.msrb.mxu3 %v3240_v15  ;;  %v3012_v17 = vmul.f32 %v3822_v43, %v5026_v58  ;;  %v3289_v28 = vld [vmem:[%s5335_s0 + $0x190] sm:$0xff]  ;;  %v3283_v43 = vld [vmem:[%s5335_s0 + $0x160] sm:$0xff] }
0x1ce1   :  { %v2133_v30 = vadd.f32 %v2131_v31, %v5364_v3  ;;  %v3286_v31 = vld [vmem:[%s5335_s0 + $0x178] sm:$0xff] }
0x1ce2   :  { %3259 = vmatpush.msrb.mxu3 %v3239_v51  ;;  %v3014_v19 = vadd.f32 %v3012_v17, %v4955_v25 }
0x1ce3   :  { %v2135_v44 = vmul.f32 0.5, %v2133_v30 }
0x1ce4   :  { %v5114_v41 = vpop.permute.xlu2 %447  ;;  %3260 = vmatpush.msrb.mxu3 %v3238_v14  ;;  %v3016_v11 = vmul.f32 0.5, %v3014_v19  ;;  %v3279_v19 = vld [vmem:[%s5335_s0 + $0x140] sm:$0xff] }
0x1ce6   :  { %3261 = vmatpush.msrb.mxu3 %v3237_v59 }
0x1ce7   :  { %453 = vrot.lane.b32.xlu0 %v5360_v62, %s3860_s11  ;;  %2213 = vrot.lane.b32.xlu1 %v5361_v18, %s3860_s11 }
0x1ce8   :  { %3262 = vmatpush.msrb.mxu3 %v3236_v45  ;;  %v3290_v45 = vld [vmem:[%s5335_s0 + $0x198] sm:$0xff] }
0x1ce9   :  { %3293 = vmatpush.msra.mxu0 %v3290_v45 }
0x1cea   :  { %3263 = vmatpush.msrb.mxu3 %v3235_v29  ;;  %v3285_v29 = vld [vmem:[%s5335_s0 + $0x170] sm:$0xff] }
0x1ceb   :  { %3294 = vmatpush.msra.mxu0 %v3289_v28 }
0x1cec   :  { %v456_v39 = vpop.permute.xlu2 %455  ;;  %3264 = vmatpush.msrb.mxu3 %v3234_v0  ;;  %v3284_v0 = vld [vmem:[%s5335_s0 + $0x168] sm:$0xff] }
0x1cee   :  { %3265 = vmatpush.msrb.mxu3 %v3233_v13  ;;  %v3282_v13 = vld [vmem:[%s5335_s0 + $0x158] sm:$0xff] }
0x1cef   :  { %886 = vrot.lane.b32.xlu0 %v812_v55, %s3859_s4  ;;  %2656 = vrot.lane.b32.xlu1 %v4909_v27, %s3860_s11 }
0x1cf4   :  { %v1326_v27 = vpop.permute.xlu2 %1325 }
0x1cf5   :  { %v1337_v42 = vsel %vm373_vm7, %v4352_v9, %v1326_v27 }
0x1cf7   :  { %1766 = vrot.lane.b32.xlu0 %v1693_v12, %s3859_s4  ;;  %v3287_v12 = vld [vmem:[%s5335_s0 + $0x180] sm:$0xff] }
0x1cfc   :  { %v1769_v47 = vpop.permute.xlu2 %1768 }
0x1cfd   :  { %v1779_v9 = vsel %vm373_vm7, %v4554_v38, %v1769_v47  ;;  %v3281_v47 = vld [vmem:[%s5335_s0 + $0x150] sm:$0xff] }
0x1cff   :  { %2209 = vrot.lane.b32.xlu0 %v2135_v44, %s3859_s4  ;;  %v3280_v44 = vld [vmem:[%s5335_s0 + $0x148] sm:$0xff] }
0x1d04   :  { %v2649_v34 = vpop.permute.xlu2 %2648 }
0x1d05   :  { %v2660_v38 = vsel %vm373_vm7, %v4867_v54, %v2649_v34  ;;  %v3278_v34 = vld [vmem:[%s5335_s0 + $0x138] sm:$0xff] }
0x1d07   :  { %3089 = vrot.lane.b32.xlu0 %v3016_v11, %s3859_s4  ;;  %v3277_v11 = vld [vmem:[%s5335_s0 + $0x130] sm:$0xff] }
0x1d0c   :  { %v3092_v10 = vpop.permute.xlu2 %3091 }
0x1d0d   :  { %v3102_v54 = vsel %vm373_vm7, %v4960_v46, %v3092_v10  ;;  %v3276_v10 = vld [vmem:[%s5335_s0 + $0x128] sm:$0xff] }
0x1d0f   :  { %892 = vrot.lane.b32.xlu0 %v5365_v21, %s3860_s11 }
0x1d14   :  { %v1332_v49 = vpop.permute.xlu2 %1331 }
0x1d15   :  { %v1339_v58 = vsel %vm461_vm11, %v1337_v42, %v1332_v49  ;;  %v3275_v49 = vld [vmem:[%s5335_s0 + $0x120] sm:$0xff] }
0x1d16   :  { %3399 = vst.msk [vmem:[%s5336_s1 + $0x20] sm:$0xff] %vm464_vm12, %v1339_v58 }
0x1d17   :  { %1772 = vrot.lane.b32.xlu0 %v5366_v36, %s3860_s11 }
0x1d19   :  { %v3226_v57 = vpop.permute.xlu1 %3225 }
0x1d1a   :  { %v3231_v63 = vsel %vm131_vm10, %v4897_v56, %v3226_v57 }
0x1d1b   :  { %3497 = vmatmul.msk.f32.vlgmr.msrb.gmra.mxu3 %vm3243_vm13, %v3231_v63 }
0x1d1c   :  { %v1775_v5 = vpop.permute.xlu2 %1774 }
0x1d1d   :  { %v1781_v24 = vsel %vm461_vm11, %v1779_v9, %v1775_v5 }
0x1d1e   :  { %3423 = vst.msk [vmem:[%s5336_s1 + $0x38] sm:$0x3] %vm466_vm9, %v1781_v24 }
0x1d1f   :  { %2215 = vrot.lane.b32.xlu0 %v5367_v7, %s3860_s11 }
0x1d21   :  { %v450_v37 = vpop.permute.xlu1 %449 }
0x1d22   :  { %v460_v56 = vsel %vm373_vm7, %v4059_v52, %v450_v37 }
0x1d23   :  { %v463_v4 = vsel %vm461_vm11, %v460_v56, %v456_v39 }
0x1d24   :  { %467 = vst.msk [vmem:[%s5336_s1 + $0x8] sm:$0x3] %vm466_vm9, %v463_v4  ;;  %v2655_v62 = vpop.permute.xlu2 %2654 }
0x1d25   :  { %v2662_v18 = vsel %vm461_vm11, %v2660_v38, %v2655_v62 }
0x1d26   :  { %3468 = vst.msk [vmem:[%s5336_s1 + $0x50] sm:$0xff] %vm464_vm12, %v2662_v18 }
0x1d27   :  { %3095 = vrot.lane.b32.xlu0 %v4974_v32, %s3860_s11 }
0x1d29   :  { %v885_v52 = vpop.permute.xlu1 %884 }
0x1d2a   :  { %v896_v8 = vsel %vm373_vm7, %v4173_v6, %v885_v52  ;;  %v459_v6 = vsel %vm373_vm7, %v4037_v35, %v5114_v41 }
0x1d2c   :  { %v3098_v16 = vpop.permute.xlu2 %3097 }
0x1d2d   :  { %v3104_v15 = vsel %vm461_vm11, %v3102_v54, %v3098_v16 }
0x1d2e   :  { %3492 = vst.msk [vmem:[%s5336_s1 + $0x68] sm:$0x3] %vm466_vm9, %v3104_v15 }
0x1d31   :  { %v1328_v2 = vpop.permute.xlu1 %1327 }
0x1d32   :  { %v1338_v46 = vsel %vm373_vm7, %v4368_v26, %v1328_v2 }
0x1d39   :  { %v2208_v20 = vpop.permute.xlu1 %2207 }
0x1d3a   :  { %v2219_v26 = vsel %vm373_vm7, %v4705_v48, %v2208_v20 }
0x1d41   :  { %v2651_v40 = vpop.permute.xlu1 %2650 }
0x1d42   :  { %v2661_v35 = vsel %vm373_vm7, %v4886_v60, %v2651_v40  ;;  %v3288_v60 = vld [vmem:[%s5335_s0 + $0x188] sm:$0xff] }
0x1d43   :  { %3295 = vmatpush.msra.mxu0 %v3288_v60 }
0x1d45   :  { %3296 = vmatpush.msra.mxu0 %v3287_v12 }
0x1d47   :  { %3297 = vmatpush.msra.mxu0 %v3286_v31 }
0x1d49   :  { %v891_v39 = vpop.permute.xlu1 %890  ;;  %3298 = vmatpush.msra.mxu0 %v3285_v29 }
0x1d4a   :  { %v898_v32 = vsel %vm461_vm11, %v896_v8, %v891_v39 }
0x1d4b   :  { %3376 = vst.msk [vmem:[%s5336_s1 + $0x10] sm:$0xff] %vm464_vm12, %v898_v32  ;;  %3299 = vmatpush.msra.mxu0 %v3284_v0 }
0x1d4d   :  { %3300 = vmatpush.msra.mxu0 %v3283_v43 }
0x1d4f   :  { %3301 = vmatpush.msra.mxu0 %v3282_v13 }
0x1d51   :  { %v3228_v61 = vpop.permute.xlu0 %3227  ;;  %v1334_v55 = vpop.permute.xlu1 %1333  ;;  %3302 = vmatpush.msra.mxu0 %v3281_v47 }
0x1d52   :  { %v1340_v1 = vsel %vm461_vm11, %v1338_v46, %v1334_v55  ;;  %v3232_v51 = vsel %vm131_vm10, %v4895_v33, %v3228_v61  ;;  %vm3318_vm10 = vcmask 326656  }
0x1d53   :  { %3400 = vst.msk [vmem:[%s5336_s1 + $0x28] sm:$0x3] %vm466_vm9, %v1340_v1  ;;  %3498 = vmatmul.msk.f32.gmra.mxu3 %vm3243_vm13, %v3232_v51  ;;  %3303 = vmatpush.msra.mxu0 %v3280_v44 }
0x1d55   :  { %3304 = vmatpush.msra.mxu0 %v3279_v19 }
0x1d57   :  { %3305 = vmatpush.msra.mxu0 %v3278_v34 }
0x1d59   :  { %v454_v14 = vpop.permute.xlu0 %453  ;;  %v2214_v59 = vpop.permute.xlu1 %2213  ;;  %3306 = vmatpush.msra.mxu0 %v3277_v11 }
0x1d5a   :  { %v462_v23 = vsel %vm461_vm11, %v459_v6, %v454_v14  ;;  %v2221_v33 = vsel %vm461_vm11, %v2219_v26, %v2214_v59 }
0x1d5b   :  { %465 = vst.msk [vmem:[%s5336_s1] sm:$0xff] %vm464_vm12, %v462_v23  ;;  %3307 = vmatpush.msra.mxu0 %v3276_v10 }
0x1d5c   :  { %3445 = vst.msk [vmem:[%s5336_s1 + $0x40] sm:$0xff] %vm464_vm12, %v2221_v33 }
0x1d5d   :  { %3308 = vmatpush.msra.mxu0 %v3275_v49 }
0x1d61   :  { %v887_v48 = vpop.permute.xlu0 %886  ;;  %v2657_v41 = vpop.permute.xlu1 %2656 }
0x1d62   :  { %v2663_v53 = vsel %vm461_vm11, %v2661_v35, %v2657_v41  ;;  %v897_v21 = vsel %vm373_vm7, %v5362_v50, %v887_v48 }
0x1d63   :  { %3469 = vst.msk [vmem:[%s5336_s1 + $0x58] sm:$0x3] %vm466_vm9, %v2663_v53 }
0x1d69   :  { %v1767_v27 = vpop.permute.xlu0 %1766 }
0x1d6a   :  { %v1778_v36 = vsel %vm373_vm7, %v5363_v22, %v1767_v27 }
0x1d71   :  { %v2210_v30 = vpop.permute.xlu0 %2209 }
0x1d72   :  { %v2220_v63 = vsel %vm373_vm7, %v5364_v3, %v2210_v30  ;;  %v3513_v3 = vld [vmem:[%s5335_s0 + $0x118] ss:$0 sm:$0xff] }
0x1d79   :  { %v3090_v17 = vpop.permute.xlu0 %3089 }
0x1d7a   :  { %v3101_v22 = vsel %vm373_vm7, %v4955_v25, %v3090_v17  ;;  %v3514_v25 = vld [vmem:[%s5335_s0 + $0x1a0] ss:$0 sm:$0xff]  ;;  %vm3320_vm7 = vcmask 320512  }
0x1d81   :  { %v893_v42 = vpop.permute.xlu0 %892 }
0x1d82   :  { %v899_v58 = vsel %vm461_vm11, %v897_v21, %v893_v42 }
0x1d83   :  { %3377 = vst.msk [vmem:[%s5336_s1 + $0x18] sm:$0x3] %vm466_vm9, %v899_v58 }
0x1d89   :  { %v1773_v57 = vpop.permute.xlu0 %1772 }
0x1d8a   :  { %v1780_v50 = vsel %vm461_vm11, %v1778_v36, %v1773_v57 }
0x1d8b   :  { %3422 = vst.msk [vmem:[%s5336_s1 + $0x30] sm:$0xff] %vm464_vm12, %v1780_v50 }
0x1d91   :  { %v2216_v9 = vpop.permute.xlu0 %2215 }
0x1d92   :  { %v2222_v5 = vsel %vm461_vm11, %v2220_v63, %v2216_v9 }
0x1d93   :  { %3446 = vst.msk [vmem:[%s5336_s1 + $0x48] sm:$0x3] %vm466_vm9, %v2222_v5 }
0x1d99   :  { %v3096_v24 = vpop.permute.xlu0 %3095 }
0x1d9a   :  { %v3103_v7 = vsel %vm461_vm11, %v3101_v22, %v3096_v24 }
0x1d9b   :  { %3491 = vst.msk [vmem:[%s5336_s1 + $0x60] sm:$0xff] %vm464_vm12, %v3103_v7 }
0x1d9e   :  { %v3267_v37 = vpop.f32.mrf.mxu3 }
0x1d9f   :  { %v3268_v56 = vadd.f32 %v3513_v3, %v3267_v37 }
0x1da1   :  { %v3273_v4 = vmax.f32 %v3268_v56, 0.0 }
0x1da3   :  { %3309 = vmatmul.f32.vlgmr.msra.gmra.mxu0 %v3273_v4 }
0x1dd6   :  { %v3270_v38 = vpop.f32.mrf.mxu3 }
0x1dd7   :  { %v3271_v62 = vadd.f32 %v3513_v3, %v3270_v38 }
0x1dd9   :  { %v3274_v18 = vmax.f32 %v3271_v62, 0.0 }
0x1ddb   :  { %3312 = vmatmul.f32.gmra.mxu0 %v3274_v18 }
0x1e20   :  { %v3310_v52 = vpop.f32.mrf.mxu0 }
0x1e21   :  { %v3311_v54 = vadd.f32 %v3514_v25, %v3310_v52 }
0x1e23   :  { %v3316_v16 = vmax.f32 %v3311_v54, 0.0 }
0x1e25   :  { %3319 = vst.msk [vmem:[%s5337_s2] sm:$0xff] %vm3318_vm10, %v3316_v16 }
0x1e58   :  { %v3313_v15 = vpop.f32.mrf.mxu0 }
0x1e59   :  { %v3314_v2 = vadd.f32 %v3514_v25, %v3313_v15 }
0x1e5b   :  { %v3317_v20 = vmax.f32 %v3314_v2, 0.0 }
0x1e5d   :  { %3321 = vst.msk [vmem:[%s5337_s2 + $0x8] sm:$0x3] %vm3320_vm7, %v3317_v20 }

</bundles_post_ra>
